<compile_context>
chip_gen: v5e
topology: v5e:2x2
jax: 0.10.0
libtpu: 0.0.40
codegen_flags: <defaults>
</compile_context>

<pallas_src>
import functools

import jax
import jax.numpy as jnp
from jax.experimental import pallas as pl
from jax.experimental.pallas import tpu as pltpu

EPS = 1e-5                      # nn.InstanceNorm3d default
COMPUTE_DTYPE = jnp.bfloat16    # matmul input dtype (f32 accumulation)


def _kpad(k):
    """Round the contraction dim up to a multiple of 16 (bf16 sublane pack)."""
    return ((k + 15) // 16) * 16


# --------------------------------------------------------------------------
# Pallas kernel: fused split-K matmul + bias + InstanceNorm + PReLU.
# Output block is (Cout, P) with P (flattened spatial) on lanes.
# --------------------------------------------------------------------------
def _conv_block_kernel(*args, n_src, norm_act):
    p_refs = args[:n_src]                    # each (1, Kp_i, P)   bf16
    w_refs = args[n_src:2 * n_src]           # each (C,  Kp_i)     bf16
    b_ref, a_ref, o_ref = args[2 * n_src:]   # (C,1) f32, (1,) SMEM f32, (1,C,P)

    y = jnp.dot(w_refs[0][...], p_refs[0][0],
                preferred_element_type=jnp.float32)
    for i in range(1, n_src):                # fused skip-concat: split-K accumulate
        y = y + jnp.dot(w_refs[i][...], p_refs[i][0],
                        preferred_element_type=jnp.float32)
    y = y + b_ref[...]                       # (C, P) + (C, 1)

    if norm_act:
        # InstanceNorm3d (affine=False): per sample, per channel over spatial.
        mean = jnp.mean(y, axis=1, keepdims=True)
        var = jnp.mean(jnp.square(y - mean), axis=1, keepdims=True)
        y = (y - mean) * jax.lax.rsqrt(var + EPS)
        a = a_ref[0]                         # PReLU single shared parameter
        y = jnp.where(y >= 0.0, y, a * y)

    o_ref[0] = y.astype(o_ref.dtype)


def pallas_conv(patches_list, w_list, bias, prelu_a, *, norm_act):
    """patches_list[i]: (N, Kp_i, P) bf16; w_list[i]: (C, Kp_i) bf16;
    bias: (C, 1) f32; prelu_a: (1,) f32  ->  (N, C, P) f32."""
    n_src = len(patches_list)
    N, _, P = patches_list[0].shape
    C = w_list[0].shape[0]

    kernel = functools.partial(_conv_block_kernel, n_src=n_src, norm_act=norm_act)

    in_specs = []
    for p in patches_list:
        in_specs.append(pl.BlockSpec((1, p.shape[1], P), lambda n: (n, 0, 0)))
    for w in w_list:
        in_specs.append(pl.BlockSpec(w.shape, lambda n: (0, 0)))
    in_specs.append(pl.BlockSpec((C, 1), lambda n: (0, 0)))
    in_specs.append(pl.BlockSpec(memory_space=pltpu.MemorySpace.SMEM))

    flops = int(sum(2 * N * P * p.shape[1] * C for p in patches_list))
    bytes_accessed = int(
        sum(p.size * p.dtype.itemsize for p in patches_list)
        + sum(w.size * w.dtype.itemsize for w in w_list)
        + bias.size * 4 + 4 + N * C * P * 4)
    cost = pl.CostEstimate(flops=flops,
                           transcendentals=int(N * C) if norm_act else 0,
                           bytes_accessed=bytes_accessed)

    return pl.pallas_call(
        kernel,
        out_shape=jax.ShapeDtypeStruct((N, C, P), jnp.float32),
        grid=(N,),
        in_specs=in_specs,
        out_specs=pl.BlockSpec((1, C, P), lambda n: (n, 0, 0)),
        compiler_params=pltpu.CompilerParams(
            dimension_semantics=("parallel",),
            vmem_limit_bytes=32 * 1024 * 1024),
        cost_estimate=cost,
    )(*patches_list, *w_list, bias, prelu_a)


# --------------------------------------------------------------------------
# XLA glue: transposed (lane-dense) im2col. Channels-first throughout, so no
# NCDHW<->NDHWC transposes are ever needed.
# --------------------------------------------------------------------------
def _im2col_T(xp, stride, out_dhw, k_pad):
    """xp: (N, C, Dp, Hp, Wp) padded (and dilated for transpose convs).
    Returns (N, k_pad, Do*Ho*Wo): K = (tap, cin) on sublanes, spatial on lanes."""
    N, C = xp.shape[:2]
    Do, Ho, Wo = out_dhw
    taps = []
    for kd in range(3):
        for kh in range(3):
            for kw in range(3):
                taps.append(
                    xp[:, :,
                       kd:kd + (Do - 1) * stride + 1:stride,
                       kh:kh + (Ho - 1) * stride + 1:stride,
                       kw:kw + (Wo - 1) * stride + 1:stride])
    p = jnp.stack(taps, axis=1)                    # (N, 27, C, Do, Ho, Wo)
    p = p.reshape(N, 27 * C, Do * Ho * Wo)
    if k_pad > 27 * C:
        p = jnp.pad(p, ((0, 0), (0, k_pad - 27 * C), (0, 0)))
    return p


def conv3d_block(x, w_mat, bias, prelu_a, *, stride, norm_act):
    """Conv3d(k=3, p=1, stride) [+ InstanceNorm + PReLU]. x: (N, Cin, D, H, W)."""
    N, Cin, D, H, W = x.shape
    Do = (D + 2 - 3) // stride + 1
    Ho = (H + 2 - 3) // stride + 1
    Wo = (W + 2 - 3) // stride + 1
    xp = jnp.pad(x.astype(COMPUTE_DTYPE),
                 ((0, 0), (0, 0), (1, 1), (1, 1), (1, 1)))
    patches = _im2col_T(xp, stride, (Do, Ho, Wo), w_mat.shape[1])
    y = pallas_conv([patches], [w_mat], bias, prelu_a, norm_act=norm_act)
    return y.reshape(N, -1, Do, Ho, Wo)


def conv_transpose3d_fused(x_list, w_mat_list, bias, prelu_a, *, stride, norm_act):
    """ConvTranspose3d(k=3, p=1, output_padding=stride-1, stride) applied to the
    channel-concat of x_list, with the concat fused as split-K accumulation.
    Lowered via zero-dilation + spatially-flipped kernel => stride-1 conv.
    Assumes k=3, padding=1, output_padding=stride-1 (the MONAI UNet up path)."""
    assert stride in (1, 2)
    N, _, D, H, W = x_list[0].shape
    Do, Ho, Wo = D * stride, H * stride, W * stride
    pad_lo, pad_hi = 1, 1 + (stride - 1)            # k-1-p, k-1-p+output_padding
    patches = []
    for x, w_mat in zip(x_list, w_mat_list):
        x = x.astype(COMPUTE_DTYPE)
        Ci = x.shape[1]
        if stride > 1:
            xd = jnp.zeros((N, Ci, (D - 1) * stride + 1, (H - 1) * stride + 1,
                            (W - 1) * stride + 1), x.dtype)
            xd = xd.at[:, :, ::stride, ::stride, ::stride].set(x)
        else:
            xd = x
        xp = jnp.pad(xd, ((0, 0), (0, 0), (pad_lo, pad_hi),
                          (pad_lo, pad_hi), (pad_lo, pad_hi)))
        patches.append(_im2col_T(xp, 1, (Do, Ho, Wo), w_mat.shape[1]))
    y = pallas_conv(patches, w_mat_list, bias, prelu_a, norm_act=norm_act)
    return y.reshape(N, -1, Do, Ho, Wo)


# --------------------------------------------------------------------------
# Full UNet forward (input/output in PyTorch NCDHW layout)
# --------------------------------------------------------------------------
def monai_unet_forward(x_ncdhw, q):
    x1 = conv3d_block(x_ncdhw, q["down0_w"], q["down0_b"], q["down0_a"],
                      stride=2, norm_act=True)                       # (N, 4, 8,8,8)
    x2 = conv3d_block(x1, q["down1_w"], q["down1_b"], q["down1_a"],
                      stride=2, norm_act=True)                       # (N, 8, 4,4,4)
    xb = conv3d_block(x2, q["bottom_w"], q["bottom_b"], q["bottom_a"],
                      stride=1, norm_act=True)                       # (N,16, 4,4,4)
    # inner skip cat([x2, xb]) fused into up1 as split-K accumulation
    xu1 = conv_transpose3d_fused([x2, xb], [q["up1_w1"], q["up1_w2"]],
                                 q["up1_b"], q["up1_a"],
                                 stride=2, norm_act=True)            # (N, 4, 8,8,8)
    # outer skip cat([x1, xu1]); top up layer is conv_only (no norm/act)
    y = conv_transpose3d_fused([x1, xu1], [q["up0_w1"], q["up0_w2"]],
                               q["up0_b"], q["up0_a"],
                               stride=2, norm_act=False)             # (N, 2,16,16,16)
    return y


# --------------------------------------------------------------------------
# One-time parameter preparation (weight plumbing hoisted out of forward)
# --------------------------------------------------------------------------
def _pack_conv_w(w_eq):
    """w_eq: forward-conv orientation (Cout, Cin, 3,3,3) ->
    (Cout, kpad(27*Cin)) bf16 with K ordered (tap, cin) to match _im2col_T."""
    cout, cin = w_eq.shape[:2]
    k = 27 * cin
    wm = jnp.transpose(w_eq, (0, 2, 3, 4, 1)).reshape(cout, k)
    wm = jnp.pad(wm, ((0, 0), (0, _kpad(k) - k)))
    return wm.astype(COMPUTE_DTYPE)


def prepare_params(p):
    q = {}
    for name in ("down0", "down1", "bottom"):
        q[f"{name}_w"] = _pack_conv_w(p[f"{name}_w"])
        q[f"{name}_b"] = p[f"{name}_b"].reshape(-1, 1).astype(jnp.float32)
        q[f"{name}_a"] = p[f"{name}_a"].astype(jnp.float32)

    def t_eq(w_t):  # ConvTranspose3d (Cin,Cout,3,3,3) -> equivalent forward conv weight
        return jnp.transpose(jnp.flip(w_t, axis=(2, 3, 4)), (1, 0, 2, 3, 4))

    up1 = t_eq(p["up1_w"])                    # (4, 24, 3,3,3); concat order [x2(8), xb(16)]
    q["up1_w1"] = _pack_conv_w(up1[:, :8])
    q["up1_w2"] = _pack_conv_w(up1[:, 8:])
    q["up1_b"] = p["up1_b"].reshape(-1, 1).astype(jnp.float32)
    q["up1_a"] = p["up1_a"].astype(jnp.float32)

    up0 = t_eq(p["up0_w"])                    # (2, 8, 3,3,3); concat order [x1(4), xu1(4)]
    q["up0_w1"] = _pack_conv_w(up0[:, :4])
    q["up0_w2"] = _pack_conv_w(up0[:, 4:])
    q["up0_b"] = p["up0_b"].reshape(-1, 1).astype(jnp.float32)
    q["up0_a"] = p["up0_a"].astype(jnp.float32)
    return q


# --------------------------------------------------------------------------
# Deterministic synthetic parameter init (kaiming-style normal, zero bias)
# --------------------------------------------------------------------------
def init_params(key):
    def kaiming(k, shape, fan_in):
        return jax.random.normal(k, shape, jnp.float32) * jnp.sqrt(2.0 / fan_in)

    ks = jax.random.split(key, 5)
    prelu = jnp.full((1,), 0.25, jnp.float32)  # nn.PReLU default init
    return {
        # Conv3d weights: (Cout, Cin, 3, 3, 3)
        "down0_w": kaiming(ks[0], (4, 1, 3, 3, 3), 1 * 27),
        "down0_b": jnp.zeros((4,), jnp.float32),
        "down0_a": prelu,
        "down1_w": kaiming(ks[1], (8, 4, 3, 3, 3), 4 * 27),
        "down1_b": jnp.zeros((8,), jnp.float32),
        "down1_a": prelu,
        "bottom_w": kaiming(ks[2], (16, 8, 3, 3, 3), 8 * 27),
        "bottom_b": jnp.zeros((16,), jnp.float32),
        "bottom_a": prelu,
        # ConvTranspose3d weights: (Cin, Cout, 3, 3, 3)
        "up1_w": kaiming(ks[3], (24, 4, 3, 3, 3), 4 * 27),
        "up1_b": jnp.zeros((4,), jnp.float32),
        "up1_a": prelu,
        "up0_w": kaiming(ks[4], (8, 2, 3, 3, 3), 2 * 27),
        "up0_b": jnp.zeros((2,), jnp.float32),
        "up0_a": prelu,  # unused (conv_only), kept for uniform kernel signature
    }


if __name__ == "__main__":
    key = jax.random.PRNGKey(0)
    pkey, xkey = jax.random.split(key)
    params = init_params(pkey)
    prepped = prepare_params(params)          # one-time weight plumbing

    # Small input consistent with spatial_dims=3, in_channels=1 (NCDHW)
    x = jax.random.normal(xkey, (2, 1, 16, 16, 16), jnp.float32)

    fwd = jax.jit(monai_unet_forward)
    y = jax.block_until_ready(fwd(x, prepped))

    assert y.shape == (2, 2, 16, 16, 16), y.shape
    assert bool(jnp.all(jnp.isfinite(y)))
    print("KERNEL_OK")
</pallas_src>

<mosaic_0001>
module attributes {stable_mosaic.version = 11 : i64} {
  func.func @_conv_block_kernel(%arg0: i32, %arg1: memref<1x32x512xbf16, #tpu.memory_space<vmem>>, %arg2: memref<4x32xbf16, #tpu.memory_space<vmem>>, %arg3: memref<4x1xf32, #tpu.memory_space<vmem>>, %arg4: memref<1xf32, #tpu.memory_space<smem>>, %arg5: memref<1x4x512xf32, #tpu.memory_space<vmem>>) attributes {dimension_semantics = [#tpu.dimension_semantics<parallel>], iteration_bounds = array<i64: 2>, scalar_prefetch = 0 : i64, scratch_operands = 0 : i64, tpu.core_type = #tpu.core_type<tc>, window_params = [{transform_indices = @transform_0, window_bounds = array<i64: 1, 32, 512>}, {pipeline_mode = #tpu.pipeline_mode<synchronous>, transform_indices = @transform_1, window_bounds = array<i64: 4, 32>}, {pipeline_mode = #tpu.pipeline_mode<synchronous>, transform_indices = @transform_2, window_bounds = array<i64: 4, 1>}, {transform_indices = @transform_3, window_bounds = array<i64: 1>}, {transform_indices = @transform_4, window_bounds = array<i64: 1, 4, 512>}]} {
    %c0 = arith.constant 0 : index
    %c0_0 = arith.constant 0 : index
    %0 = vector.load %arg2[%c0, %c0_0] : memref<4x32xbf16, #tpu.memory_space<vmem>>, vector<4x32xbf16>
    %c0_1 = arith.constant 0 : index
    %c0_2 = arith.constant 0 : index
    %c0_3 = arith.constant 0 : index
    %1 = vector.load %arg1[%c0_1, %c0_2, %c0_3] : memref<1x32x512xbf16, #tpu.memory_space<vmem>>, vector<1x32x512xbf16>
    %2 = vector.shape_cast %1 : vector<1x32x512xbf16> to vector<32x512xbf16>
    %cst = arith.constant dense<0.000000e+00> : vector<4x512xf32>
    %3 = tpu.matmul %0, %2, %cst {dimension_numbers = #tpu.dot_dimension_numbers<[1], [0], [0], [1], [0, 0, 1, 1], [], []>} : vector<4x32xbf16>, vector<32x512xbf16>, vector<4x512xf32> -> vector<4x512xf32>
    %c0_4 = arith.constant 0 : index
    %c0_5 = arith.constant 0 : index
    %4 = vector.load %arg3[%c0_4, %c0_5] : memref<4x1xf32, #tpu.memory_space<vmem>>, vector<4x1xf32>
    %5 = vector.broadcast %4 : vector<4x1xf32> to vector<4x512xf32>
    %6 = arith.addf %3, %5 : vector<4x512xf32>
    %cst_6 = arith.constant dense<0.000000e+00> : vector<4xf32>
    %7 = vector.multi_reduction <add>, %6, %cst_6 [1] : vector<4x512xf32> to vector<4xf32>
    %8 = vector.shape_cast %7 : vector<4xf32> to vector<4x1xf32>
    %cst_7 = arith.constant 5.120000e+02 : f32
    %9 = vector.broadcast %cst_7 : f32 to vector<4x1xf32>
    %10 = arith.divf %8, %9 : vector<4x1xf32>
    %11 = vector.broadcast %10 : vector<4x1xf32> to vector<4x512xf32>
    %12 = arith.subf %6, %11 : vector<4x512xf32>
    %13 = arith.mulf %12, %12 : vector<4x512xf32>
    %cst_8 = arith.constant dense<0.000000e+00> : vector<4xf32>
    %14 = vector.multi_reduction <add>, %13, %cst_8 [1] : vector<4x512xf32> to vector<4xf32>
    %15 = vector.shape_cast %14 : vector<4xf32> to vector<4x1xf32>
    %cst_9 = arith.constant 5.120000e+02 : f32
    %16 = vector.broadcast %cst_9 : f32 to vector<4x1xf32>
    %17 = arith.divf %15, %16 : vector<4x1xf32>
    %18 = vector.broadcast %10 : vector<4x1xf32> to vector<4x512xf32>
    %19 = arith.subf %6, %18 : vector<4x512xf32>
    %cst_10 = arith.constant 9.99999974E-6 : f32
    %20 = vector.broadcast %cst_10 : f32 to vector<4x1xf32>
    %21 = arith.addf %17, %20 : vector<4x1xf32>
    %22 = math.rsqrt %21 : vector<4x1xf32>
    %23 = vector.broadcast %22 : vector<4x1xf32> to vector<4x512xf32>
    %24 = arith.mulf %19, %23 : vector<4x512xf32>
    %c0_11 = arith.constant 0 : index
    %25 = memref.load %arg4[%c0_11] : memref<1xf32, #tpu.memory_space<smem>>
    %cst_12 = arith.constant 0.000000e+00 : f32
    %26 = vector.broadcast %cst_12 : f32 to vector<4x512xf32>
    %27 = arith.cmpf oge, %24, %26 : vector<4x512xf32>
    %28 = vector.broadcast %25 : f32 to vector<4x512xf32>
    %29 = arith.mulf %28, %24 : vector<4x512xf32>
    %30 = arith.select %27, %24, %29 : vector<4x512xi1>, vector<4x512xf32>
    %c0_13 = arith.constant 0 : index
    %c0_14 = arith.constant 0 : index
    %c0_15 = arith.constant 0 : index
    %31 = vector.load %arg5[%c0_13, %c0_14, %c0_15] : memref<1x4x512xf32, #tpu.memory_space<vmem>>, vector<1x4x512xf32>
    %32 = vector.shape_cast %31 : vector<1x4x512xf32> to vector<4x512xf32>
    %33 = vector.shape_cast %30 : vector<4x512xf32> to vector<1x4x512xf32>
    tpu.vector_store %arg5[%c0_13, %c0_14, %c0_15], %33 {strides = array<i32>} : memref<1x4x512xf32, #tpu.memory_space<vmem>>, vector<1x4x512xf32>,
    return
  }
  func.func @transform_0(%arg0: i32) -> (i32, i32, i32) {
    %c0_i32 = arith.constant 0 : i32
    %c0_i32_0 = arith.constant 0 : i32
    %c0_i32_1 = arith.constant 0 : i32
    return %arg0, %c0_i32, %c0_i32_0 : i32, i32, i32
  }
  func.func @transform_1(%arg0: i32) -> (i32, i32) {
    %c0_i32 = arith.constant 0 : i32
    %c0_i32_0 = arith.constant 0 : i32
    %c0_i32_1 = arith.constant 0 : i32
    return %c0_i32, %c0_i32_0 : i32, i32
  }
  func.func @transform_2(%arg0: i32) -> (i32, i32) {
    %c0_i32 = arith.constant 0 : i32
    %c0_i32_0 = arith.constant 0 : i32
    %c0_i32_1 = arith.constant 0 : i32
    return %c0_i32, %c0_i32_0 : i32, i32
  }
  func.func @transform_3(%arg0: i32) -> i32 {
    %c0_i32 = arith.constant 0 : i32
    %c0_i32_0 = arith.constant 0 : i32
    return %c0_i32 : i32
  }
  func.func @transform_4(%arg0: i32) -> (i32, i32, i32) {
    %c0_i32 = arith.constant 0 : i32
    %c0_i32_0 = arith.constant 0 : i32
    %c0_i32_1 = arith.constant 0 : i32
    return %arg0, %c0_i32, %c0_i32_0 : i32, i32, i32
  }
}

module attributes {stable_mosaic.version = 11 : i64} {
  func.func @_conv_block_kernel(%arg0: i32, %arg1: memref<1x112x64xbf16, #tpu.memory_space<vmem>>, %arg2: memref<8x112xbf16, #tpu.memory_space<vmem>>, %arg3: memref<8x1xf32, #tpu.memory_space<vmem>>, %arg4: memref<1xf32, #tpu.memory_space<smem>>, %arg5: memref<1x8x64xf32, #tpu.memory_space<vmem>>) attributes {dimension_semantics = [#tpu.dimension_semantics<parallel>], iteration_bounds = array<i64: 2>, scalar_prefetch = 0 : i64, scratch_operands = 0 : i64, tpu.core_type = #tpu.core_type<tc>, window_params = [{transform_indices = @transform_0, window_bounds = array<i64: 1, 112, 64>}, {pipeline_mode = #tpu.pipeline_mode<synchronous>, transform_indices = @transform_1, window_bounds = array<i64: 8, 112>}, {pipeline_mode = #tpu.pipeline_mode<synchronous>, transform_indices = @transform_2, window_bounds = array<i64: 8, 1>}, {transform_indices = @transform_3, window_bounds = array<i64: 1>}, {transform_indices = @transform_4, window_bounds = array<i64: 1, 8, 64>}]} {
    %c0 = arith.constant 0 : index
    %c0_0 = arith.constant 0 : index
    %0 = vector.load %arg2[%c0, %c0_0] : memref<8x112xbf16, #tpu.memory_space<vmem>>, vector<8x112xbf16>
    %c0_1 = arith.constant 0 : index
    %c0_2 = arith.constant 0 : index
    %c0_3 = arith.constant 0 : index
    %1 = vector.load %arg1[%c0_1, %c0_2, %c0_3] : memref<1x112x64xbf16, #tpu.memory_space<vmem>>, vector<1x112x64xbf16>
    %2 = vector.shape_cast %1 : vector<1x112x64xbf16> to vector<112x64xbf16>
    %cst = arith.constant dense<0.000000e+00> : vector<8x64xf32>
    %3 = tpu.matmul %0, %2, %cst {dimension_numbers = #tpu.dot_dimension_numbers<[1], [0], [0], [1], [0, 0, 1, 1], [], []>} : vector<8x112xbf16>, vector<112x64xbf16>, vector<8x64xf32> -> vector<8x64xf32>
    %c0_4 = arith.constant 0 : index
    %c0_5 = arith.constant 0 : index
    %4 = vector.load %arg3[%c0_4, %c0_5] : memref<8x1xf32, #tpu.memory_space<vmem>>, vector<8x1xf32>
    %5 = vector.broadcast %4 : vector<8x1xf32> to vector<8x64xf32>
    %6 = arith.addf %3, %5 : vector<8x64xf32>
    %cst_6 = arith.constant dense<0.000000e+00> : vector<8xf32>
    %7 = vector.multi_reduction <add>, %6, %cst_6 [1] : vector<8x64xf32> to vector<8xf32>
    %8 = vector.shape_cast %7 : vector<8xf32> to vector<8x1xf32>
    %cst_7 = arith.constant 6.400000e+01 : f32
    %9 = vector.broadcast %cst_7 : f32 to vector<8x1xf32>
    %10 = arith.divf %8, %9 : vector<8x1xf32>
    %11 = vector.broadcast %10 : vector<8x1xf32> to vector<8x64xf32>
    %12 = arith.subf %6, %11 : vector<8x64xf32>
    %13 = arith.mulf %12, %12 : vector<8x64xf32>
    %cst_8 = arith.constant dense<0.000000e+00> : vector<8xf32>
    %14 = vector.multi_reduction <add>, %13, %cst_8 [1] : vector<8x64xf32> to vector<8xf32>
    %15 = vector.shape_cast %14 : vector<8xf32> to vector<8x1xf32>
    %cst_9 = arith.constant 6.400000e+01 : f32
    %16 = vector.broadcast %cst_9 : f32 to vector<8x1xf32>
    %17 = arith.divf %15, %16 : vector<8x1xf32>
    %18 = vector.broadcast %10 : vector<8x1xf32> to vector<8x64xf32>
    %19 = arith.subf %6, %18 : vector<8x64xf32>
    %cst_10 = arith.constant 9.99999974E-6 : f32
    %20 = vector.broadcast %cst_10 : f32 to vector<8x1xf32>
    %21 = arith.addf %17, %20 : vector<8x1xf32>
    %22 = math.rsqrt %21 : vector<8x1xf32>
    %23 = vector.broadcast %22 : vector<8x1xf32> to vector<8x64xf32>
    %24 = arith.mulf %19, %23 : vector<8x64xf32>
    %c0_11 = arith.constant 0 : index
    %25 = memref.load %arg4[%c0_11] : memref<1xf32, #tpu.memory_space<smem>>
    %cst_12 = arith.constant 0.000000e+00 : f32
    %26 = vector.broadcast %cst_12 : f32 to vector<8x64xf32>
    %27 = arith.cmpf oge, %24, %26 : vector<8x64xf32>
    %28 = vector.broadcast %25 : f32 to vector<8x64xf32>
    %29 = arith.mulf %28, %24 : vector<8x64xf32>
    %30 = arith.select %27, %24, %29 : vector<8x64xi1>, vector<8x64xf32>
    %c0_13 = arith.constant 0 : index
    %c0_14 = arith.constant 0 : index
    %c0_15 = arith.constant 0 : index
    %31 = vector.load %arg5[%c0_13, %c0_14, %c0_15] : memref<1x8x64xf32, #tpu.memory_space<vmem>>, vector<1x8x64xf32>
    %32 = vector.shape_cast %31 : vector<1x8x64xf32> to vector<8x64xf32>
    %33 = vector.shape_cast %30 : vector<8x64xf32> to vector<1x8x64xf32>
    tpu.vector_store %arg5[%c0_13, %c0_14, %c0_15], %33 {strides = array<i32>} : memref<1x8x64xf32, #tpu.memory_space<vmem>>, vector<1x8x64xf32>,
    return
  }
  func.func @transform_0(%arg0: i32) -> (i32, i32, i32) {
    %c0_i32 = arith.constant 0 : i32
    %c0_i32_0 = arith.constant 0 : i32
    %c0_i32_1 = arith.constant 0 : i32
    return %arg0, %c0_i32, %c0_i32_0 : i32, i32, i32
  }
  func.func @transform_1(%arg0: i32) -> (i32, i32) {
    %c0_i32 = arith.constant 0 : i32
    %c0_i32_0 = arith.constant 0 : i32
    %c0_i32_1 = arith.constant 0 : i32
    return %c0_i32, %c0_i32_0 : i32, i32
  }
  func.func @transform_2(%arg0: i32) -> (i32, i32) {
    %c0_i32 = arith.constant 0 : i32
    %c0_i32_0 = arith.constant 0 : i32
    %c0_i32_1 = arith.constant 0 : i32
    return %c0_i32, %c0_i32_0 : i32, i32
  }
  func.func @transform_3(%arg0: i32) -> i32 {
    %c0_i32 = arith.constant 0 : i32
    %c0_i32_0 = arith.constant 0 : i32
    return %c0_i32 : i32
  }
  func.func @transform_4(%arg0: i32) -> (i32, i32, i32) {
    %c0_i32 = arith.constant 0 : i32
    %c0_i32_0 = arith.constant 0 : i32
    %c0_i32_1 = arith.constant 0 : i32
    return %arg0, %c0_i32, %c0_i32_0 : i32, i32, i32
  }
}

module attributes {stable_mosaic.version = 11 : i64} {
  func.func @_conv_block_kernel(%arg0: i32, %arg1: memref<1x224x64xbf16, #tpu.memory_space<vmem>>, %arg2: memref<16x224xbf16, #tpu.memory_space<vmem>>, %arg3: memref<16x1xf32, #tpu.memory_space<vmem>>, %arg4: memref<1xf32, #tpu.memory_space<smem>>, %arg5: memref<1x16x64xf32, #tpu.memory_space<vmem>>) attributes {dimension_semantics = [#tpu.dimension_semantics<parallel>], iteration_bounds = array<i64: 2>, scalar_prefetch = 0 : i64, scratch_operands = 0 : i64, tpu.core_type = #tpu.core_type<tc>, window_params = [{transform_indices = @transform_0, window_bounds = array<i64: 1, 224, 64>}, {pipeline_mode = #tpu.pipeline_mode<synchronous>, transform_indices = @transform_1, window_bounds = array<i64: 16, 224>}, {pipeline_mode = #tpu.pipeline_mode<synchronous>, transform_indices = @transform_2, window_bounds = array<i64: 16, 1>}, {transform_indices = @transform_3, window_bounds = array<i64: 1>}, {transform_indices = @transform_4, window_bounds = array<i64: 1, 16, 64>}]} {
    %c0 = arith.constant 0 : index
    %c0_0 = arith.constant 0 : index
    %0 = vector.load %arg2[%c0, %c0_0] : memref<16x224xbf16, #tpu.memory_space<vmem>>, vector<16x224xbf16>
    %c0_1 = arith.constant 0 : index
    %c0_2 = arith.constant 0 : index
    %c0_3 = arith.constant 0 : index
    %1 = vector.load %arg1[%c0_1, %c0_2, %c0_3] : memref<1x224x64xbf16, #tpu.memory_space<vmem>>, vector<1x224x64xbf16>
    %2 = vector.shape_cast %1 : vector<1x224x64xbf16> to vector<224x64xbf16>
    %cst = arith.constant dense<0.000000e+00> : vector<16x64xf32>
    %3 = tpu.matmul %0, %2, %cst {dimension_numbers = #tpu.dot_dimension_numbers<[1], [0], [0], [1], [0, 0, 1, 1], [], []>} : vector<16x224xbf16>, vector<224x64xbf16>, vector<16x64xf32> -> vector<16x64xf32>
    %c0_4 = arith.constant 0 : index
    %c0_5 = arith.constant 0 : index
    %4 = vector.load %arg3[%c0_4, %c0_5] : memref<16x1xf32, #tpu.memory_space<vmem>>, vector<16x1xf32>
    %5 = vector.broadcast %4 : vector<16x1xf32> to vector<16x64xf32>
    %6 = arith.addf %3, %5 : vector<16x64xf32>
    %cst_6 = arith.constant dense<0.000000e+00> : vector<16xf32>
    %7 = vector.multi_reduction <add>, %6, %cst_6 [1] : vector<16x64xf32> to vector<16xf32>
    %8 = vector.shape_cast %7 : vector<16xf32> to vector<16x1xf32>
    %cst_7 = arith.constant 6.400000e+01 : f32
    %9 = vector.broadcast %cst_7 : f32 to vector<16x1xf32>
    %10 = arith.divf %8, %9 : vector<16x1xf32>
    %11 = vector.broadcast %10 : vector<16x1xf32> to vector<16x64xf32>
    %12 = arith.subf %6, %11 : vector<16x64xf32>
    %13 = arith.mulf %12, %12 : vector<16x64xf32>
    %cst_8 = arith.constant dense<0.000000e+00> : vector<16xf32>
    %14 = vector.multi_reduction <add>, %13, %cst_8 [1] : vector<16x64xf32> to vector<16xf32>
    %15 = vector.shape_cast %14 : vector<16xf32> to vector<16x1xf32>
    %cst_9 = arith.constant 6.400000e+01 : f32
    %16 = vector.broadcast %cst_9 : f32 to vector<16x1xf32>
    %17 = arith.divf %15, %16 : vector<16x1xf32>
    %18 = vector.broadcast %10 : vector<16x1xf32> to vector<16x64xf32>
    %19 = arith.subf %6, %18 : vector<16x64xf32>
    %cst_10 = arith.constant 9.99999974E-6 : f32
    %20 = vector.broadcast %cst_10 : f32 to vector<16x1xf32>
    %21 = arith.addf %17, %20 : vector<16x1xf32>
    %22 = math.rsqrt %21 : vector<16x1xf32>
    %23 = vector.broadcast %22 : vector<16x1xf32> to vector<16x64xf32>
    %24 = arith.mulf %19, %23 : vector<16x64xf32>
    %c0_11 = arith.constant 0 : index
    %25 = memref.load %arg4[%c0_11] : memref<1xf32, #tpu.memory_space<smem>>
    %cst_12 = arith.constant 0.000000e+00 : f32
    %26 = vector.broadcast %cst_12 : f32 to vector<16x64xf32>
    %27 = arith.cmpf oge, %24, %26 : vector<16x64xf32>
    %28 = vector.broadcast %25 : f32 to vector<16x64xf32>
    %29 = arith.mulf %28, %24 : vector<16x64xf32>
    %30 = arith.select %27, %24, %29 : vector<16x64xi1>, vector<16x64xf32>
    %c0_13 = arith.constant 0 : index
    %c0_14 = arith.constant 0 : index
    %c0_15 = arith.constant 0 : index
    %31 = vector.load %arg5[%c0_13, %c0_14, %c0_15] : memref<1x16x64xf32, #tpu.memory_space<vmem>>, vector<1x16x64xf32>
    %32 = vector.shape_cast %31 : vector<1x16x64xf32> to vector<16x64xf32>
    %33 = vector.shape_cast %30 : vector<16x64xf32> to vector<1x16x64xf32>
    tpu.vector_store %arg5[%c0_13, %c0_14, %c0_15], %33 {strides = array<i32>} : memref<1x16x64xf32, #tpu.memory_space<vmem>>, vector<1x16x64xf32>,
    return
  }
  func.func @transform_0(%arg0: i32) -> (i32, i32, i32) {
    %c0_i32 = arith.constant 0 : i32
    %c0_i32_0 = arith.constant 0 : i32
    %c0_i32_1 = arith.constant 0 : i32
    return %arg0, %c0_i32, %c0_i32_0 : i32, i32, i32
  }
  func.func @transform_1(%arg0: i32) -> (i32, i32) {
    %c0_i32 = arith.constant 0 : i32
    %c0_i32_0 = arith.constant 0 : i32
    %c0_i32_1 = arith.constant 0 : i32
    return %c0_i32, %c0_i32_0 : i32, i32
  }
  func.func @transform_2(%arg0: i32) -> (i32, i32) {
    %c0_i32 = arith.constant 0 : i32
    %c0_i32_0 = arith.constant 0 : i32
    %c0_i32_1 = arith.constant 0 : i32
    return %c0_i32, %c0_i32_0 : i32, i32
  }
  func.func @transform_3(%arg0: i32) -> i32 {
    %c0_i32 = arith.constant 0 : i32
    %c0_i32_0 = arith.constant 0 : i32
    return %c0_i32 : i32
  }
  func.func @transform_4(%arg0: i32) -> (i32, i32, i32) {
    %c0_i32 = arith.constant 0 : i32
    %c0_i32_0 = arith.constant 0 : i32
    %c0_i32_1 = arith.constant 0 : i32
    return %arg0, %c0_i32, %c0_i32_0 : i32, i32, i32
  }
}

module attributes {stable_mosaic.version = 11 : i64} {
  func.func @_conv_block_kernel(%arg0: i32, %arg1: memref<1x224x512xbf16, #tpu.memory_space<vmem>>, %arg2: memref<1x432x512xbf16, #tpu.memory_space<vmem>>, %arg3: memref<4x224xbf16, #tpu.memory_space<vmem>>, %arg4: memref<4x432xbf16, #tpu.memory_space<vmem>>, %arg5: memref<4x1xf32, #tpu.memory_space<vmem>>, %arg6: memref<1xf32, #tpu.memory_space<smem>>, %arg7: memref<1x4x512xf32, #tpu.memory_space<vmem>>) attributes {dimension_semantics = [#tpu.dimension_semantics<parallel>], iteration_bounds = array<i64: 2>, scalar_prefetch = 0 : i64, scratch_operands = 0 : i64, tpu.core_type = #tpu.core_type<tc>, window_params = [{transform_indices = @transform_0, window_bounds = array<i64: 1, 224, 512>}, {transform_indices = @transform_1, window_bounds = array<i64: 1, 432, 512>}, {pipeline_mode = #tpu.pipeline_mode<synchronous>, transform_indices = @transform_2, window_bounds = array<i64: 4, 224>}, {pipeline_mode = #tpu.pipeline_mode<synchronous>, transform_indices = @transform_3, window_bounds = array<i64: 4, 432>}, {pipeline_mode = #tpu.pipeline_mode<synchronous>, transform_indices = @transform_4, window_bounds = array<i64: 4, 1>}, {transform_indices = @transform_5, window_bounds = array<i64: 1>}, {transform_indices = @transform_6, window_bounds = array<i64: 1, 4, 512>}]} {
    %c0 = arith.constant 0 : index
    %c0_0 = arith.constant 0 : index
    %0 = vector.load %arg3[%c0, %c0_0] : memref<4x224xbf16, #tpu.memory_space<vmem>>, vector<4x224xbf16>
    %c0_1 = arith.constant 0 : index
    %c0_2 = arith.constant 0 : index
    %c0_3 = arith.constant 0 : index
    %1 = vector.load %arg1[%c0_1, %c0_2, %c0_3] : memref<1x224x512xbf16, #tpu.memory_space<vmem>>, vector<1x224x512xbf16>
    %2 = vector.shape_cast %1 : vector<1x224x512xbf16> to vector<224x512xbf16>
    %cst = arith.constant dense<0.000000e+00> : vector<4x512xf32>
    %3 = tpu.matmul %0, %2, %cst {dimension_numbers = #tpu.dot_dimension_numbers<[1], [0], [0], [1], [0, 0, 1, 1], [], []>} : vector<4x224xbf16>, vector<224x512xbf16>, vector<4x512xf32> -> vector<4x512xf32>
    %c0_4 = arith.constant 0 : index
    %c0_5 = arith.constant 0 : index
    %4 = vector.load %arg4[%c0_4, %c0_5] : memref<4x432xbf16, #tpu.memory_space<vmem>>, vector<4x432xbf16>
    %c0_6 = arith.constant 0 : index
    %c0_7 = arith.constant 0 : index
    %c0_8 = arith.constant 0 : index
    %5 = vector.load %arg2[%c0_6, %c0_7, %c0_8] : memref<1x432x512xbf16, #tpu.memory_space<vmem>>, vector<1x432x512xbf16>
    %6 = vector.shape_cast %5 : vector<1x432x512xbf16> to vector<432x512xbf16>
    %cst_9 = arith.constant dense<0.000000e+00> : vector<4x512xf32>
    %7 = tpu.matmul %4, %6, %cst_9 {dimension_numbers = #tpu.dot_dimension_numbers<[1], [0], [0], [1], [0, 0, 1, 1], [], []>} : vector<4x432xbf16>, vector<432x512xbf16>, vector<4x512xf32> -> vector<4x512xf32>
    %8 = arith.addf %3, %7 : vector<4x512xf32>
    %c0_10 = arith.constant 0 : index
    %c0_11 = arith.constant 0 : index
    %9 = vector.load %arg5[%c0_10, %c0_11] : memref<4x1xf32, #tpu.memory_space<vmem>>, vector<4x1xf32>
    %10 = vector.broadcast %9 : vector<4x1xf32> to vector<4x512xf32>
    %11 = arith.addf %8, %10 : vector<4x512xf32>
    %cst_12 = arith.constant dense<0.000000e+00> : vector<4xf32>
    %12 = vector.multi_reduction <add>, %11, %cst_12 [1] : vector<4x512xf32> to vector<4xf32>
    %13 = vector.shape_cast %12 : vector<4xf32> to vector<4x1xf32>
    %cst_13 = arith.constant 5.120000e+02 : f32
    %14 = vector.broadcast %cst_13 : f32 to vector<4x1xf32>
    %15 = arith.divf %13, %14 : vector<4x1xf32>
    %16 = vector.broadcast %15 : vector<4x1xf32> to vector<4x512xf32>
    %17 = arith.subf %11, %16 : vector<4x512xf32>
    %18 = arith.mulf %17, %17 : vector<4x512xf32>
    %cst_14 = arith.constant dense<0.000000e+00> : vector<4xf32>
    %19 = vector.multi_reduction <add>, %18, %cst_14 [1] : vector<4x512xf32> to vector<4xf32>
    %20 = vector.shape_cast %19 : vector<4xf32> to vector<4x1xf32>
    %cst_15 = arith.constant 5.120000e+02 : f32
    %21 = vector.broadcast %cst_15 : f32 to vector<4x1xf32>
    %22 = arith.divf %20, %21 : vector<4x1xf32>
    %23 = vector.broadcast %15 : vector<4x1xf32> to vector<4x512xf32>
    %24 = arith.subf %11, %23 : vector<4x512xf32>
    %cst_16 = arith.constant 9.99999974E-6 : f32
    %25 = vector.broadcast %cst_16 : f32 to vector<4x1xf32>
    %26 = arith.addf %22, %25 : vector<4x1xf32>
    %27 = math.rsqrt %26 : vector<4x1xf32>
    %28 = vector.broadcast %27 : vector<4x1xf32> to vector<4x512xf32>
    %29 = arith.mulf %24, %28 : vector<4x512xf32>
    %c0_17 = arith.constant 0 : index
    %30 = memref.load %arg6[%c0_17] : memref<1xf32, #tpu.memory_space<smem>>
    %cst_18 = arith.constant 0.000000e+00 : f32
    %31 = vector.broadcast %cst_18 : f32 to vector<4x512xf32>
    %32 = arith.cmpf oge, %29, %31 : vector<4x512xf32>
    %33 = vector.broadcast %30 : f32 to vector<4x512xf32>
    %34 = arith.mulf %33, %29 : vector<4x512xf32>
    %35 = arith.select %32, %29, %34 : vector<4x512xi1>, vector<4x512xf32>
    %c0_19 = arith.constant 0 : index
    %c0_20 = arith.constant 0 : index
    %c0_21 = arith.constant 0 : index
    %36 = vector.load %arg7[%c0_19, %c0_20, %c0_21] : memref<1x4x512xf32, #tpu.memory_space<vmem>>, vector<1x4x512xf32>
    %37 = vector.shape_cast %36 : vector<1x4x512xf32> to vector<4x512xf32>
    %38 = vector.shape_cast %35 : vector<4x512xf32> to vector<1x4x512xf32>
    tpu.vector_store %arg7[%c0_19, %c0_20, %c0_21], %38 {strides = array<i32>} : memref<1x4x512xf32, #tpu.memory_space<vmem>>, vector<1x4x512xf32>,
    return
  }
  func.func @transform_0(%arg0: i32) -> (i32, i32, i32) {
    %c0_i32 = arith.constant 0 : i32
    %c0_i32_0 = arith.constant 0 : i32
    %c0_i32_1 = arith.constant 0 : i32
    return %arg0, %c0_i32, %c0_i32_0 : i32, i32, i32
  }
  func.func @transform_1(%arg0: i32) -> (i32, i32, i32) {
    %c0_i32 = arith.constant 0 : i32
    %c0_i32_0 = arith.constant 0 : i32
    %c0_i32_1 = arith.constant 0 : i32
    return %arg0, %c0_i32, %c0_i32_0 : i32, i32, i32
  }
  func.func @transform_2(%arg0: i32) -> (i32, i32) {
    %c0_i32 = arith.constant 0 : i32
    %c0_i32_0 = arith.constant 0 : i32
    %c0_i32_1 = arith.constant 0 : i32
    return %c0_i32, %c0_i32_0 : i32, i32
  }
  func.func @transform_3(%arg0: i32) -> (i32, i32) {
    %c0_i32 = arith.constant 0 : i32
    %c0_i32_0 = arith.constant 0 : i32
    %c0_i32_1 = arith.constant 0 : i32
    return %c0_i32, %c0_i32_0 : i32, i32
  }
  func.func @transform_4(%arg0: i32) -> (i32, i32) {
    %c0_i32 = arith.constant 0 : i32
    %c0_i32_0 = arith.constant 0 : i32
    %c0_i32_1 = arith.constant 0 : i32
    return %c0_i32, %c0_i32_0 : i32, i32
  }
  func.func @transform_5(%arg0: i32) -> i32 {
    %c0_i32 = arith.constant 0 : i32
    %c0_i32_0 = arith.constant 0 : i32
    return %c0_i32 : i32
  }
  func.func @transform_6(%arg0: i32) -> (i32, i32, i32) {
    %c0_i32 = arith.constant 0 : i32
    %c0_i32_0 = arith.constant 0 : i32
    %c0_i32_1 = arith.constant 0 : i32
    return %arg0, %c0_i32, %c0_i32_0 : i32, i32, i32
  }
}

module attributes {stable_mosaic.version = 11 : i64} {
  func.func @_conv_block_kernel(%arg0: i32, %arg1: memref<1x112x4096xbf16, #tpu.memory_space<vmem>>, %arg2: memref<1x112x4096xbf16, #tpu.memory_space<vmem>>, %arg3: memref<2x112xbf16, #tpu.memory_space<vmem>>, %arg4: memref<2x112xbf16, #tpu.memory_space<vmem>>, %arg5: memref<2x1xf32, #tpu.memory_space<vmem>>, %arg6: memref<1xf32, #tpu.memory_space<smem>>, %arg7: memref<1x2x4096xf32, #tpu.memory_space<vmem>>) attributes {dimension_semantics = [#tpu.dimension_semantics<parallel>], iteration_bounds = array<i64: 2>, scalar_prefetch = 0 : i64, scratch_operands = 0 : i64, tpu.core_type = #tpu.core_type<tc>, window_params = [{transform_indices = @transform_0, window_bounds = array<i64: 1, 112, 4096>}, {transform_indices = @transform_1, window_bounds = array<i64: 1, 112, 4096>}, {pipeline_mode = #tpu.pipeline_mode<synchronous>, transform_indices = @transform_2, window_bounds = array<i64: 2, 112>}, {pipeline_mode = #tpu.pipeline_mode<synchronous>, transform_indices = @transform_3, window_bounds = array<i64: 2, 112>}, {pipeline_mode = #tpu.pipeline_mode<synchronous>, transform_indices = @transform_4, window_bounds = array<i64: 2, 1>}, {transform_indices = @transform_5, window_bounds = array<i64: 1>}, {transform_indices = @transform_6, window_bounds = array<i64: 1, 2, 4096>}]} {
    %c0 = arith.constant 0 : index
    %c0_0 = arith.constant 0 : index
    %0 = vector.load %arg3[%c0, %c0_0] : memref<2x112xbf16, #tpu.memory_space<vmem>>, vector<2x112xbf16>
    %c0_1 = arith.constant 0 : index
    %c0_2 = arith.constant 0 : index
    %c0_3 = arith.constant 0 : index
    %1 = vector.load %arg1[%c0_1, %c0_2, %c0_3] : memref<1x112x4096xbf16, #tpu.memory_space<vmem>>, vector<1x112x4096xbf16>
    %2 = vector.shape_cast %1 : vector<1x112x4096xbf16> to vector<112x4096xbf16>
    %cst = arith.constant dense<0.000000e+00> : vector<2x4096xf32>
    %3 = tpu.matmul %0, %2, %cst {dimension_numbers = #tpu.dot_dimension_numbers<[1], [0], [0], [1], [0, 0, 1, 1], [], []>} : vector<2x112xbf16>, vector<112x4096xbf16>, vector<2x4096xf32> -> vector<2x4096xf32>
    %c0_4 = arith.constant 0 : index
    %c0_5 = arith.constant 0 : index
    %4 = vector.load %arg4[%c0_4, %c0_5] : memref<2x112xbf16, #tpu.memory_space<vmem>>, vector<2x112xbf16>
    %c0_6 = arith.constant 0 : index
    %c0_7 = arith.constant 0 : index
    %c0_8 = arith.constant 0 : index
    %5 = vector.load %arg2[%c0_6, %c0_7, %c0_8] : memref<1x112x4096xbf16, #tpu.memory_space<vmem>>, vector<1x112x4096xbf16>
    %6 = vector.shape_cast %5 : vector<1x112x4096xbf16> to vector<112x4096xbf16>
    %cst_9 = arith.constant dense<0.000000e+00> : vector<2x4096xf32>
    %7 = tpu.matmul %4, %6, %cst_9 {dimension_numbers = #tpu.dot_dimension_numbers<[1], [0], [0], [1], [0, 0, 1, 1], [], []>} : vector<2x112xbf16>, vector<112x4096xbf16>, vector<2x4096xf32> -> vector<2x4096xf32>
    %8 = arith.addf %3, %7 : vector<2x4096xf32>
    %c0_10 = arith.constant 0 : index
    %c0_11 = arith.constant 0 : index
    %9 = vector.load %arg5[%c0_10, %c0_11] : memref<2x1xf32, #tpu.memory_space<vmem>>, vector<2x1xf32>
    %10 = vector.broadcast %9 : vector<2x1xf32> to vector<2x4096xf32>
    %11 = arith.addf %8, %10 : vector<2x4096xf32>
    %c0_12 = arith.constant 0 : index
    %c0_13 = arith.constant 0 : index
    %c0_14 = arith.constant 0 : index
    %12 = vector.load %arg7[%c0_12, %c0_13, %c0_14] : memref<1x2x4096xf32, #tpu.memory_space<vmem>>, vector<1x2x4096xf32>
    %13 = vector.shape_cast %12 : vector<1x2x4096xf32> to vector<2x4096xf32>
    %14 = vector.shape_cast %11 : vector<2x4096xf32> to vector<1x2x4096xf32>
    tpu.vector_store %arg7[%c0_12, %c0_13, %c0_14], %14 {strides = array<i32>} : memref<1x2x4096xf32, #tpu.memory_space<vmem>>, vector<1x2x4096xf32>,
    return
  }
  func.func @transform_0(%arg0: i32) -> (i32, i32, i32) {
    %c0_i32 = arith.constant 0 : i32
    %c0_i32_0 = arith.constant 0 : i32
    %c0_i32_1 = arith.constant 0 : i32
    return %arg0, %c0_i32, %c0_i32_0 : i32, i32, i32
  }
  func.func @transform_1(%arg0: i32) -> (i32, i32, i32) {
    %c0_i32 = arith.constant 0 : i32
    %c0_i32_0 = arith.constant 0 : i32
    %c0_i32_1 = arith.constant 0 : i32
    return %arg0, %c0_i32, %c0_i32_0 : i32, i32, i32
  }
  func.func @transform_2(%arg0: i32) -> (i32, i32) {
    %c0_i32 = arith.constant 0 : i32
    %c0_i32_0 = arith.constant 0 : i32
    %c0_i32_1 = arith.constant 0 : i32
    return %c0_i32, %c0_i32_0 : i32, i32
  }
  func.func @transform_3(%arg0: i32) -> (i32, i32) {
    %c0_i32 = arith.constant 0 : i32
    %c0_i32_0 = arith.constant 0 : i32
    %c0_i32_1 = arith.constant 0 : i32
    return %c0_i32, %c0_i32_0 : i32, i32
  }
  func.func @transform_4(%arg0: i32) -> (i32, i32) {
    %c0_i32 = arith.constant 0 : i32
    %c0_i32_0 = arith.constant 0 : i32
    %c0_i32_1 = arith.constant 0 : i32
    return %c0_i32, %c0_i32_0 : i32, i32
  }
  func.func @transform_5(%arg0: i32) -> i32 {
    %c0_i32 = arith.constant 0 : i32
    %c0_i32_0 = arith.constant 0 : i32
    return %c0_i32 : i32
  }
  func.func @transform_6(%arg0: i32) -> (i32, i32, i32) {
    %c0_i32 = arith.constant 0 : i32
    %c0_i32_0 = arith.constant 0 : i32
    %c0_i32_1 = arith.constant 0 : i32
    return %arg0, %c0_i32, %c0_i32_0 : i32, i32, i32
  }
}

</mosaic_0001>

<bundles_post_ra>
// kernel: monai_unet_forward.5
= control target key start
LH: loop header
LB: loop body
LE: loop exit
PB: predicated region body
PF: predicated region fallthrough
CT: control target
= control target key end

     0   :  { %s665_s0 = inlined_call_operand.vmem [shape: bf16[2,32,512], index: 0, kind: input, shape index: {}]   ;;  %s666_s1 = inlined_call_operand.hbm [shape: bf16[4,32], index: 1, kind: input, shape index: {}]   ;;  %s667_s2 = inlined_call_operand.vmem [shape: f32[4,1], index: 2, kind: input, shape index: {}]   ;;  %s668_s3 = inlined_call_operand.<no memory space> [shape: f32[1], index: 3, kind: input, shape index: {}]   ;;  %s669_s4 = inlined_call_operand.vmem [shape: f32[2,4,512], index: 4, kind: output, shape index: {}]  }
   0x1   :  { %9 = sst [smem:[#allocation2]] %s668_s3 }
   0x2   :  { %10 = vsyncpa [#allocation4], 0  ;;  %s628_s17 = smov 0  }
   0x3 LB: > { %s470_s18 = sadd.s32 4294967295, %s595_s17   ;;  %p472_p0 = scmp.ge.s32.totalorder %s595_s17, 1  ;;  %s595_s17 = sphi %s628_s17, %s16_s17  }
   0x4   : > { %p136_p1 = scmp.lt.s32.totalorder %s595_s17, 3  ;;  %s148_s21 = sshll.u32 %s666_s1, 4  ;;  %s149_s21 = int_to_ptr.hbm [resolvable:$true] %s148_s21 }
   0x5   : > { %p537_p3 = scmp.eq.s32.totalorder %s470_s18, 0  ;;  %s597_s3 = smov [#allocation3]  }
   0x6   : > { %p137_p2 = pnand %p472_p0, %p136_p1  ;;  %s150_s22 = sshll.u32 %s597_s3, 4  ;;  %s151_s22 = int_to_ptr.vmem [resolvable:$true] %s150_s22 }
   0x8   : > { %p533_p4 = pneg %p137_p2  ;;  %177 = sbr.rel (%p137_p2) target bundleno = 446 (0x1be), region = 36 }
   0xa   : > { %p534_p5 = pnand %p537_p3, %p533_p4 }
   0xc   : > { %536 = dma.hbm_to_vmem [thread:$0]  (!%p534_p5), %s149_s21, 32, %s151_s22, [#allocation4]  }
   0xd   : > { %590 = dma.done.wait (%p537_p3), [#allocation4], 32  }
   0xe   : > { %592 = vsyncadd (%p537_p3), [#allocation4], 4294967264  ;;  %p204_p6 = scmp.lt.s32.totalorder %s470_s18, 1  ;;  %v598_v0 = vmov 0   ;;  %v224_v24 = vld [vmem:[%s667_s2] sm:$0xf] }
   0xf   : > { %550 = vset.pattern.permute.xlu0 %v598_v0  ;;  %v215_v26 = vld [vmem:[#allocation3] sm:$0x3]  ;;  %vm270_vm0 = vcmask 261120   ;;  %vm326_vm1 = vcmask 1043456   ;;  %v599_v47 = vmov 512.0   ;;  %s377_s29 = sld [smem:[#allocation2]] }
  0x10   : > { %s671_s18 = smov (!%p204_p6, %s470_s18), 1  ;;  %227 = vperm.xlu0 %550, %v224_v24   ;;  %551 = vrcp.f32 %v599_v47 }
  0x11   : > { %s519_s23 = sshll.u32 %s671_s18, 6  ;;  %s520_s30 = sshll.u32 %s671_s18, 4 }
  0x12   : > { %s208_s26 = scalar_lea.vmem %s665_s0, %s519_s23  ;;  %s213_s7 = scalar_lea.vmem %s669_s4, %s520_s30 }
  0x13   : > { %v499_v1 = vld [vmem:[%s208_s26 + $0x20] sm:$0xf]  ;;  %v527_v2 = vld [vmem:[%s208_s26 + $0x2c] sm:$0xf0]  ;;  %v525_v3 = vld [vmem:[%s208_s26 + $0x24] sm:$0xf] }
  0x14   : > { %v500_v4 = vor.u32 %v527_v2, %v499_v1  ;;  %v501_v5 = vld [vmem:[%s208_s26 + $0x30] sm:$0xf0]  ;;  %v507_v6 = vld [vmem:[%s208_s26 + $0x28] sm:$0xf]  ;;  %v528_v7 = vld [vmem:[%s208_s26 + $0x34] sm:$0xf0] }
  0x15   : > { %v504_v8 = vor.u32 %v525_v3, %v501_v5  ;;  %v508_v9 = vor.u32 %v528_v7, %v507_v6  ;;  %v526_v10 = vld [vmem:[%s208_s26 + $0x2c] sm:$0xf]  ;;  %v509_v11 = vld [vmem:[%s208_s26 + $0x38] sm:$0xf0]  ;;  %v483_v12 = vld [vmem:[%s208_s26] sm:$0xf] }
  0x16   : > { %280 = vmatpush.bf16.msra.mxu0 %v500_v4  ;;  %v512_v13 = vor.u32 %v526_v10, %v509_v11  ;;  %v523_v14 = vld [vmem:[%s208_s26 + $0xc] sm:$0xf0]  ;;  %v521_v15 = vld [vmem:[%s208_s26 + $0x4] sm:$0xf]  ;;  %v485_v16 = vld [vmem:[%s208_s26 + $0x10] sm:$0xf0]  ;;  %v552_v48 = vpop.eup %551 }
  0x17   : > { %293 = vmatpush.bf16.msra.mxu1 %v504_v8  ;;  %306 = vmatpush.bf16.msra.mxu2 %v508_v9  ;;  %v484_v17 = vor.u32 %v523_v14, %v483_v12  ;;  %v488_v18 = vor.u32 %v521_v15, %v485_v16  ;;  %v491_v19 = vld [vmem:[%s208_s26 + $0x8] sm:$0xf]  ;;  %v524_v20 = vld [vmem:[%s208_s26 + $0x14] sm:$0xf0]  ;;  %v522_v21 = vld [vmem:[%s208_s26 + $0xc] sm:$0xf]  ;;  %vm341_vm2 = vweird.f32 %v552_v48  ;;  %v382_v16 = vstv %s377_s29 }
  0x18   : > { %319 = vmatpush.bf16.msra.mxu3 %v512_v13  ;;  %v492_v22 = vor.u32 %v524_v20, %v491_v19  ;;  %v493_v23 = vld [vmem:[%s208_s26 + $0x18] sm:$0xf0]  ;;  %v337_v49 = vmul.f32 512.0, %v552_v48 }
  0x19   : > { %v496_v25 = vor.u32 %v522_v21, %v493_v23 }
  0x1a   : > { %281 = vmatpush.bf16.msra.mxu0 %v484_v17  ;;  %v338_v50 = vsub.f32 1.0, %v337_v49 }
  0x1b   : > { %294 = vmatpush.bf16.msra.mxu1 %v488_v18  ;;  %307 = vmatpush.bf16.msra.mxu2 %v492_v22 }
  0x1c   : > { %320 = vmatpush.bf16.msra.mxu3 %v496_v25  ;;  %v339_v51 = vmul.f32 %v552_v48, %v338_v50 }
  0x1d   : > { %513 = vmatmul.msk.bf16.vlgmr.msra.gmra.mxu0 %vm270_vm0, %v215_v26 }
  0x1e   : > { %514 = vmatmul.msk.bf16.vlgmr.msra.gmra.mxu1 %vm270_vm0, %v215_v26  ;;  %515 = vmatmul.msk.bf16.vlgmr.msra.gmra.mxu2 %vm270_vm0, %v215_v26  ;;  %v340_v52 = vadd.f32 %v552_v48, %v339_v51 }
  0x1f   : > { %516 = vmatmul.msk.bf16.vlgmr.msra.gmra.mxu3 %vm270_vm0, %v215_v26 }
  0x20   : > { %v342_v53 = vsel %vm341_vm2, %v552_v48, %v340_v52 }
  0x82   : > { %v228_v27 = vpop.permute.xlu0 %227 }
  0x9a   : > { %v283_v28 = vpop.f32.mrf.mxu0 }
  0x9b   : > { %v296_v29 = vpop.f32.mrf.mxu1  ;;  %v284_v30 = vadd.f32 %v283_v28, %v228_v27 }
  0x9c   : > { %v297_v31 = vadd.f32 %v296_v29, %v228_v27 }
  0x9d   : > { %v327_v32 = vsel %vm326_vm1, %v284_v30, 0.0 }
  0x9e   : > { %v328_v33 = vsel %vm326_vm1, %v297_v31, 0.0 }
  0x9f   : > { %v329_v35 = vadd.f32 %v328_v33, %v327_v32 }
  0xa1   : > { %v309_v34 = vpop.f32.mrf.mxu2 }
  0xa2   : > { %v310_v36 = vadd.f32 %v309_v34, %v228_v27  ;;  %v322_v37 = vpop.f32.mrf.mxu3  ;;  %v285_v38 = vpop.f32.mrf.mxu0 }
  0xa3   : > { %v323_v39 = vadd.f32 %v322_v37, %v228_v27  ;;  %v298_v40 = vpop.f32.mrf.mxu1 }
  0xa4   : > { %v330_v41 = vsel %vm326_vm1, %v310_v36, 0.0 }
  0xa5   : > { %v331_v42 = vadd.f32 %v330_v41, %v329_v35  ;;  %v332_v43 = vsel %vm326_vm1, %v323_v39, 0.0 }
  0xa7   : > { %v333_v44 = vadd.f32 %v332_v43, %v331_v42 }
  0xa9   : > { %v311_v45 = vpop.f32.mrf.mxu2  ;;  %334 = vadd.xlane.f32.xlu0 %v333_v44 }
  0xaa   : > { %v324_v46 = vpop.f32.mrf.mxu3 }
 0x11c   : > { %v335_v54 = vpop.xlane.xlu0 %334 }
 0x11d   : > { %v343_v55 = vmul.f32 %v342_v53, %v335_v54 }
 0x11f   : > { %v344_v56 = vsub.f32 %v284_v30, %v343_v55  ;;  %v345_v57 = vsub.f32 %v297_v31, %v343_v55  ;;  %v346_v58 = vsub.f32 %v310_v36, %v343_v55  ;;  %v347_v59 = vsub.f32 %v323_v39, %v343_v55 }
 0x121   : > { %v348_v60 = vmul.f32 %v344_v56, %v344_v56  ;;  %v349_v61 = vmul.f32 %v345_v57, %v345_v57  ;;  %v350_v62 = vmul.f32 %v346_v58, %v346_v58  ;;  %v351_v63 = vmul.f32 %v347_v59, %v347_v59 }
 0x123   : > { %v352_v0 = vsel %vm326_vm1, %v348_v60, 0.0  ;;  %v353_v1 = vsel %vm326_vm1, %v349_v61, 0.0  ;;  %v355_v3 = vsel %vm326_vm1, %v350_v62, 0.0  ;;  %v357_v5 = vsel %vm326_vm1, %v351_v63, 0.0 }
 0x124   : > { %v354_v2 = vadd.f32 %v353_v1, %v352_v0 }
 0x126   : > { %v356_v4 = vadd.f32 %v355_v3, %v354_v2 }
 0x128   : > { %v358_v6 = vadd.f32 %v357_v5, %v356_v4 }
 0x12a   : > { %359 = vadd.xlane.f32.xlu1 %v358_v6 }
 0x19d   : > { %v360_v7 = vpop.xlane.xlu1 %359 }
 0x19e   : > { %v361_v8 = vmul.f32 %v360_v7, %v342_v53 }
 0x1a0   : > { %v362_v9 = vadd.f32 1e-05, %v361_v8 }
 0x1a2   : > { %553 = vrsqrt.f32 %v362_v9  ;;  %vm369_vm4 = vweird.f32 %v362_v9 }
 0x1a8   : > { %v554_v10 = vpop.eup %553 }
 0x1a9   : > { %v364_v11 = vmul.f32 %v554_v10, %v362_v9  ;;  %vm370_vm3 = vweird.f32 %v554_v10 }
 0x1aa   : > { %vm371_vm5 = vmor %vm369_vm4, %vm370_vm3 }
 0x1ab   : > { %v365_v12 = vmul.f32 %v554_v10, %v364_v11 }
 0x1ad   : > { %v366_v13 = vmul.f32 0.5, %v365_v12 }
 0x1af   : > { %v367_v14 = vsub.f32 1.5, %v366_v13 }
 0x1b1   : > { %v368_v15 = vmul.f32 %v554_v10, %v367_v14 }
 0x1b3   : > { %v372_v17 = vsel %vm371_vm5, %v554_v10, %v368_v15 }
 0x1b4   : > { %v373_v18 = vmul.f32 %v372_v17, %v344_v56  ;;  %v374_v19 = vmul.f32 %v372_v17, %v345_v57  ;;  %v375_v20 = vmul.f32 %v372_v17, %v346_v58  ;;  %v376_v21 = vmul.f32 %v372_v17, %v347_v59 }
 0x1b6   : > { %vm379_vm6 = vcmp.ge.f32.partialorder %v374_v19, 0.0  ;;  %vm381_vm7 = vcmp.ge.f32.partialorder %v376_v21, 0.0  ;;  %v383_v22 = vmul.f32 %v382_v16, %v373_v18  ;;  %v384_v23 = vmul.f32 %v382_v16, %v374_v19 }
 0x1b7   : > { %v385_v24 = vmul.f32 %v382_v16, %v375_v20  ;;  %v386_v25 = vmul.f32 %v382_v16, %v376_v21  ;;  %vm378_vm8 = vcmp.ge.f32.partialorder %v373_v18, 0.0  ;;  %vm380_vm9 = vcmp.ge.f32.partialorder %v375_v20, 0.0 }
 0x1b8   : > { %v388_v26 = vsel %vm379_vm6, %v374_v19, %v384_v23  ;;  %v387_v30 = vsel %vm378_vm8, %v373_v18, %v383_v22 }
 0x1b9   : > { %v390_v27 = vsel %vm381_vm7, %v376_v21, %v386_v25  ;;  %v395_v28 = vrot.slane %v388_v26, 4  ;;  %v389_v31 = vsel %vm380_vm9, %v375_v20, %v385_v24 }
 0x1ba   : > { %v396_v29 = vrot.slane %v390_v27, 4 }
 0x1bb   : > { %v397_v32 = vsel %vm326_vm1, %v387_v30, %v395_v28 }
 0x1bc   : > { %v398_v33 = vsel %vm326_vm1, %v389_v31, %v396_v29  ;;  %401 = vst [vmem:[%s213_s7] sm:$0xff] %v397_v32 }
 0x1bd   : > { %402 = vst [vmem:[%s213_s7 + $0x8] sm:$0xff] %v398_v33 }
 0x1be PF: > { %s16_s17 = sadd.s32 1, %s595_s17  }
 0x1bf   : > { %p13_p7 = scmp.ge.s32.totalorder %s16_s17, 4  }
 0x1c1   :  { %15 = sbr.rel (!%p13_p7) target bundleno = 3 (0x3), region = 71 }
 0x1c6   :  { %424 = vsyncpa [#allocation4], 1 }
 0x1c7   :  { %426 = vsyncpa [#allocation4 + $0x1], 1 }

// kernel: monai_unet_forward.6
= control target key start
LH: loop header
LB: loop body
LE: loop exit
PB: predicated region body
PF: predicated region fallthrough
CT: control target
= control target key end

     0   :  { %s466_s17 = smov 0   ;;  %s496_s0 = inlined_call_operand.vmem [shape: bf16[2,112,64], index: 0, kind: input, shape index: {}]   ;;  %s497_s1 = inlined_call_operand.vmem [shape: bf16[8,112], index: 1, kind: input, shape index: {}]   ;;  %s498_s2 = inlined_call_operand.vmem [shape: f32[8,1], index: 2, kind: input, shape index: {}]   ;;  %s499_s3 = inlined_call_operand.<no memory space> [shape: f32[1], index: 3, kind: input, shape index: {}]   ;;  %s500_s4 = inlined_call_operand.vmem [shape: f32[2,8,64], index: 4, kind: output, shape index: {}]  }
   0x1   :  { %9 = sst [smem:[#allocation2]] %s499_s3 }
   0x2 LB: > { %s367_s18 = sadd.s32 4294967295, %s434_s17   ;;  %p371_p0 = scmp.ge.s32.totalorder %s434_s17, 1  ;;  %s434_s17 = sphi %s466_s17, %s15_s17  }
   0x3   : > { %p163_p1 = scmp.lt.s32.totalorder %s434_s17, 3 }
   0x5   : > { %p164_p2 = pnand %p371_p0, %p163_p1 }
   0x6   : > { %p188_p3 = scmp.lt.s32.totalorder (!%p164_p2), %s367_s18, 1  ;;  %s308_s26 = sld [smem:[#allocation2]] (!%p164_p2) }
   0x7   : > { %167 = sbr.rel (%p164_p2) target bundleno = 440 (0x1b8), region = 36 }
   0xc   : > { %s502_s18 = smov (!%p188_p3, %s367_s18), 1  ;;  %v213_v0 = vld [vmem:[%s498_s2] sm:$0xff]  ;;  %v436_v1 = vmov 0   ;;  %vm261_vm0 = vcmask 916480   ;;  %vm278_vm1 = vcmask 523264   ;;  %v437_v15 = vmov 64.0  }
   0xd   : > { %s412_s3 = smul.u32 56, %s502_s18  ;;  %423 = vset.pattern.permute.xlu0 %v436_v1  ;;  %v198_v9 = vld [vmem:[%s497_s1] sm:$0xf]  ;;  %424 = vrcp.f32 %v437_v15  ;;  %s373_s27 = sshll.u32 %s502_s18, 3  ;;  %v310_v36 = vstv %s308_s26 }
   0xe   : > { %216 = vperm.xlu0 %423, %v213_v0   ;;  %s196_s30 = scalar_lea.vmem %s500_s4, %s373_s27 }
   0xf   : > { %s192_s23 = scalar_lea.vmem %s496_s0, %s412_s3 }
  0x10   : > { %v411_v2 = vld [vmem:[%s192_s23 + $0x30] sm:$0xff]  ;;  %v410_v3 = vld [vmem:[%s192_s23 + $0x28] sm:$0xff]  ;;  %v409_v4 = vld [vmem:[%s192_s23 + $0x20] sm:$0xff] }
  0x11   : > { %266 = vmatpush.bf16.msra.mxu0 %v411_v2  ;;  %v408_v5 = vld [vmem:[%s192_s23 + $0x18] sm:$0xff]  ;;  %v407_v6 = vld [vmem:[%s192_s23 + $0x10] sm:$0xff]  ;;  %v406_v7 = vld [vmem:[%s192_s23 + $0x8] sm:$0xff] }
  0x12   : > { %v405_v8 = vld [vmem:[%s192_s23] sm:$0xff] }
  0x13   : > { %v425_v16 = vpop.eup %424 }
  0x14   : > { %v283_v17 = vmul.f32 64.0, %v425_v16  ;;  %vm287_vm2 = vweird.f32 %v425_v16 }
  0x15   : > { %267 = vmatpush.bf16.msra.mxu0 %v410_v3 }
  0x16   : > { %v284_v18 = vsub.f32 1.0, %v283_v17 }
  0x18   : > { %v285_v19 = vmul.f32 %v425_v16, %v284_v18 }
  0x19   : > { %268 = vmatpush.bf16.msra.mxu0 %v409_v4 }
  0x1a   : > { %v286_v20 = vadd.f32 %v425_v16, %v285_v19 }
  0x1c   : > { %v288_v21 = vsel %vm287_vm2, %v425_v16, %v286_v20 }
  0x1d   : > { %269 = vmatpush.bf16.msra.mxu0 %v408_v5 }
  0x21   : > { %270 = vmatpush.bf16.msra.mxu0 %v407_v6 }
  0x25   : > { %271 = vmatpush.bf16.msra.mxu0 %v406_v7 }
  0x29   : > { %272 = vmatpush.bf16.msra.mxu0 %v405_v8 }
  0x2c   : > { %402 = vmatmul.msk.bf16.vlgmr.msra.gmra.mxu0 %vm261_vm0, %v198_v9 }
  0x80   : > { %v217_v10 = vpop.permute.xlu0 %216 }
  0xa9   : > { %v274_v11 = vpop.f32.mrf.mxu0 }
  0xaa   : > { %v275_v12 = vadd.f32 %v274_v11, %v217_v10 }
  0xac   : > { %v279_v13 = vsel %vm278_vm1, %v275_v12, 0.0 }
  0xad   : > { %280 = vadd.xlane.f32.xlu0 %v279_v13 }
  0xb1   : > { %v276_v14 = vpop.f32.mrf.mxu0 }
 0x120   : > { %v281_v22 = vpop.xlane.xlu0 %280 }
 0x121   : > { %v289_v23 = vmul.f32 %v288_v21, %v281_v22 }
 0x123   : > { %v290_v24 = vsub.f32 %v275_v12, %v289_v23 }
 0x125   : > { %v291_v25 = vmul.f32 %v290_v24, %v290_v24 }
 0x127   : > { %v292_v26 = vsel %vm278_vm1, %v291_v25, 0.0 }
 0x128   : > { %293 = vadd.xlane.f32.xlu1 %v292_v26 }
 0x19b   : > { %v294_v27 = vpop.xlane.xlu1 %293 }
 0x19c   : > { %v295_v28 = vmul.f32 %v294_v27, %v288_v21 }
 0x19e   : > { %v296_v29 = vadd.f32 1e-05, %v295_v28 }
 0x1a0   : > { %426 = vrsqrt.f32 %v296_v29  ;;  %vm303_vm4 = vweird.f32 %v296_v29 }
 0x1a6   : > { %v427_v30 = vpop.eup %426 }
 0x1a7   : > { %v298_v31 = vmul.f32 %v427_v30, %v296_v29  ;;  %vm304_vm3 = vweird.f32 %v427_v30 }
 0x1a8   : > { %vm305_vm5 = vmor %vm303_vm4, %vm304_vm3 }
 0x1a9   : > { %v299_v32 = vmul.f32 %v427_v30, %v298_v31 }
 0x1ab   : > { %v300_v33 = vmul.f32 0.5, %v299_v32 }
 0x1ad   : > { %v301_v34 = vsub.f32 1.5, %v300_v33 }
 0x1af   : > { %v302_v35 = vmul.f32 %v427_v30, %v301_v34 }
 0x1b1   : > { %v306_v37 = vsel %vm305_vm5, %v427_v30, %v302_v35 }
 0x1b2   : > { %v307_v38 = vmul.f32 %v306_v37, %v290_v24 }
 0x1b4   : > { %vm309_vm6 = vcmp.ge.f32.partialorder %v307_v38, 0.0  ;;  %v311_v39 = vmul.f32 %v310_v36, %v307_v38 }
 0x1b6   : > { %v312_v40 = vsel %vm309_vm6, %v307_v38, %v311_v39 }
 0x1b7   : > { %313 = vst.msk [vmem:[%s196_s30] sm:$0xff] %vm278_vm1, %v312_v40 }
 0x1b8 PF: > { %s15_s17 = sadd.s32 1, %s434_s17  }
 0x1b9   : > { %p12_p4 = scmp.ge.s32.totalorder %s15_s17, 4  }
 0x1bb   :  { %14 = sbr.rel (!%p12_p4) target bundleno = 2 (0x2), region = 66 }

// kernel: monai_unet_forward.7
= control target key start
LH: loop header
LB: loop body
LE: loop exit
PB: predicated region body
PF: predicated region fallthrough
CT: control target
= control target key end

     0   :  { %s632_s17 = smov 0   ;;  %s693_s0 = inlined_call_operand.vmem [shape: bf16[2,224,64], index: 0, kind: input, shape index: {}]   ;;  %s694_s1 = inlined_call_operand.vmem [shape: bf16[16,224], index: 1, kind: input, shape index: {}]   ;;  %s695_s2 = inlined_call_operand.vmem [shape: f32[16,1], index: 2, kind: input, shape index: {}]   ;;  %s696_s3 = inlined_call_operand.<no memory space> [shape: f32[1], index: 3, kind: input, shape index: {}]   ;;  %s697_s4 = inlined_call_operand.vmem [shape: f32[2,16,64], index: 4, kind: output, shape index: {}]  }
   0x1   :  { %9 = sst [smem:[#allocation2]] %s696_s3 }
   0x2 LB: > { %s484_s18 = sadd.s32 4294967295, %s600_s17   ;;  %p488_p0 = scmp.ge.s32.totalorder %s600_s17, 1  ;;  %s600_s17 = sphi %s632_s17, %s15_s17  }
   0x3   : > { %p163_p1 = scmp.lt.s32.totalorder %s600_s17, 3 }
   0x5   : > { %p164_p2 = pnand %p488_p0, %p163_p1 }
   0x6   : > { %p189_p3 = scmp.lt.s32.totalorder (!%p164_p2), %s484_s18, 1  ;;  %s419_s8 = sld [smem:[#allocation2]] (!%p164_p2) }
   0x7   : > { %167 = sbr.rel (%p164_p2) target bundleno = 454 (0x1c6), region = 36 }
   0xc   : > { %s699_s18 = smov (!%p189_p3, %s484_s18), 1  ;;  %v602_v4 = vmov 0   ;;  %v230_v5 = vld [vmem:[%s695_s2] sm:$0xff]  ;;  %v231_v10 = vld [vmem:[%s695_s2 + $0x8] sm:$0xff]  ;;  %vm335_vm0 = vcmask 785408   ;;  %vm367_vm1 = vcmask 523264  }
   0xd   : > { %s576_s3 = smul.u32 112, %s699_s18  ;;  %587 = vset.pattern.permute.xlu0 %v602_v4  ;;  %v560_v13 = vld [vmem:[%s694_s1 + $0x4] sm:$0xf]  ;;  %v496_v16 = vld [vmem:[%s694_s1 + $0x8] sm:$0xf0]  ;;  %v603_v35 = vmov 64.0  }
   0xe   : > { %234 = vperm.xlu0 %587, %v230_v5   ;;  %v499_v17 = vor.u32 %v560_v13, %v496_v16  ;;  %v494_v20 = vld [vmem:[%s694_s1] sm:$0xf]  ;;  %v561_v21 = vld [vmem:[%s694_s1 + $0x4] sm:$0xf0]  ;;  %588 = vrcp.f32 %v603_v35  ;;  %s559_s9 = sshll.u32 %s699_s18, 4 }
   0xf   : > { %s646_s21 = scalar_lea.vmem %s693_s0, %s576_s3  ;;  %v495_v22 = vor.u32 %v561_v21, %v494_v20  ;;  %s198_s12 = scalar_lea.vmem %s697_s4, %s559_s9 }
  0x10   : > { %v569_v0 = vld [vmem:[%s646_s21 + $0x38] sm:$0xff]  ;;  %v575_v1 = vld [vmem:[%s646_s21 + $0x68] sm:$0xff]  ;;  %v568_v2 = vld [vmem:[%s646_s21 + $0x30] sm:$0xff] }
  0x11   : > { %339 = vmatpush.bf16.msra.mxu0 %v569_v0  ;;  %355 = vmatpush.bf16.msra.mxu1 %v575_v1  ;;  %v574_v3 = vld [vmem:[%s646_s21 + $0x60] sm:$0xff]  ;;  %v567_v6 = vld [vmem:[%s646_s21 + $0x28] sm:$0xff]  ;;  %v573_v7 = vld [vmem:[%s646_s21 + $0x58] sm:$0xff] }
  0x12   : > { %v566_v8 = vld [vmem:[%s646_s21 + $0x20] sm:$0xff]  ;;  %v572_v9 = vld [vmem:[%s646_s21 + $0x50] sm:$0xff]  ;;  %v565_v11 = vld [vmem:[%s646_s21 + $0x18] sm:$0xff] }
  0x13   : > { %v571_v12 = vld [vmem:[%s646_s21 + $0x48] sm:$0xff]  ;;  %v564_v14 = vld [vmem:[%s646_s21 + $0x10] sm:$0xff]  ;;  %v570_v15 = vld [vmem:[%s646_s21 + $0x40] sm:$0xff] }
  0x14   : > { %v563_v18 = vld [vmem:[%s646_s21 + $0x8] sm:$0xff]  ;;  %v562_v19 = vld [vmem:[%s646_s21] sm:$0xff]  ;;  %v589_v36 = vpop.eup %588 }
  0x15   : > { %340 = vmatpush.bf16.msra.mxu0 %v568_v2  ;;  %356 = vmatpush.bf16.msra.mxu1 %v574_v3  ;;  %v375_v37 = vmul.f32 64.0, %v589_v36  ;;  %vm379_vm2 = vweird.f32 %v589_v36  ;;  %v422_v2 = vstv %s419_s8 }
  0x16   : > { %239 = vperm.xlu0 %587, %v231_v10  }
  0x17   : > { %v376_v38 = vsub.f32 1.0, %v375_v37 }
  0x19   : > { %341 = vmatpush.bf16.msra.mxu0 %v567_v6  ;;  %357 = vmatpush.bf16.msra.mxu1 %v573_v7  ;;  %v377_v39 = vmul.f32 %v589_v36, %v376_v38 }
  0x1b   : > { %v378_v40 = vadd.f32 %v589_v36, %v377_v39 }
  0x1d   : > { %342 = vmatpush.bf16.msra.mxu0 %v566_v8  ;;  %358 = vmatpush.bf16.msra.mxu1 %v572_v9  ;;  %v380_v41 = vsel %vm379_vm2, %v589_v36, %v378_v40 }
  0x21   : > { %343 = vmatpush.bf16.msra.mxu0 %v565_v11  ;;  %359 = vmatpush.bf16.msra.mxu1 %v571_v12 }
  0x25   : > { %344 = vmatpush.bf16.msra.mxu0 %v564_v14  ;;  %360 = vmatpush.bf16.msra.mxu1 %v570_v15 }
  0x28   : > { %556 = vmatmul.msk.bf16.vlgmr.msra.gmra.mxu1 %vm335_vm0, %v499_v17 }
  0x29   : > { %345 = vmatpush.bf16.msra.mxu0 %v563_v18 }
  0x2d   : > { %346 = vmatpush.bf16.msra.mxu0 %v562_v19 }
  0x30   : > { %347 = vmatmul.bf16.vlgmr.msra.gmra.mxu0 %v495_v22 }
  0x80   : > { %v235_v23 = vpop.permute.xlu0 %234 }
  0x88   : > { %v240_v29 = vpop.permute.xlu0 %239 }
  0xa5   : > { %v362_v24 = vpop.f32.mrf.mxu1 }
  0xad   : > { %v348_v25 = vpop.f32.mrf.mxu0  ;;  %v364_v32 = vpop.f32.mrf.mxu1 }
  0xae   : > { %v349_v26 = vadd.f32 %v348_v25, %v235_v23 }
  0xb0   : > { %v363_v27 = vadd.f32 %v362_v24, %v349_v26 }
  0xb2   : > { %v368_v28 = vsel %vm367_vm1, %v363_v27, 0.0 }
  0xb3   : > { %369 = vadd.xlane.f32.xlu1 %v368_v28 }
  0xb5   : > { %v350_v30 = vpop.f32.mrf.mxu0 }
  0xb6   : > { %v351_v31 = vadd.f32 %v350_v30, %v240_v29 }
  0xb8   : > { %v365_v33 = vadd.f32 %v364_v32, %v351_v31 }
  0xba   : > { %v371_v34 = vsel %vm367_vm1, %v365_v33, 0.0 }
  0xbb   : > { %372 = vadd.xlane.f32.xlu1 %v371_v34 }
 0x126   : > { %v370_v42 = vpop.xlane.xlu1 %369 }
 0x127   : > { %v381_v43 = vmul.f32 %v380_v41, %v370_v42 }
 0x129   : > { %v383_v44 = vsub.f32 %v363_v27, %v381_v43 }
 0x12b   : > { %v385_v45 = vmul.f32 %v383_v44, %v383_v44 }
 0x12d   : > { %v387_v46 = vsel %vm367_vm1, %v385_v45, 0.0 }
 0x12e   : > { %388 = vadd.xlane.f32.xlu2 %v387_v46  ;;  %v373_v47 = vpop.xlane.xlu1 %372 }
 0x12f   : > { %v382_v48 = vmul.f32 %v380_v41, %v373_v47 }
 0x131   : > { %v384_v49 = vsub.f32 %v365_v33, %v382_v48 }
 0x133   : > { %v386_v50 = vmul.f32 %v384_v49, %v384_v49 }
 0x135   : > { %v390_v51 = vsel %vm367_vm1, %v386_v50, 0.0 }
 0x136   : > { %391 = vadd.xlane.f32.xlu2 %v390_v51 }
 0x1a1   : > { %v389_v52 = vpop.xlane.xlu2 %388 }
 0x1a2   : > { %v393_v53 = vmul.f32 %v389_v52, %v380_v41 }
 0x1a4   : > { %v395_v54 = vadd.f32 1e-05, %v393_v53 }
 0x1a6   : > { %590 = vrsqrt.f32 %v395_v54  ;;  %vm403_vm4 = vweird.f32 %v395_v54 }
 0x1a9   : > { %v392_v55 = vpop.xlane.xlu2 %391 }
 0x1aa   : > { %v394_v56 = vmul.f32 %v392_v55, %v380_v41 }
 0x1ac   : > { %v591_v57 = vpop.eup %590  ;;  %v396_v58 = vadd.f32 1e-05, %v394_v56 }
 0x1ad   : > { %v398_v59 = vmul.f32 %v591_v57, %v395_v54  ;;  %vm404_vm3 = vweird.f32 %v591_v57 }
 0x1ae   : > { %592 = vrsqrt.f32 %v396_v58  ;;  %vm405_vm5 = vmor %vm403_vm4, %vm404_vm3  ;;  %vm413_vm8 = vweird.f32 %v396_v58 }
 0x1af   : > { %v399_v60 = vmul.f32 %v591_v57, %v398_v59 }
 0x1b1   : > { %v400_v61 = vmul.f32 0.5, %v399_v60 }
 0x1b3   : > { %v401_v62 = vsub.f32 1.5, %v400_v61 }
 0x1b4   : > { %v593_v63 = vpop.eup %592 }
 0x1b5   : > { %v402_v0 = vmul.f32 %v591_v57, %v401_v62  ;;  %v408_v1 = vmul.f32 %v593_v63, %v396_v58  ;;  %vm414_vm7 = vweird.f32 %v593_v63 }
 0x1b6   : > { %vm415_vm9 = vmor %vm413_vm8, %vm414_vm7 }
 0x1b7   : > { %v406_v3 = vsel %vm405_vm5, %v591_v57, %v402_v0  ;;  %v409_v4 = vmul.f32 %v593_v63, %v408_v1 }
 0x1b8   : > { %v417_v5 = vmul.f32 %v406_v3, %v383_v44 }
 0x1b9   : > { %v410_v6 = vmul.f32 0.5, %v409_v4 }
 0x1ba   : > { %vm420_vm6 = vcmp.ge.f32.partialorder %v417_v5, 0.0  ;;  %v423_v7 = vmul.f32 %v422_v2, %v417_v5 }
 0x1bb   : > { %v411_v8 = vsub.f32 1.5, %v410_v6 }
 0x1bc   : > { %v425_v9 = vsel %vm420_vm6, %v417_v5, %v423_v7 }
 0x1bd   : > { %427 = vst.msk [vmem:[%s198_s12] sm:$0xff] %vm367_vm1, %v425_v9  ;;  %v412_v10 = vmul.f32 %v593_v63, %v411_v8 }
 0x1bf   : > { %v416_v11 = vsel %vm415_vm9, %v593_v63, %v412_v10 }
 0x1c0   : > { %v418_v12 = vmul.f32 %v416_v11, %v384_v49 }
 0x1c2   : > { %vm421_vm10 = vcmp.ge.f32.partialorder %v418_v12, 0.0  ;;  %v424_v13 = vmul.f32 %v422_v2, %v418_v12 }
 0x1c4   : > { %v426_v14 = vsel %vm421_vm10, %v418_v12, %v424_v13 }
 0x1c5   : > { %428 = vst.msk [vmem:[%s198_s12 + $0x8] sm:$0xff] %vm367_vm1, %v426_v14 }
 0x1c6 PF: > { %s15_s17 = sadd.s32 1, %s600_s17  }
 0x1c7   : > { %p12_p4 = scmp.ge.s32.totalorder %s15_s17, 4  }
 0x1c9   :  { %14 = sbr.rel (!%p12_p4) target bundleno = 2 (0x2), region = 66 }

// kernel: monai_unet_forward.8
= control target key start
LH: loop header
LB: loop body
LE: loop exit
PB: predicated region body
PF: predicated region fallthrough
CT: control target
= control target key end

     0   :  { %s2651_s23 = smov 0   ;;  %s3071_s0 = inlined_call_operand.vmem [shape: bf16[2,224,512], index: 0, kind: input, shape index: {}]   ;;  %s3072_s1 = inlined_call_operand.vmem [shape: bf16[2,432,512], index: 1, kind: input, shape index: {}]   ;;  %s3073_s2 = inlined_call_operand.vmem [shape: bf16[4,224], index: 2, kind: input, shape index: {}]   ;;  %s3074_s3 = inlined_call_operand.vmem [shape: bf16[4,432], index: 3, kind: input, shape index: {}]   ;;  %s3075_s4 = inlined_call_operand.vmem [shape: f32[4,1], index: 4, kind: input, shape index: {}]   ;;  %s3076_s5 = inlined_call_operand.<no memory space> [shape: f32[1], index: 5, kind: input, shape index: {}]   ;;  %s3077_s6 = inlined_call_operand.vmem [shape: f32[2,4,512], index: 6, kind: output, shape index: {}]  }
   0x1   :  { %11 = sst [smem:[#allocation2]] %s3076_s5 }
   0x2 LB: > { %s1746_s24 = sadd.s32 4294967295, %s2609_s23   ;;  %p1750_p0 = scmp.ge.s32.totalorder %s2609_s23, 1  ;;  %s2609_s23 = sphi %s2651_s23, %s17_s23  }
   0x3   : > { %p223_p1 = scmp.lt.s32.totalorder %s2609_s23, 3 }
   0x5   : > { %p224_p2 = pnand %p1750_p0, %p223_p1 }
   0x6   : > { %p258_p3 = scmp.lt.s32.totalorder (!%p224_p2), %s1746_s24, 1  ;;  %s1653_s14 = sld [smem:[#allocation2]] (!%p224_p2) }
   0x7   : > { %227 = sbr.rel (%p224_p2) target bundleno = 610 (0x262), region = 44 }
   0xc   : > { %v331_v0 = vld [vmem:[%s3074_s3] sm:$0xff]  ;;  %s3079_s24 = smov (!%p258_p3, %s1746_s24), 1  ;;  %vm989_vm0 = vcmask 392192   ;;  %vm1485_vm1 = vcmask 785408   ;;  %vm1602_vm2 = vcmask 1043456  }
   0xd   : > { %441 = vst [vmem:[#allocation1] ss:$4 sm:$0xff] %v331_v0  ;;  %s2587_s5 = smul.u32 864, %s3079_s24  ;;  %s2421_s15 = sshll.u32 %s3079_s24, 4 }
   0xe   : > { %s2586_s8 = smul.u32 448, %s3079_s24  ;;  %s272_s18 = scalar_lea.vmem %s3077_s6, %s2421_s15 }
   0xf   : > { %s2668_s29 = scalar_lea.vmem %s3072_s1, %s2587_s5 }
  0x10   : > { %v1869_v1 = vld [vmem:[%s2668_s29 + $0xe0] sm:$0xf]  ;;  %v2508_v2 = vld [vmem:[%s2668_s29 + $0xec] sm:$0xf0]  ;;  %v2506_v32 = vld [vmem:[%s2668_s29 + $0xe4] sm:$0xf]  ;;  %s2905_s11 = scalar_lea.vmem %s3071_s0, %s2586_s8 }
  0x11   : > { %v1997_v3 = vld [vmem:[%s2668_s29 + $0x1e0] sm:$0xf]  ;;  %v1870_v4 = vor.u32 %v2508_v2, %v1869_v1  ;;  %v2540_v5 = vld [vmem:[%s2668_s29 + $0x1ec] sm:$0xf0]  ;;  %v1871_v33 = vld [vmem:[%s2668_s29 + $0xf0] sm:$0xf0] }
  0x12   : > { %v2173_v6 = vld [vmem:[%s2668_s29 + $0x340] sm:$0xf]  ;;  %v2584_v7 = vld [vmem:[%s2668_s29 + $0x34c] sm:$0xf0]  ;;  %v1998_v8 = vor.u32 %v2540_v5, %v1997_v3  ;;  %v1874_v39 = vor.u32 %v2506_v32, %v1871_v33  ;;  %v2502_v44 = vld [vmem:[%s2668_s29 + $0xc4] sm:$0xf] }
  0x13   : > { %v2174_v9 = vor.u32 %v2584_v7, %v2173_v6  ;;  %v1853_v10 = vld [vmem:[%s2668_s29 + $0xc0] sm:$0xf]  ;;  %v2504_v11 = vld [vmem:[%s2668_s29 + $0xcc] sm:$0xf0]  ;;  %992 = vmatpush.bf16.msra.mxu0 %v1870_v4  ;;  %v1855_v45 = vld [vmem:[%s2668_s29 + $0xd0] sm:$0xf0] }
  0x14   : > { %v1981_v12 = vld [vmem:[%s2668_s29 + $0x1c0] sm:$0xf]  ;;  %v1854_v13 = vor.u32 %v2504_v11, %v1853_v10  ;;  %v2536_v14 = vld [vmem:[%s2668_s29 + $0x1cc] sm:$0xf0]  ;;  %1005 = vmatpush.bf16.msra.mxu1 %v1998_v8  ;;  %v1858_v52 = vor.u32 %v2502_v44, %v1855_v45  ;;  %v2498_v56 = vld [vmem:[%s2668_s29 + $0xa4] sm:$0xf] }
  0x15   : > { %v2125_v15 = vld [vmem:[%s2668_s29 + $0x2e0] sm:$0xf]  ;;  %v2572_v16 = vld [vmem:[%s2668_s29 + $0x2ec] sm:$0xf0]  ;;  %1036 = vmatpush.bf16.msra.mxu3 %v2174_v9  ;;  %v1982_v17 = vor.u32 %v2536_v14, %v1981_v12  ;;  %v1839_v57 = vld [vmem:[%s2668_s29 + $0xb0] sm:$0xf0] }
  0x16   : > { %v2126_v18 = vor.u32 %v2572_v16, %v2125_v15  ;;  %v2157_v19 = vld [vmem:[%s2668_s29 + $0x320] sm:$0xf]  ;;  %v2580_v20 = vld [vmem:[%s2668_s29 + $0x32c] sm:$0xf0]  ;;  %v1842_v0 = vor.u32 %v2498_v56, %v1839_v57  ;;  %v2494_v4 = vld [vmem:[%s2668_s29 + $0x84] sm:$0xf] }
  0x17   : > { %v1837_v21 = vld [vmem:[%s2668_s29 + $0xa0] sm:$0xf]  ;;  %v2158_v22 = vor.u32 %v2580_v20, %v2157_v19  ;;  %v2500_v23 = vld [vmem:[%s2668_s29 + $0xac] sm:$0xf0]  ;;  %993 = vmatpush.bf16.msra.mxu0 %v1854_v13  ;;  %v1823_v5 = vld [vmem:[%s2668_s29 + $0x90] sm:$0xf0] }
  0x18   : > { %v1965_v24 = vld [vmem:[%s2668_s29 + $0x1a0] sm:$0xf]  ;;  %v2532_v25 = vld [vmem:[%s2668_s29 + $0x1ac] sm:$0xf0]  ;;  %1018 = vmatpush.bf16.msra.mxu2 %v2126_v18  ;;  %v1838_v29 = vor.u32 %v2500_v23, %v1837_v21  ;;  %1006 = vmatpush.bf16.msra.mxu1 %v1982_v17  ;;  %v1826_v13 = vor.u32 %v2494_v4, %v1823_v5  ;;  %v2490_v15 = vld [vmem:[%s2668_s29 + $0x64] sm:$0xf] }
  0x19   : > { %v2109_v26 = vld [vmem:[%s2668_s29 + $0x2c0] sm:$0xf]  ;;  %v2568_v27 = vld [vmem:[%s2668_s29 + $0x2cc] sm:$0xf0]  ;;  %1037 = vmatpush.bf16.msra.mxu3 %v2158_v22  ;;  %v1966_v34 = vor.u32 %v2532_v25, %v1965_v24  ;;  %v1807_v16 = vld [vmem:[%s2668_s29 + $0x70] sm:$0xf0] }
  0x1a   : > { %v2141_v28 = vld [vmem:[%s2668_s29 + $0x300] sm:$0xf]  ;;  %v2110_v30 = vor.u32 %v2568_v27, %v2109_v26  ;;  %v2576_v31 = vld [vmem:[%s2668_s29 + $0x30c] sm:$0xf0]  ;;  %v1810_v27 = vor.u32 %v2490_v15, %v1807_v16  ;;  %v1791_v32 = vld [vmem:[%s2668_s29 + $0x50] sm:$0xf0] }
  0x1b   : > { %v2142_v35 = vor.u32 %v2576_v31, %v2141_v28  ;;  %v1821_v36 = vld [vmem:[%s2668_s29 + $0x80] sm:$0xf]  ;;  %v2496_v37 = vld [vmem:[%s2668_s29 + $0x8c] sm:$0xf0]  ;;  %994 = vmatpush.bf16.msra.mxu0 %v1838_v29  ;;  %v2486_v28 = vld [vmem:[%s2668_s29 + $0x44] sm:$0xf] }
  0x1c   : > { %v1949_v38 = vld [vmem:[%s2668_s29 + $0x180] sm:$0xf]  ;;  %v2528_v40 = vld [vmem:[%s2668_s29 + $0x18c] sm:$0xf0]  ;;  %1019 = vmatpush.bf16.msra.mxu2 %v2110_v30  ;;  %v1822_v46 = vor.u32 %v2496_v37, %v1821_v36  ;;  %1007 = vmatpush.bf16.msra.mxu1 %v1966_v34  ;;  %v2538_v29 = vld [vmem:[%s2668_s29 + $0x1e4] sm:$0xf]  ;;  %v1794_v45 = vor.u32 %v2486_v28, %v1791_v32 }
  0x1d   : > { %v2093_v41 = vld [vmem:[%s2668_s29 + $0x2a0] sm:$0xf]  ;;  %v2564_v42 = vld [vmem:[%s2668_s29 + $0x2ac] sm:$0xf0]  ;;  %1038 = vmatpush.bf16.msra.mxu3 %v2142_v35  ;;  %v1950_v48 = vor.u32 %v2528_v40, %v1949_v38  ;;  %v1999_v30 = vld [vmem:[%s2668_s29 + $0x1f0] sm:$0xf0] }
  0x1e   : > { %v2094_v43 = vor.u32 %v2564_v42, %v2093_v41  ;;  %v1805_v47 = vld [vmem:[%s2668_s29 + $0x60] sm:$0xf]  ;;  %v2492_v49 = vld [vmem:[%s2668_s29 + $0x6c] sm:$0xf0]  ;;  %v2570_v33 = vld [vmem:[%s2668_s29 + $0x2e4] sm:$0xf] }
  0x1f   : > { %v2077_v50 = vld [vmem:[%s2668_s29 + $0x280] sm:$0xf]  ;;  %v2560_v51 = vld [vmem:[%s2668_s29 + $0x28c] sm:$0xf0]  ;;  %995 = vmatpush.bf16.msra.mxu0 %v1822_v46  ;;  %v1806_v58 = vor.u32 %v2492_v49, %v1805_v47  ;;  %v2127_v34 = vld [vmem:[%s2668_s29 + $0x2f0] sm:$0xf0] }
  0x20   : > { %v1933_v53 = vld [vmem:[%s2668_s29 + $0x160] sm:$0xf]  ;;  %v2524_v54 = vld [vmem:[%s2668_s29 + $0x16c] sm:$0xf0]  ;;  %1020 = vmatpush.bf16.msra.mxu2 %v2094_v43  ;;  %v2078_v55 = vor.u32 %v2560_v51, %v2077_v50  ;;  %1008 = vmatpush.bf16.msra.mxu1 %v1950_v48  ;;  %v2482_v40 = vld [vmem:[%s2668_s29 + $0x24] sm:$0xf]  ;;  %v2130_v46 = vor.u32 %v2570_v33, %v2127_v34 }
  0x21   : > { %1044 = vmatpush.bf16.msrb.mxu3 %v1874_v39  ;;  %v2061_v59 = vld [vmem:[%s2668_s29 + $0x260] sm:$0xf]  ;;  %v2556_v60 = vld [vmem:[%s2668_s29 + $0x26c] sm:$0xf0]  ;;  %v1934_v61 = vor.u32 %v2524_v54, %v1933_v53  ;;  %v2002_v39 = vor.u32 %v2538_v29, %v1999_v30  ;;  %v1775_v41 = vld [vmem:[%s2668_s29 + $0x30] sm:$0xf0] }
  0x22   : > { %v1789_v62 = vld [vmem:[%s2668_s29 + $0x40] sm:$0xf]  ;;  %v2488_v63 = vld [vmem:[%s2668_s29 + $0x4c] sm:$0xf0]  ;;  %v2062_v3 = vor.u32 %v2556_v60, %v2061_v59  ;;  %v2534_v42 = vld [vmem:[%s2668_s29 + $0x1c4] sm:$0xf]  ;;  %v1778_v60 = vor.u32 %v2482_v40, %v1775_v41 }
  0x23   : > { %v1917_v1 = vld [vmem:[%s2668_s29 + $0x140] sm:$0xf]  ;;  %v2520_v2 = vld [vmem:[%s2668_s29 + $0x14c] sm:$0xf0]  ;;  %996 = vmatpush.bf16.msra.mxu0 %v1806_v58  ;;  %v1790_v6 = vor.u32 %v2488_v63, %v1789_v62  ;;  %v2582_v43 = vld [vmem:[%s2668_s29 + $0x344] sm:$0xf] }
  0x24   : > { %1021 = vmatpush.bf16.msra.mxu2 %v2078_v55  ;;  %v2045_v7 = vld [vmem:[%s2668_s29 + $0x240] sm:$0xf]  ;;  %v2552_v8 = vld [vmem:[%s2668_s29 + $0x24c] sm:$0xf0]  ;;  %1009 = vmatpush.bf16.msra.mxu1 %v1934_v61  ;;  %v1918_v9 = vor.u32 %v2520_v2, %v1917_v1  ;;  %v2175_v44 = vld [vmem:[%s2668_s29 + $0x350] sm:$0xf0] }
  0x25   : > { %1045 = vmatpush.bf16.msrb.mxu3 %v1858_v52  ;;  %v1773_v10 = vld [vmem:[%s2668_s29 + $0x20] sm:$0xf]  ;;  %v2484_v11 = vld [vmem:[%s2668_s29 + $0x2c] sm:$0xf0]  ;;  %v2046_v17 = vor.u32 %v2552_v8, %v2045_v7  ;;  %v1983_v47 = vld [vmem:[%s2668_s29 + $0x1d0] sm:$0xf0]  ;;  %v2178_v53 = vor.u32 %v2582_v43, %v2175_v44 }
  0x26   : > { %v1901_v12 = vld [vmem:[%s2668_s29 + $0x120] sm:$0xf]  ;;  %v2516_v14 = vld [vmem:[%s2668_s29 + $0x12c] sm:$0xf0]  ;;  %v1774_v20 = vor.u32 %v2484_v11, %v1773_v10  ;;  %v2566_v48 = vld [vmem:[%s2668_s29 + $0x2c4] sm:$0xf]  ;;  %v1986_v56 = vor.u32 %v2534_v42, %v1983_v47 }
  0x27   : > { %v1757_v18 = vld [vmem:[%s2668_s29] sm:$0xf]  ;;  %997 = vmatpush.bf16.msra.mxu0 %v1790_v6  ;;  %v2548_v21 = vld [vmem:[%s2668_s29 + $0x22c] sm:$0xf0]  ;;  %v1902_v23 = vor.u32 %v2516_v14, %v1901_v12  ;;  %v2111_v49 = vld [vmem:[%s2668_s29 + $0x2d0] sm:$0xf0] }
  0x28   : > { %1022 = vmatpush.bf16.msra.mxu2 %v2062_v3  ;;  %v2029_v19 = vld [vmem:[%s2668_s29 + $0x220] sm:$0xf]  ;;  %v2729_v22 = vld.sshfl [vmem:[#allocation1 + $0x18] sm:$0xff pattern:$0x73625140]  ;;  %1010 = vmatpush.bf16.msra.mxu1 %v1918_v9  ;;  %v2114_v61 = vor.u32 %v2566_v48, %v2111_v49 }
  0x29   : > { %1046 = vmatpush.bf16.msrb.mxu3 %v1842_v0  ;;  %v2480_v24 = vld [vmem:[%s2668_s29 + $0xc] sm:$0xf0]  ;;  %v1885_v25 = vld [vmem:[%s2668_s29 + $0x100] sm:$0xf]  ;;  %v2030_v31 = vor.u32 %v2548_v21, %v2029_v19  ;;  %v2578_v52 = vld [vmem:[%s2668_s29 + $0x324] sm:$0xf] }
  0x2a   : > { %v2512_v26 = vld [vmem:[%s2668_s29 + $0x10c] sm:$0xf0]  ;;  %2187 = vmatmul.msk.bf16.vlgmr.msra.gmra.mxu3 %vm989_vm0, %v2729_v22  ;;  %v1758_v35 = vor.u32 %v2480_v24, %v1757_v18  ;;  %v2013_v36 = vld [vmem:[%s2668_s29 + $0x200] sm:$0xf]  ;;  %v2478_v57 = vld [vmem:[%s2668_s29 + $0x4] sm:$0xf] }
  0x2b   : > { %998 = vmatpush.bf16.msra.mxu0 %v1774_v20  ;;  %v2544_v37 = vld [vmem:[%s2668_s29 + $0x20c] sm:$0xf0]  ;;  %v1886_v38 = vor.u32 %v2512_v26, %v1885_v25  ;;  %v2755_v54 = vld.sshfl [vmem:[#allocation1] sm:$0xff pattern:$0x73625140] }
  0x2c   : > { %1023 = vmatpush.bf16.msra.mxu2 %v2046_v17  ;;  %1011 = vmatpush.bf16.msra.mxu1 %v1902_v23  ;;  %v2014_v50 = vor.u32 %v2544_v37, %v2013_v36  ;;  %v2752_v51 = vld.sshfl [vmem:[#allocation1 + $0x10] sm:$0xff pattern:$0x73625140]  ;;  %v274_v55 = vld [vmem:[%s3073_s2] sm:$0xf] }
  0x2d   : > { %1047 = vmatpush.bf16.msrb.mxu3 %v1826_v13  ;;  %v2159_v58 = vld [vmem:[%s2668_s29 + $0x330] sm:$0xf0]  ;;  %v2762_v59 = vld.sshfl [vmem:[#allocation1 + $0x8] sm:$0xff pattern:$0x73625140] }
  0x2e   : > { %v2530_v62 = vld [vmem:[%s2668_s29 + $0x1a4] sm:$0xf]  ;;  %v1967_v63 = vld [vmem:[%s2668_s29 + $0x1b0] sm:$0xf0]  ;;  %1201 = vst [vmem:[#allocation1] ss:$4 sm:$0xff] %v274_v55  ;;  %v2162_v3 = vor.u32 %v2578_v52, %v2159_v58 }
  0x2f   : > { %999 = vmatpush.bf16.msra.mxu0 %v1758_v35  ;;  %v1759_v0 = vld [vmem:[%s2668_s29 + $0x10] sm:$0xf0]  ;;  %v2562_v1 = vld [vmem:[%s2668_s29 + $0x2a4] sm:$0xf]  ;;  %v1877_v4 = vld [vmem:[%s2668_s29 + $0xe8] sm:$0xf]  ;;  %v1970_v6 = vor.u32 %v2530_v62, %v1967_v63 }
  0x30   : > { %1024 = vmatpush.bf16.msra.mxu2 %v2030_v31  ;;  %1012 = vmatpush.bf16.msra.mxu1 %v1886_v38  ;;  %v2095_v2 = vld [vmem:[%s2668_s29 + $0x2b0] sm:$0xf0]  ;;  %v2509_v5 = vld [vmem:[%s2668_s29 + $0xf4] sm:$0xf0]  ;;  %v2526_v7 = vld [vmem:[%s2668_s29 + $0x184] sm:$0xf]  ;;  %v1762_v10 = vor.u32 %v2478_v57, %v1759_v0 }
  0x31   : > { %1048 = vmatpush.bf16.msrb.mxu3 %v1810_v27  ;;  %v2574_v8 = vld [vmem:[%s2668_s29 + $0x304] sm:$0xf]  ;;  %v2143_v9 = vld [vmem:[%s2668_s29 + $0x310] sm:$0xf0]  ;;  %v2098_v11 = vor.u32 %v2562_v1, %v2095_v2  ;;  %v2005_v13 = vld [vmem:[%s2668_s29 + $0x1e8] sm:$0xf]  ;;  %v1878_v15 = vor.u32 %v2509_v5, %v1877_v4 }
  0x32   : > { %1000 = vmatmul.bf16.vlgmr.msra.gmra.mxu0 %v2755_v54  ;;  %v1951_v12 = vld [vmem:[%s2668_s29 + $0x190] sm:$0xf0]  ;;  %v2541_v14 = vld [vmem:[%s2668_s29 + $0x1f4] sm:$0xf0]  ;;  %v2558_v16 = vld [vmem:[%s2668_s29 + $0x284] sm:$0xf]  ;;  %v2146_v18 = vor.u32 %v2574_v8, %v2143_v9 }
  0x33   : > { %1057 = vmatpush.bf16.msrb.mxu0 %v2002_v39  ;;  %1013 = vmatmul.bf16.vlgmr.msra.gmra.mxu1 %v2762_v59  ;;  %v2079_v17 = vld [vmem:[%s2668_s29 + $0x290] sm:$0xf0]  ;;  %v1861_v19 = vld [vmem:[%s2668_s29 + $0xc8] sm:$0xf]  ;;  %v2505_v20 = vld [vmem:[%s2668_s29 + $0xd4] sm:$0xf0]  ;;  %v1954_v21 = vor.u32 %v2526_v7, %v1951_v12  ;;  %v2006_v23 = vor.u32 %v2541_v14, %v2005_v13 }
  0x34   : > { %1070 = vmatpush.bf16.msrb.mxu1 %v2130_v46  ;;  %1025 = vmatpush.bf16.msra.mxu2 %v2014_v50  ;;  %v2522_v24 = vld [vmem:[%s2668_s29 + $0x164] sm:$0xf]  ;;  %v2082_v25 = vor.u32 %v2558_v16, %v2079_v17  ;;  %v1935_v26 = vld [vmem:[%s2668_s29 + $0x170] sm:$0xf0]  ;;  %v1989_v27 = vld [vmem:[%s2668_s29 + $0x1c8] sm:$0xf]  ;;  %v1862_v29 = vor.u32 %v2505_v20, %v1861_v19 }
  0x35   : > { %1049 = vmatpush.bf16.msrb.mxu3 %v1794_v45  ;;  %v2537_v28 = vld [vmem:[%s2668_s29 + $0x1d4] sm:$0xf0]  ;;  %v2554_v30 = vld [vmem:[%s2668_s29 + $0x264] sm:$0xf]  ;;  %v2063_v31 = vld [vmem:[%s2668_s29 + $0x270] sm:$0xf0]  ;;  %v1938_v34 = vor.u32 %v2522_v24, %v1935_v26 }
  0x36   : > { %v1845_v32 = vld [vmem:[%s2668_s29 + $0xa8] sm:$0xf]  ;;  %v2501_v33 = vld [vmem:[%s2668_s29 + $0xb4] sm:$0xf0]  ;;  %v1990_v35 = vor.u32 %v2537_v28, %v1989_v27  ;;  %v2518_v36 = vld [vmem:[%s2668_s29 + $0x144] sm:$0xf]  ;;  %v2066_v37 = vor.u32 %v2554_v30, %v2063_v31 }
  0x37   : > { %1058 = vmatpush.bf16.msrb.mxu0 %v1986_v56  ;;  %1026 = vmatmul.bf16.vlgmr.msra.gmra.mxu2 %v2752_v51  ;;  %v1919_v38 = vld [vmem:[%s2668_s29 + $0x150] sm:$0xf0]  ;;  %v1973_v39 = vld [vmem:[%s2668_s29 + $0x1a8] sm:$0xf]  ;;  %v2533_v40 = vld [vmem:[%s2668_s29 + $0x1b4] sm:$0xf0]  ;;  %v1846_v41 = vor.u32 %v2501_v33, %v1845_v32 }
  0x38   : > { %1088 = vmatpush.bf16.msrb.mxu2 %v2178_v53  ;;  %1071 = vmatpush.bf16.msrb.mxu1 %v2114_v61  ;;  %v2550_v42 = vld [vmem:[%s2668_s29 + $0x244] sm:$0xf]  ;;  %v2047_v43 = vld [vmem:[%s2668_s29 + $0x250] sm:$0xf0]  ;;  %v1829_v44 = vld [vmem:[%s2668_s29 + $0x88] sm:$0xf]  ;;  %v1922_v46 = vor.u32 %v2518_v36, %v1919_v38  ;;  %v1974_v47 = vor.u32 %v2533_v40, %v1973_v39 }
  0x39   : > { %1050 = vmatpush.bf16.msrb.mxu3 %v1778_v60  ;;  %v2497_v45 = vld [vmem:[%s2668_s29 + $0x94] sm:$0xf0]  ;;  %v2514_v48 = vld [vmem:[%s2668_s29 + $0x124] sm:$0xf]  ;;  %v2050_v49 = vor.u32 %v2550_v42, %v2047_v43  ;;  %v1903_v50 = vld [vmem:[%s2668_s29 + $0x130] sm:$0xf0] }
  0x3a   : > { %v1957_v52 = vld [vmem:[%s2668_s29 + $0x188] sm:$0xf]  ;;  %v2529_v53 = vld [vmem:[%s2668_s29 + $0x194] sm:$0xf0]  ;;  %v1830_v55 = vor.u32 %v2497_v45, %v1829_v44  ;;  %v2546_v56 = vld [vmem:[%s2668_s29 + $0x224] sm:$0xf]  ;;  %v1906_v61 = vor.u32 %v2514_v48, %v1903_v50 }
  0x3b   : > { %1059 = vmatpush.bf16.msrb.mxu0 %v1970_v6  ;;  %v2031_v57 = vld [vmem:[%s2668_s29 + $0x230] sm:$0xf0]  ;;  %v1813_v58 = vld [vmem:[%s2668_s29 + $0x68] sm:$0xf]  ;;  %v2493_v60 = vld [vmem:[%s2668_s29 + $0x74] sm:$0xf0]  ;;  %v1958_v62 = vor.u32 %v2529_v53, %v1957_v52 }
  0x3c   : > { %1089 = vmatpush.bf16.msrb.mxu2 %v2162_v3  ;;  %1072 = vmatpush.bf16.msrb.mxu1 %v2098_v11  ;;  %v2510_v63 = vld [vmem:[%s2668_s29 + $0x104] sm:$0xf]  ;;  %v1887_v0 = vld [vmem:[%s2668_s29 + $0x110] sm:$0xf0]  ;;  %v2034_v2 = vor.u32 %v2546_v56, %v2031_v57  ;;  %v1941_v4 = vld [vmem:[%s2668_s29 + $0x168] sm:$0xf]  ;;  %v1814_v6 = vor.u32 %v2493_v60, %v1813_v58 }
  0x3d   : > { %1051 = vmatpush.bf16.msrb.mxu3 %v1762_v10  ;;  %v2542_v1 = vld [vmem:[%s2668_s29 + $0x204] sm:$0xf]  ;;  %v2015_v3 = vld [vmem:[%s2668_s29 + $0x210] sm:$0xf0]  ;;  %v2525_v5 = vld [vmem:[%s2668_s29 + $0x174] sm:$0xf0]  ;;  %v1890_v13 = vor.u32 %v2510_v63, %v1887_v0 }
  0x3e   : > { %v1797_v7 = vld [vmem:[%s2668_s29 + $0x48] sm:$0xf]  ;;  %v2573_v9 = vld [vmem:[%s2668_s29 + $0x2f4] sm:$0xf0]  ;;  %v1942_v14 = vor.u32 %v2525_v5, %v1941_v4  ;;  %v2507_v40 = vld [vmem:[%s2668_s29 + $0xec] sm:$0xf] }
  0x3f   : > { %1060 = vmatpush.bf16.msrb.mxu0 %v1954_v21  ;;  %v2133_v8 = vld [vmem:[%s2668_s29 + $0x2e8] sm:$0xf]  ;;  %v2489_v10 = vld [vmem:[%s2668_s29 + $0x54] sm:$0xf0]  ;;  %v1879_v42 = vld [vmem:[%s2668_s29 + $0xf8] sm:$0xf0] }
  0x40   : > { %1090 = vmatpush.bf16.msrb.mxu2 %v2146_v18  ;;  %1073 = vmatpush.bf16.msrb.mxu1 %v2082_v25  ;;  %v2181_v11 = vld [vmem:[%s2668_s29 + $0x348] sm:$0xf]  ;;  %v2585_v12 = vld [vmem:[%s2668_s29 + $0x354] sm:$0xf0]  ;;  %v2134_v16 = vor.u32 %v2573_v9, %v2133_v8  ;;  %v1798_v19 = vor.u32 %v2489_v10, %v1797_v7  ;;  %v2539_v43 = vld [vmem:[%s2668_s29 + $0x1ec] sm:$0xf]  ;;  %v1882_v56 = vor.u32 %v2507_v40, %v1879_v42 }
  0x41   : > { %1096 = vmatpush.bf16.msra.mxu3 %v1878_v15  ;;  %v2018_v15 = vor.u32 %v2542_v1, %v2015_v3  ;;  %v1925_v17 = vld [vmem:[%s2668_s29 + $0x148] sm:$0xf]  ;;  %v2521_v18 = vld [vmem:[%s2668_s29 + $0x154] sm:$0xf0]  ;;  %v2182_v20 = vor.u32 %v2585_v12, %v2181_v11  ;;  %v2007_v44 = vld [vmem:[%s2668_s29 + $0x1f8] sm:$0xf0] }
  0x42   : > { %1052 = vmatmul.bf16.vlgmr.msrb.gmra.mxu3 %v2755_v54  ;;  %v1781_v21 = vld [vmem:[%s2668_s29 + $0x28] sm:$0xf]  ;;  %v2569_v24 = vld [vmem:[%s2668_s29 + $0x2d4] sm:$0xf0]  ;;  %v1926_v28 = vor.u32 %v2521_v18, %v1925_v17  ;;  %v2571_v53 = vld [vmem:[%s2668_s29 + $0x2ec] sm:$0xf]  ;;  %v2010_v57 = vor.u32 %v2539_v43, %v2007_v44 }
  0x43   : > { %1061 = vmatpush.bf16.msrb.mxu0 %v1938_v34  ;;  %v2485_v25 = vld [vmem:[%s2668_s29 + $0x34] sm:$0xf0]  ;;  %v2165_v26 = vld [vmem:[%s2668_s29 + $0x328] sm:$0xf]  ;;  %v2503_v58 = vld [vmem:[%s2668_s29 + $0xcc] sm:$0xf] }
  0x44   : > { %1109 = vmatpush.bf16.msra.mxu2 %v2006_v23  ;;  %1074 = vmatpush.bf16.msrb.mxu1 %v2066_v37  ;;  %v2117_v23 = vld [vmem:[%s2668_s29 + $0x2c8] sm:$0xf]  ;;  %v2581_v27 = vld [vmem:[%s2668_s29 + $0x334] sm:$0xf0]  ;;  %v1782_v33 = vor.u32 %v2485_v25, %v1781_v21  ;;  %v1991_v63 = vld [vmem:[%s2668_s29 + $0x1d8] sm:$0xf0] }
  0x45   : > { %1097 = vmatpush.bf16.msra.mxu3 %v1862_v29  ;;  %v2118_v29 = vor.u32 %v2569_v24, %v2117_v23  ;;  %v1765_v30 = vld [vmem:[%s2668_s29 + $0x8] sm:$0xf]  ;;  %v2517_v32 = vld [vmem:[%s2668_s29 + $0x134] sm:$0xf0]  ;;  %v2166_v34 = vor.u32 %v2581_v27, %v2165_v26  ;;  %v2567_v4 = vld [vmem:[%s2668_s29 + $0x2cc] sm:$0xf] }
  0x46   : > { %v1909_v31 = vld [vmem:[%s2668_s29 + $0x128] sm:$0xf]  ;;  %v2565_v37 = vld [vmem:[%s2668_s29 + $0x2b4] sm:$0xf0]  ;;  %v2119_v5 = vld [vmem:[%s2668_s29 + $0x2d8] sm:$0xf0] }
  0x47   : > { %1062 = vmatpush.bf16.msrb.mxu0 %v1922_v46  ;;  %2188 = vmatmul.msk.bf16.vlgmr.msrb.gmra.mxu2 %vm989_vm0, %v2729_v22  ;;  %v2101_v36 = vld [vmem:[%s2668_s29 + $0x2a8] sm:$0xf]  ;;  %v2577_v39 = vld [vmem:[%s2668_s29 + $0x314] sm:$0xf0]  ;;  %v2499_v8 = vld [vmem:[%s2668_s29 + $0xac] sm:$0xf] }
  0x48   : > { %1110 = vmatpush.bf16.msra.mxu2 %v1990_v35  ;;  %1075 = vmatpush.bf16.msrb.mxu1 %v2050_v49  ;;  %v2481_v35 = vld [vmem:[%s2668_s29 + $0x14] sm:$0xf0]  ;;  %v2149_v38 = vld [vmem:[%s2668_s29 + $0x308] sm:$0xf]  ;;  %v2102_v45 = vor.u32 %v2565_v37, %v2101_v36  ;;  %v1847_v9 = vld [vmem:[%s2668_s29 + $0xb8] sm:$0xf0] }
  0x49   : > { %1098 = vmatpush.bf16.msra.mxu3 %v1846_v41  ;;  %v1910_v41 = vor.u32 %v2517_v32, %v1909_v31  ;;  %v1893_v46 = vld [vmem:[%s2668_s29 + $0x108] sm:$0xf]  ;;  %v1766_v49 = vor.u32 %v2481_v35, %v1765_v30  ;;  %v2150_v50 = vor.u32 %v2577_v39, %v2149_v38  ;;  %v2561_v52 = vld [vmem:[%s2668_s29 + $0x294] sm:$0xf0]  ;;  %v2531_v10 = vld [vmem:[%s2668_s29 + $0x1ac] sm:$0xf]  ;;  %v1850_v18 = vor.u32 %v2499_v8, %v1847_v9 }
  0x4a   : > { %v2085_v48 = vld [vmem:[%s2668_s29 + $0x288] sm:$0xf]  ;;  %v2557_v3 = vld [vmem:[%s2668_s29 + $0x274] sm:$0xf0]  ;;  %v1975_v11 = vld [vmem:[%s2668_s29 + $0x1b8] sm:$0xf0] }
  0x4b   : > { %1063 = vmatpush.bf16.msrb.mxu0 %v1906_v61  ;;  %v1863_v61 = vld [vmem:[%s2668_s29 + $0xd8] sm:$0xf0]  ;;  %v2086_v0 = vor.u32 %v2561_v52, %v2085_v48  ;;  %v2527_v23 = vld [vmem:[%s2668_s29 + $0x18c] sm:$0xf]  ;;  %v2037_v27 = vld [vmem:[%s2668_s29 + $0x228] sm:$0xf] }
  0x4c   : > { %1111 = vmatpush.bf16.msra.mxu2 %v1974_v47  ;;  %1076 = vmatpush.bf16.msrb.mxu1 %v2034_v2  ;;  %v2513_v47 = vld [vmem:[%s2668_s29 + $0x114] sm:$0xf0]  ;;  %v2069_v2 = vld [vmem:[%s2668_s29 + $0x268] sm:$0xf]  ;;  %v2103_v17 = vld [vmem:[%s2668_s29 + $0x2b8] sm:$0xf0] }
  0x4d   : > { %1099 = vmatpush.bf16.msra.mxu3 %v1830_v55  ;;  %v2135_v55 = vld [vmem:[%s2668_s29 + $0x2f8] sm:$0xf0]  ;;  %v1894_v60 = vor.u32 %v2513_v47, %v1893_v46  ;;  %v2070_v12 = vor.u32 %v2557_v3, %v2069_v2  ;;  %v2523_v35 = vld [vmem:[%s2668_s29 + $0x16c] sm:$0xf]  ;;  %v2021_v39 = vld [vmem:[%s2668_s29 + $0x208] sm:$0xf] }
  0x4e   : > { %v2138_v1 = vor.u32 %v2571_v53, %v2135_v55  ;;  %v1831_v21 = vld [vmem:[%s2668_s29 + $0x98] sm:$0xf0]  ;;  %v2545_v40 = vld [vmem:[%s2668_s29 + $0x214] sm:$0xf0]  ;;  %v2583_v46 = vld [vmem:[%s2668_s29 + $0x34c] sm:$0xf] }
  0x4f   : > { %1064 = vmatpush.bf16.msrb.mxu0 %v1890_v13  ;;  %v2122_v13 = vor.u32 %v2567_v4, %v2119_v5  ;;  %v1959_v24 = vld [vmem:[%s2668_s29 + $0x198] sm:$0xf0]  ;;  %v2022_v52 = vor.u32 %v2545_v40, %v2021_v39  ;;  %v2479_v5 = vld [vmem:[%s2668_s29 + $0xc] sm:$0xf]  ;;  %v2291_v39 = vld [vmem:[%s2905_s11 + $0xd0] sm:$0xf0] }
  0x50   : > { %1112 = vmatpush.bf16.msra.mxu2 %v1958_v62  ;;  %1077 = vmatpush.bf16.msrb.mxu1 %v2018_v15  ;;  %v2535_v62 = vld [vmem:[%s2668_s29 + $0x1cc] sm:$0xf]  ;;  %v2553_v15 = vld [vmem:[%s2668_s29 + $0x254] sm:$0xf0]  ;;  %v2087_v30 = vld [vmem:[%s2668_s29 + $0x298] sm:$0xf0]  ;;  %v1962_v32 = vor.u32 %v2527_v23, %v1959_v24 }
  0x51   : > { %1100 = vmatpush.bf16.msra.mxu3 %v1814_v6  ;;  %v1866_v6 = vor.u32 %v2503_v58, %v1863_v61  ;;  %v1994_v7 = vor.u32 %v2535_v62, %v1991_v63  ;;  %v1943_v36 = vld [vmem:[%s2668_s29 + $0x178] sm:$0xf0]  ;;  %v2483_v61 = vld [vmem:[%s2668_s29 + $0x2c] sm:$0xf]  ;;  %v2307_v23 = vld [vmem:[%s2905_s11 + $0xf0] sm:$0xf0] }
  0x52   : > { %1065 = vmatmul.bf16.vlgmr.msrb.gmra.mxu0 %v2762_v59  ;;  %v2071_v42 = vld [vmem:[%s2668_s29 + $0x278] sm:$0xf0]  ;;  %v1946_v44 = vor.u32 %v2523_v35, %v1943_v36  ;;  %v2579_v62 = vld [vmem:[%s2668_s29 + $0x32c] sm:$0xf]  ;;  %v2448_v35 = vld [vmem:[%s2905_s11 + $0xcc] sm:$0xf0] }
  0x53   : > { %1122 = vmatpush.bf16.msra.mxu0 %v2134_v16  ;;  %1078 = vmatmul.bf16.vlgmr.msrb.gmra.mxu1 %v2752_v51  ;;  %v2563_v16 = vld [vmem:[%s2668_s29 + $0x2ac] sm:$0xf]  ;;  %v2183_v47 = vld [vmem:[%s2668_s29 + $0x358] sm:$0xf0]  ;;  %v2385_v36 = vld [vmem:[%s2905_s11 + $0x180] sm:$0xf] }
  0x54   : > { %1113 = vmatpush.bf16.msra.mxu2 %v1942_v14  ;;  %1140 = vmatpush.bf16.msra.mxu1 %v2182_v20  ;;  %v2053_v14 = vld [vmem:[%s2668_s29 + $0x248] sm:$0xf]  ;;  %v2495_v20 = vld [vmem:[%s2668_s29 + $0x8c] sm:$0xf]  ;;  %v2106_v26 = vor.u32 %v2563_v16, %v2103_v17  ;;  %v1799_v48 = vld [vmem:[%s2668_s29 + $0x58] sm:$0xf0]  ;;  %v2186_v55 = vor.u32 %v2583_v46, %v2183_v47 }
  0x55   : > { %1101 = vmatpush.bf16.msra.mxu3 %v1798_v19  ;;  %v1978_v19 = vor.u32 %v2531_v10, %v1975_v11  ;;  %v2054_v25 = vor.u32 %v2553_v15, %v2053_v14  ;;  %v1834_v31 = vor.u32 %v2495_v20, %v1831_v21  ;;  %v2167_v63 = vld [vmem:[%s2668_s29 + $0x338] sm:$0xf0]  ;;  %v2511_v11 = vld [vmem:[%s2668_s29 + $0x10c] sm:$0xf]  ;;  %v2305_v15 = vld [vmem:[%s2905_s11 + $0xe0] sm:$0xf] }
  0x56   : > { %v1911_v2 = vld [vmem:[%s2668_s29 + $0x138] sm:$0xf0]  ;;  %v2170_v4 = vor.u32 %v2579_v62, %v2167_v63  ;;  %v2452_v16 = vld [vmem:[%s2905_s11 + $0xec] sm:$0xf0]  ;;  %v2450_v20 = vld [vmem:[%s2905_s11 + $0xe4] sm:$0xf] }
  0x57   : > { %1123 = vmatpush.bf16.msra.mxu0 %v2118_v29  ;;  %v2559_v29 = vld [vmem:[%s2668_s29 + $0x28c] sm:$0xf]  ;;  %v2039_v8 = vld [vmem:[%s2668_s29 + $0x238] sm:$0xf0]  ;;  %v2444_v47 = vld [vmem:[%s2905_s11 + $0xac] sm:$0xf0] }
  0x58   : > { %1114 = vmatpush.bf16.msra.mxu2 %v1926_v28  ;;  %1141 = vmatpush.bf16.msra.mxu1 %v2166_v34  ;;  %v2549_v28 = vld [vmem:[%s2668_s29 + $0x234] sm:$0xf0]  ;;  %v1815_v34 = vld [vmem:[%s2668_s29 + $0x78] sm:$0xf0]  ;;  %v2090_v38 = vor.u32 %v2559_v29, %v2087_v30  ;;  %v2543_v24 = vld [vmem:[%s2668_s29 + $0x20c] sm:$0xf]  ;;  %v2306_v30 = vor.u32 %v2452_v16, %v2305_v15 }
  0x59   : > { %1102 = vmatpush.bf16.msra.mxu3 %v1782_v33  ;;  %v2491_v33 = vld [vmem:[%s2668_s29 + $0x6c] sm:$0xf]  ;;  %v2038_v37 = vor.u32 %v2549_v28, %v2037_v27  ;;  %v1895_v14 = vld [vmem:[%s2668_s29 + $0x118] sm:$0xf0]  ;;  %v2474_v28 = vld [vmem:[%s2905_s11 + $0x1a4] sm:$0xf] }
  0x5a   : > { %v1818_v43 = vor.u32 %v2491_v33, %v1815_v34  ;;  %v1898_v27 = vor.u32 %v2511_v11, %v1895_v14  ;;  %v2403_v29 = vld [vmem:[%s2905_s11 + $0x1b0] sm:$0xf0]  ;;  %v2310_v33 = vor.u32 %v2450_v20, %v2307_v23  ;;  %v2440_v62 = vld [vmem:[%s2905_s11 + $0x8c] sm:$0xf0]  ;;  %v2611_v15 = vmov 0  }
  0x5b   : > { %1124 = vmatpush.bf16.msra.mxu0 %v2102_v45  ;;  %v2487_v45 = vld [vmem:[%s2668_s29 + $0x4c] sm:$0xf]  ;;  %v2406_v40 = vor.u32 %v2474_v28, %v2403_v29  ;;  %v2464_v63 = vld [vmem:[%s2905_s11 + $0x14c] sm:$0xf0]  ;;  %v2243_v11 = vld [vmem:[%s2905_s11 + $0x70] sm:$0xf0]  ;;  %2598 = vset.pattern.permute.xlu0 %v2611_v15 }
  0x5c   : > { %1115 = vmatpush.bf16.msra.mxu2 %v1910_v41  ;;  %1142 = vmatpush.bf16.msra.mxu1 %v2150_v50  ;;  %v2555_v41 = vld [vmem:[%s2668_s29 + $0x26c] sm:$0xf]  ;;  %v1927_v50 = vld [vmem:[%s2668_s29 + $0x158] sm:$0xf0]  ;;  %v1802_v58 = vor.u32 %v2487_v45, %v1799_v48  ;;  %v2273_v45 = vld [vmem:[%s2905_s11 + $0xa0] sm:$0xf] }
  0x5d   : > { %1103 = vmatpush.bf16.msra.mxu3 %v1766_v49  ;;  %v2519_v49 = vld [vmem:[%s2668_s29 + $0x14c] sm:$0xf]  ;;  %v2074_v53 = vor.u32 %v2555_v41, %v2071_v42  ;;  %v2470_v41 = vld [vmem:[%s2905_s11 + $0x184] sm:$0xf]  ;;  %v2387_v42 = vld [vmem:[%s2905_s11 + $0x190] sm:$0xf0] }
  0x5e   : > { %v2369_v48 = vld [vmem:[%s2905_s11 + $0x160] sm:$0xf]  ;;  %v2339_v14 = vld [vmem:[%s2905_s11 + $0x130] sm:$0xf0]  ;;  %v2430_v23 = vld [vmem:[%s2905_s11 + $0x44] sm:$0xf] }
  0x5f   : > { %1125 = vmatpush.bf16.msra.mxu0 %v2086_v0  ;;  %v1783_v0 = vld [vmem:[%s2668_s29 + $0x38] sm:$0xf0]  ;;  %v1592_v28 = vld [vmem:[%s3075_s4] sm:$0xf]  ;;  %v2454_v29 = vld [vmem:[%s2905_s11 + $0x104] sm:$0xf] }
  0x60   : > { %1161 = vmatpush.bf16.msrb.mxu1 %v2010_v57  ;;  %1116 = vmatpush.bf16.msra.mxu2 %v1894_v60  ;;  %v2055_v57 = vld [vmem:[%s2668_s29 + $0x258] sm:$0xf0]  ;;  %v1930_v60 = vor.u32 %v2519_v49, %v1927_v50  ;;  %v1786_v9 = vor.u32 %v2483_v61, %v1783_v0  ;;  %v2468_v49 = vld [vmem:[%s2905_s11 + $0x16c] sm:$0xf0]  ;;  %v2442_v50 = vld [vmem:[%s2905_s11 + $0xa4] sm:$0xf] }
  0x61   : > { %1148 = vmatpush.bf16.msrb.mxu3 %v1882_v56  ;;  %v2551_v56 = vld [vmem:[%s2668_s29 + $0x24c] sm:$0xf]  ;;  %v2259_v0 = vld [vmem:[%s2905_s11 + $0x90] sm:$0xf0]  ;;  %1595 = vperm.xlu0 %2598, %v1592_v28  }
  0x62   : > { %1104 = vmatmul.bf16.vlgmr.msra.gmra.mxu3 %v2755_v54  ;;  %v2058_v3 = vor.u32 %v2551_v56, %v2055_v57  ;;  %v2371_v56 = vld [vmem:[%s2905_s11 + $0x170] sm:$0xf0]  ;;  %v2274_v57 = vor.u32 %v2444_v47, %v2273_v45  ;;  %v2393_v47 = vld [vmem:[%s2905_s11 + $0x188] sm:$0xf] }
  0x63   : > { %1117 = vmatmul.bf16.vlgmr.msra.gmra.mxu2 %v2762_v59  ;;  %1126 = vmatpush.bf16.msra.mxu0 %v2070_v12  ;;  %v2575_v12 = vld [vmem:[%s2668_s29 + $0x30c] sm:$0xf] }
  0x64   : > { %1174 = vmatpush.bf16.msrb.mxu2 %v2138_v1  ;;  %1162 = vmatpush.bf16.msrb.mxu1 %v1994_v7  ;;  %v2515_v1 = vld [vmem:[%s2668_s29 + $0x12c] sm:$0xf] }
  0x65   : > { %1149 = vmatpush.bf16.msrb.mxu3 %v1866_v6  ;;  %2189 = vmatmul.msk.bf16.vlgmr.msra.gmra.mxu1 %vm989_vm0, %v2729_v22  ;;  %v1767_v6 = vld [vmem:[%s2668_s29 + $0x18] sm:$0xf0]  ;;  %v2547_v7 = vld [vmem:[%s2668_s29 + $0x22c] sm:$0xf]  ;;  %v1914_v10 = vor.u32 %v2515_v1, %v1911_v2  ;;  %v2462_v2 = vld [vmem:[%s2905_s11 + $0x144] sm:$0xf] }
  0x66   : > { %v2042_v17 = vor.u32 %v2547_v7, %v2039_v8  ;;  %v2436_v7 = vld [vmem:[%s2905_s11 + $0x6c] sm:$0xf0]  ;;  %v2337_v8 = vld [vmem:[%s2905_s11 + $0x120] sm:$0xf] }
  0x67   : > { %1127 = vmatpush.bf16.msra.mxu0 %v2054_v25  ;;  %v2023_v25 = vld [vmem:[%s2668_s29 + $0x218] sm:$0xf0] }
  0x68   : > { %1175 = vmatpush.bf16.msrb.mxu2 %v2122_v13  ;;  %1163 = vmatpush.bf16.msrb.mxu1 %v1978_v19  ;;  %v2151_v13 = vld [vmem:[%s2668_s29 + $0x318] sm:$0xf0]  ;;  %v2476_v19 = vld [vmem:[%s2905_s11 + $0x1ac] sm:$0xf0]  ;;  %v2026_v34 = vor.u32 %v2543_v24, %v2023_v25  ;;  %v2227_v24 = vld [vmem:[%s2905_s11 + $0x50] sm:$0xf0] }
  0x69   : > { %1150 = vmatpush.bf16.msrb.mxu3 %v1850_v18  ;;  %v2401_v18 = vld [vmem:[%s2905_s11 + $0x1a0] sm:$0xf]  ;;  %v2154_v21 = vor.u32 %v2575_v12, %v2151_v13  ;;  %v2458_v13 = vld [vmem:[%s2905_s11 + $0x124] sm:$0xf] }
  0x6a   : > { %v2342_v25 = vor.u32 %v2458_v13, %v2339_v14  ;;  %v2361_v13 = vld [vmem:[%s2905_s11 + $0x148] sm:$0xf]  ;;  %v2465_v14 = vld [vmem:[%s2905_s11 + $0x154] sm:$0xf0] }
  0x6b   : > { %1128 = vmatpush.bf16.msra.mxu0 %v2038_v37  ;;  %v2472_v37 = vld [vmem:[%s2905_s11 + $0x18c] sm:$0xf0] }
  0x6c   : > { %1176 = vmatpush.bf16.msrb.mxu2 %v2106_v26  ;;  %1164 = vmatpush.bf16.msrb.mxu1 %v1962_v32  ;;  %v1770_v26 = vor.u32 %v2479_v5, %v1767_v6  ;;  %v2289_v32 = vld [vmem:[%s2905_s11 + $0xc0] sm:$0xf] }
  0x6d   : > { %1151 = vmatpush.bf16.msrb.mxu3 %v1834_v31  ;;  %v2402_v31 = vor.u32 %v2476_v19, %v2401_v18  ;;  %v2241_v5 = vld [vmem:[%s2905_s11 + $0x60] sm:$0xf]  ;;  %v2432_v18 = vld [vmem:[%s2905_s11 + $0x4c] sm:$0xf0] }
  0x6e   : > { %v2242_v16 = vor.u32 %v2436_v7, %v2241_v5  ;;  %v2321_v19 = vld [vmem:[%s2905_s11 + $0x100] sm:$0xf]  ;;  %v2265_v5 = vld [vmem:[%s2905_s11 + $0x88] sm:$0xf]  ;;  %v2447_v7 = vld [vmem:[%s2905_s11 + $0xcc] sm:$0xf] }
  0x6f   : > { %1129 = vmatpush.bf16.msra.mxu0 %v2022_v52  ;;  %v2275_v52 = vld [vmem:[%s2905_s11 + $0xb0] sm:$0xf0] }
  0x70   : > { %1177 = vmatpush.bf16.msrb.mxu2 %v2090_v38  ;;  %1165 = vmatpush.bf16.msrb.mxu1 %v1946_v44  ;;  %v2446_v38 = vld [vmem:[%s2905_s11 + $0xc4] sm:$0xf]  ;;  %v2386_v44 = vor.u32 %v2472_v37, %v2385_v36  ;;  %v2278_v61 = vor.u32 %v2442_v50, %v2275_v52  ;;  %v2209_v37 = vld [vmem:[%s2905_s11 + $0x20] sm:$0xf] }
  0x71   : > { %1152 = vmatpush.bf16.msrb.mxu3 %v1818_v43  ;;  %v2290_v43 = vor.u32 %v2448_v35, %v2289_v32  ;;  %v2294_v46 = vor.u32 %v2446_v38, %v2291_v39  ;;  %v2230_v35 = vor.u32 %v2430_v23, %v2227_v24  ;;  %v2428_v38 = vld [vmem:[%s2905_s11 + $0x2c] sm:$0xf0]  ;;  %v2426_v39 = vld [vmem:[%s2905_s11 + $0x24] sm:$0xf]  ;;  %v2467_v23 = vld [vmem:[%s2905_s11 + $0x16c] sm:$0xf] }
  0x72   : > { %1130 = vmatmul.bf16.vlgmr.msra.gmra.mxu0 %v2752_v51  ;;  %v2210_v45 = vor.u32 %v2428_v38, %v2209_v37  ;;  %v2987_v52 = vld.sshfl [vmem:[#allocation1 + $0x8] sm:$0xff pattern:$0x73625140]  ;;  %v2379_v24 = vld [vmem:[%s2905_s11 + $0x178] sm:$0xf0] }
  0x73   : > { %1192 = vmatpush.bf16.msrb.mxu0 %v2186_v55  ;;  %v2466_v55 = vld [vmem:[%s2905_s11 + $0x164] sm:$0xf]  ;;  %v2329_v37 = vld [vmem:[%s2905_s11 + $0x108] sm:$0xf]  ;;  %v2457_v38 = vld [vmem:[%s2905_s11 + $0x114] sm:$0xf0] }
  0x74   : > { %1178 = vmatpush.bf16.msrb.mxu2 %v2074_v53  ;;  %1166 = vmatpush.bf16.msrb.mxu1 %v1930_v60  ;;  %v2390_v53 = vor.u32 %v2470_v41, %v2387_v42  ;;  %v2257_v60 = vld [vmem:[%s2905_s11 + $0x80] sm:$0xf]  ;;  %v2374_v1 = vor.u32 %v2466_v55, %v2371_v56  ;;  %v2297_v42 = vld [vmem:[%s2905_s11 + $0xc8] sm:$0xf]  ;;  %v2422_v55 = vld [vmem:[%s2905_s11 + $0x4] sm:$0xf] }
  0x75   : > { %1153 = vmatpush.bf16.msrb.mxu3 %v1802_v58  ;;  %v2370_v58 = vor.u32 %v2468_v49, %v2369_v48  ;;  %v2473_v48 = vld [vmem:[%s2905_s11 + $0x194] sm:$0xf0]  ;;  %v2195_v56 = vld [vmem:[%s2905_s11 + $0x10] sm:$0xf0] }
  0x77   : > { %1193 = vmatpush.bf16.msrb.mxu0 %v2170_v4  ;;  %v2258_v4 = vor.u32 %v2440_v62, %v2257_v60  ;;  %v2451_v60 = vld [vmem:[%s2905_s11 + $0xec] sm:$0xf]  ;;  %v2315_v62 = vld [vmem:[%s2905_s11 + $0xf8] sm:$0xf0] }
  0x78   : > { %1179 = vmatpush.bf16.msrb.mxu2 %v2058_v3  ;;  %1167 = vmatpush.bf16.msrb.mxu1 %v1914_v10  ;;  %v2355_v3 = vld [vmem:[%s2905_s11 + $0x150] sm:$0xf0]  ;;  %v2434_v10 = vld [vmem:[%s2905_s11 + $0x64] sm:$0xf] }
  0x79   : > { %1154 = vmatpush.bf16.msrb.mxu3 %v1786_v9  ;;  %v2460_v9 = vld [vmem:[%s2905_s11 + $0x12c] sm:$0xf0]  ;;  %v2358_v12 = vor.u32 %v2462_v2, %v2355_v3  ;;  %v2246_v20 = vor.u32 %v2434_v10, %v2243_v11  ;;  %v2198_v2 = vor.u32 %v2422_v55, %v2195_v56  ;;  %v2299_v10 = vld [vmem:[%s2905_s11 + $0xd8] sm:$0xf0]  ;;  %v2471_v11 = vld [vmem:[%s2905_s11 + $0x18c] sm:$0xf] }
  0x7a   : > { %v2425_v55 = vld [vmem:[%s2905_s11 + $0x14] sm:$0xf0]  ;;  %v2431_v56 = vld [vmem:[%s2905_s11 + $0x4c] sm:$0xf] }
  0x7b   : > { %1194 = vmatpush.bf16.msrb.mxu0 %v2154_v21  ;;  %v2456_v21 = vld [vmem:[%s2905_s11 + $0x10c] sm:$0xf0] }
  0x7c   : > { %1180 = vmatpush.bf16.msrb.mxu2 %v2042_v17  ;;  %1168 = vmatpush.bf16.msrb.mxu1 %v1898_v27  ;;  %v2338_v17 = vor.u32 %v2460_v9, %v2337_v8  ;;  %v2453_v27 = vld [vmem:[%s2905_s11 + $0xf4] sm:$0xf0]  ;;  %v2322_v32 = vor.u32 %v2456_v21, %v2321_v19  ;;  %v2283_v21 = vld [vmem:[%s2905_s11 + $0xb8] sm:$0xf0] }
  0x7d   : > { %1155 = vmatpush.bf16.msrb.mxu3 %v1770_v26  ;;  %v2313_v26 = vld [vmem:[%s2905_s11 + $0xe8] sm:$0xf] }
  0x7e   : > { %v2314_v36 = vor.u32 %v2453_v27, %v2313_v26  ;;  %v2461_v26 = vld [vmem:[%s2905_s11 + $0x134] sm:$0xf0] }
  0x7f   : > { %1503 = vmatpush.bf16.msra.mxu0 %v2402_v31  ;;  %1169 = vmatmul.bf16.vlgmr.msrb.gmra.mxu1 %v2762_v59  ;;  %v2438_v59 = vld [vmem:[%s2905_s11 + $0x84] sm:$0xf] }
  0x80   : > { %1514 = vmatpush.bf16.msra.mxu1 %v2310_v33  ;;  %1181 = vmatpush.bf16.msrb.mxu2 %v2026_v34  ;;  %v2262_v6 = vor.u32 %v2438_v59, %v2259_v0  ;;  %v2409_v33 = vld [vmem:[%s2905_s11 + $0x1a8] sm:$0xf]  ;;  %v2477_v34 = vld [vmem:[%s2905_s11 + $0x1b4] sm:$0xf0] }
  0x81   : > { %1488 = vmatpush.bf16.msra.mxu3 %v2306_v30  ;;  %v2323_v30 = vld [vmem:[%s2905_s11 + $0x110] sm:$0xf0]  ;;  %v2377_v0 = vld [vmem:[%s2905_s11 + $0x168] sm:$0xf] }
  0x82   : > { %1156 = vmatmul.bf16.vlgmr.msrb.gmra.mxu3 %v2755_v54  ;;  %v2353_v54 = vld [vmem:[%s2905_s11 + $0x140] sm:$0xf]  ;;  %2190 = vmatmul.msk.bf16.vlgmr.msrb.gmra.mxu0 %vm989_vm0, %v2729_v22  ;;  %v2326_v41 = vor.u32 %v2454_v29, %v2323_v30  ;;  %v2233_v29 = vld [vmem:[%s2905_s11 + $0x48] sm:$0xf]  ;;  %v2433_v30 = vld [vmem:[%s2905_s11 + $0x54] sm:$0xf0] }
  0x83   : > { %1504 = vmatpush.bf16.msra.mxu0 %v2386_v44  ;;  %1182 = vmatmul.bf16.vlgmr.msrb.gmra.mxu2 %v2752_v51  ;;  %v2354_v51 = vor.u32 %v2464_v63, %v2353_v54  ;;  %v2225_v22 = vld [vmem:[%s2905_s11 + $0x40] sm:$0xf]  ;;  %v2410_v44 = vor.u32 %v2477_v34, %v2409_v33  ;;  %v2475_v54 = vld [vmem:[%s2905_s11 + $0x1ac] sm:$0xf]  ;;  %v2411_v63 = vld [vmem:[%s2905_s11 + $0x1b8] sm:$0xf0] }
  0x84   : > { %1529 = vmatpush.bf16.msra.mxu2 %v2406_v40  ;;  %1515 = vmatpush.bf16.msra.mxu1 %v2294_v46  ;;  %v2226_v31 = vor.u32 %v2432_v18, %v2225_v22  ;;  %v2211_v40 = vld [vmem:[%s2905_s11 + $0x30] sm:$0xf0]  ;;  %v2193_v46 = vld [vmem:[%s2905_s11] sm:$0xf]  ;;  %v2414_v8 = vor.u32 %v2475_v54, %v2411_v63  ;;  %v2437_v22 = vld [vmem:[%s2905_s11 + $0x74] sm:$0xf0] }
  0x85   : > { %1489 = vmatpush.bf16.msra.mxu3 %v2290_v43  ;;  %v2449_v43 = vld [vmem:[%s2905_s11 + $0xd4] sm:$0xf0]  ;;  %v2214_v49 = vor.u32 %v2426_v39, %v2211_v40  ;;  %v2443_v18 = vld [vmem:[%s2905_s11 + $0xac] sm:$0xf]  ;;  %v2267_v34 = vld [vmem:[%s2905_s11 + $0x98] sm:$0xf0]  ;;  %v2234_v39 = vor.u32 %v2433_v30, %v2233_v29 }
  0x86   : > { %v2298_v50 = vor.u32 %v2449_v43, %v2297_v42  ;;  %v2286_v28 = vor.u32 %v2443_v18, %v2283_v21  ;;  %v2429_v42 = vld [vmem:[%s2905_s11 + $0x34] sm:$0xf0]  ;;  %v2427_v63 = vld [vmem:[%s2905_s11 + $0x2c] sm:$0xf] }
  0x87   : > { %1505 = vmatpush.bf16.msra.mxu0 %v2370_v58  ;;  %v2445_v58 = vld [vmem:[%s2905_s11 + $0xb4] sm:$0xf0] }
  0x88   : > { %1530 = vmatpush.bf16.msra.mxu2 %v2390_v53  ;;  %1516 = vmatpush.bf16.msra.mxu1 %v2278_v61  ;;  %v2424_v53 = vld [vmem:[%s2905_s11 + $0xc] sm:$0xf0]  ;;  %v2394_v61 = vor.u32 %v2473_v48, %v2393_v47  ;;  %v2459_v47 = vld [vmem:[%s2905_s11 + $0x12c] sm:$0xf]  ;;  %v2347_v48 = vld [vmem:[%s2905_s11 + $0x138] sm:$0xf0] }
  0x89   : > { %1490 = vmatpush.bf16.msra.mxu3 %v2274_v57  ;;  %v2281_v57 = vld [vmem:[%s2905_s11 + $0xa8] sm:$0xf]  ;;  %v2194_v59 = vor.u32 %v2424_v53, %v2193_v46  ;;  %v2251_v46 = vld [vmem:[%s2905_s11 + $0x78] sm:$0xf0] }
  0x8a   : > { %v2282_v3 = vor.u32 %v2445_v58, %v2281_v57  ;;  %v2201_v53 = vld [vmem:[%s2905_s11 + $0x8] sm:$0xf]  ;;  %v2235_v57 = vld [vmem:[%s2905_s11 + $0x58] sm:$0xf0]  ;;  %v2350_v58 = vor.u32 %v2459_v47, %v2347_v48 }
  0x8b   : > { %1506 = vmatpush.bf16.msra.mxu0 %v2354_v51  ;;  %v3002_v51 = vld.sshfl [vmem:[#allocation1] sm:$0xff pattern:$0x73625140]  ;;  %v2238_v54 = vor.u32 %v2431_v56, %v2235_v57 }
  0x8c   : > { %1531 = vmatpush.bf16.msra.mxu2 %v2374_v1  ;;  %1517 = vmatpush.bf16.msra.mxu1 %v2262_v6  ;;  %v2469_v1 = vld [vmem:[%s2905_s11 + $0x174] sm:$0xf0] }
  0x8d   : > { %1491 = vmatpush.bf16.msra.mxu3 %v2258_v4  ;;  %v2318_v4 = vor.u32 %v2451_v60, %v2315_v62  ;;  %v2441_v6 = vld [vmem:[%s2905_s11 + $0x94] sm:$0xf0]  ;;  %v2378_v9 = vor.u32 %v2469_v1, %v2377_v0  ;;  %v2455_v60 = vld [vmem:[%s2905_s11 + $0x10c] sm:$0xf]  ;;  %v2202_v62 = vor.u32 %v2425_v55, %v2201_v53 }
  0x8e   : > { %v2266_v15 = vor.u32 %v2441_v6, %v2265_v5 }
  0x8f   : > { %1507 = vmatpush.bf16.msra.mxu0 %v2338_v17  ;;  %v2249_v17 = vld [vmem:[%s2905_s11 + $0x68] sm:$0xf] }
  0x90   : > { %1532 = vmatpush.bf16.msra.mxu2 %v2358_v12  ;;  %1518 = vmatpush.bf16.msra.mxu1 %v2246_v20  ;;  %v2395_v12 = vld [vmem:[%s2905_s11 + $0x198] sm:$0xf0]  ;;  %v2362_v20 = vor.u32 %v2465_v14, %v2361_v13  ;;  %v2250_v27 = vor.u32 %v2437_v22, %v2249_v17 }
  0x91   : > { %1492 = vmatpush.bf16.msra.mxu3 %v2242_v16  ;;  %v2302_v16 = vor.u32 %v2447_v7, %v2299_v10  ;;  %v2398_v19 = vor.u32 %v2471_v11, %v2395_v12 }
  0x93   : > { %1508 = vmatpush.bf16.msra.mxu0 %v2322_v32  ;;  %v2382_v32 = vor.u32 %v2467_v23, %v2379_v24 }
  0x94   : > { %1533 = vmatpush.bf16.msra.mxu2 %v2342_v25  ;;  %1519 = vmatpush.bf16.msra.mxu1 %v2230_v35  ;;  %v2345_v25 = vld [vmem:[%s2905_s11 + $0x128] sm:$0xf]  ;;  %v2463_v35 = vld [vmem:[%s2905_s11 + $0x14c] sm:$0xf] }
  0x95   : > { %1493 = vmatpush.bf16.msra.mxu3 %v2226_v31  ;;  %v2439_v31 = vld [vmem:[%s2905_s11 + $0x8c] sm:$0xf]  ;;  %v2346_v33 = vor.u32 %v2461_v26, %v2345_v25 }
  0x96   : > { %2415 = vmatmul.msk.bf16.vlgmr.msra.gmra.mxu0 %vm1485_vm1, %v2987_v52  ;;  %v2270_v40 = vor.u32 %v2439_v31, %v2267_v34 }
  0x97   : > { %1540 = vmatpush.bf16.msrb.mxu0 %v2314_v36  ;;  %v2363_v36 = vld [vmem:[%s2905_s11 + $0x158] sm:$0xf0] }
  0x98   : > { %1534 = vmatpush.bf16.msra.mxu2 %v2326_v41  ;;  %1520 = vmatpush.bf16.msra.mxu1 %v2214_v49  ;;  %v2217_v41 = vld [vmem:[%s2905_s11 + $0x28] sm:$0xf]  ;;  %v2366_v43 = vor.u32 %v2463_v35, %v2363_v36 }
  0x99   : > { %1494 = vmatpush.bf16.msra.mxu3 %v2210_v45  ;;  %v2435_v45 = vld [vmem:[%s2905_s11 + $0x6c] sm:$0xf]  ;;  %v2218_v49 = vor.u32 %v2429_v42, %v2217_v41 }
  0x9b   : > { %1541 = vmatpush.bf16.msrb.mxu0 %v2298_v50  ;;  %2416 = vmatmul.msk.bf16.vlgmr.msra.gmra.mxu2 %vm1485_vm1, %v2987_v52  ;;  %v2254_v50 = vor.u32 %v2435_v45, %v2251_v46 }
  0x9c   : > { %1555 = vmatpush.bf16.msrb.mxu2 %v2410_v44  ;;  %1521 = vmatpush.bf16.msra.mxu1 %v2198_v2  ;;  %v2330_v44 = vor.u32 %v2457_v38, %v2329_v37  ;;  %v2423_v2 = vld [vmem:[%s2905_s11 + $0xc] sm:$0xf] }
  0x9d   : > { %1495 = vmatpush.bf16.msra.mxu3 %v2194_v59  ;;  %v2219_v59 = vld [vmem:[%s2905_s11 + $0x38] sm:$0xf0] }
  0x9e   : > { %v2222_v1 = vor.u32 %v2427_v63, %v2219_v59 }
  0x9f   : > { %1542 = vmatpush.bf16.msrb.mxu0 %v2282_v3  ;;  %1522 = vmatmul.bf16.vlgmr.msra.gmra.mxu1 %v3002_v51  ;;  %v2203_v3 = vld [vmem:[%s2905_s11 + $0x18] sm:$0xf0] }
  0xa0   : > { %1556 = vmatpush.bf16.msrb.mxu2 %v2394_v61  ;;  %1581 = vmatpush.bf16.msrb.mxu1 %v2414_v8  ;;  %v2331_v61 = vld [vmem:[%s2905_s11 + $0x118] sm:$0xf0] }
  0xa1   : > { %1566 = vmatpush.bf16.msrb.mxu3 %v2318_v4  ;;  %v2334_v0 = vor.u32 %v2455_v60, %v2331_v61  ;;  %v2206_v4 = vor.u32 %v2423_v2, %v2203_v3 }
  0xa2   : > { %1496 = vmatmul.bf16.vlgmr.msra.gmra.mxu3 %v3002_v51 }
  0xa3   : > { %1543 = vmatpush.bf16.msrb.mxu0 %v2266_v15 }
  0xa4   : > { %1557 = vmatpush.bf16.msrb.mxu2 %v2378_v9  ;;  %1582 = vmatpush.bf16.msrb.mxu1 %v2398_v19 }
  0xa5   : > { %1567 = vmatpush.bf16.msrb.mxu3 %v2302_v16 }
  0xa7   : > { %1544 = vmatpush.bf16.msrb.mxu0 %v2250_v27 }
  0xa8   : > { %1558 = vmatpush.bf16.msrb.mxu2 %v2362_v20  ;;  %1583 = vmatpush.bf16.msrb.mxu1 %v2382_v32 }
  0xa9   : > { %1568 = vmatpush.bf16.msrb.mxu3 %v2286_v28 }
  0xab   : > { %1545 = vmatpush.bf16.msrb.mxu0 %v2234_v39 }
  0xac   : > { %1559 = vmatpush.bf16.msrb.mxu2 %v2346_v33  ;;  %1584 = vmatpush.bf16.msrb.mxu1 %v2366_v43 }
  0xad   : > { %1569 = vmatpush.bf16.msrb.mxu3 %v2270_v40  ;;  %v1040_v5 = vpop.f32.mrf.mxu3 }
  0xaf   : > { %1546 = vmatpush.bf16.msrb.mxu0 %v2218_v49  ;;  %v1001_v6 = vpop.f32.mrf.mxu0 }
  0xb0   : > { %1560 = vmatpush.bf16.msrb.mxu2 %v2330_v44  ;;  %1585 = vmatpush.bf16.msrb.mxu1 %v2350_v58  ;;  %v1014_v7 = vpop.f32.mrf.mxu1 }
  0xb1   : > { %1570 = vmatpush.bf16.msrb.mxu3 %v2254_v50  ;;  %v1015_v8 = vadd.f32 %v1014_v7, %v1001_v6 }
  0xb3   : > { %2417 = vmatmul.msk.bf16.vlgmr.msrb.gmra.mxu2 %vm1485_vm1, %v2987_v52  ;;  %1547 = vmatpush.bf16.msrb.mxu0 %v2202_v62 }
  0xb4   : > { %1586 = vmatpush.bf16.msrb.mxu1 %v2334_v0 }
  0xb5   : > { %1571 = vmatpush.bf16.msrb.mxu3 %v2238_v54  ;;  %v1042_v9 = vpop.f32.mrf.mxu3 }
  0xb6   : > { %1548 = vmatmul.bf16.vlgmr.msrb.gmra.mxu0 %v3002_v51 }
  0xb7   : > { %2418 = vmatmul.msk.bf16.vlgmr.msrb.gmra.mxu1 %vm1485_vm1, %v2987_v52  ;;  %v1003_v10 = vpop.f32.mrf.mxu0 }
  0xb8   : > { %v1016_v11 = vpop.f32.mrf.mxu1 }
  0xb9   : > { %1572 = vmatpush.bf16.msrb.mxu3 %v2222_v1 }
  0xba   : > { %v1027_v12 = vpop.f32.mrf.mxu2 }
  0xbb   : > { %v1028_v13 = vadd.f32 %v1027_v12, %v1015_v8 }
  0xbd   : > { %1573 = vmatpush.bf16.msrb.mxu3 %v2206_v4  ;;  %v1041_v14 = vadd.f32 %v1040_v5, %v1028_v13 }
  0xc0   : > { %1574 = vmatmul.bf16.vlgmr.msrb.gmra.mxu3 %v3002_v51 }
  0xc2   : > { %v1029_v16 = vpop.f32.mrf.mxu2 }
  0xc5   : > { %v1053_v15 = vpop.f32.mrf.mxu3 }
  0xca   : > { %v1092_v22 = vpop.f32.mrf.mxu2 }
  0xcd   : > { %v1055_v17 = vpop.f32.mrf.mxu3 }
  0xcf   : > { %v1066_v18 = vpop.f32.mrf.mxu0 }
  0xd0   : > { %v1067_v19 = vadd.f32 %v1066_v18, %v1053_v15  ;;  %v1079_v52 = vpop.f32.mrf.mxu1 }
  0xd2   : > { %v1080_v20 = vadd.f32 %v1079_v52, %v1067_v19  ;;  %v1094_v23 = vpop.f32.mrf.mxu2  ;;  %v2612_v52 = vmov 512.0  }
  0xd3   : > { %v1596_v4 = vpop.permute.xlu0 %1595  ;;  %2599 = vrcp.f32 %v2612_v52 }
  0xd4   : > { %v1093_v21 = vadd.f32 %v1092_v22, %v1080_v20 }
  0xd7   : > { %v1068_v24 = vpop.f32.mrf.mxu0 }
  0xd8   : > { %v1081_v25 = vpop.f32.mrf.mxu1 }
  0xd9   : > { %v2600_v20 = vpop.eup %2599 }
  0xda   : > { %vm1617_vm3 = vweird.f32 %v2600_v20 }
  0xe2   : > { %v1144_v26 = vpop.f32.mrf.mxu1 }
  0xe5   : > { %v1105_v51 = vpop.f32.mrf.mxu3 }
  0xe6   : > { %v1118_v27 = vpop.f32.mrf.mxu2 }
  0xe7   : > { %v1119_v28 = vadd.f32 %v1118_v27, %v1105_v51 }
  0xea   : > { %v1146_v30 = vpop.f32.mrf.mxu1 }
  0xed   : > { %v1107_v29 = vpop.f32.mrf.mxu3 }
  0xee   : > { %v1120_v31 = vpop.f32.mrf.mxu2 }
  0xef   : > { %v1131_v32 = vpop.f32.mrf.mxu0 }
  0xf0   : > { %v1132_v33 = vadd.f32 %v1131_v32, %v1119_v28 }
  0xf2   : > { %v1145_v34 = vadd.f32 %v1144_v26, %v1132_v33 }
  0xf7   : > { %v1133_v35 = vpop.f32.mrf.mxu0 }
  0xfc   : > { %v1170_v36 = vpop.f32.mrf.mxu1 }
  0xff   : > { %v1196_v38 = vpop.f32.mrf.mxu0 }
 0x104   : > { %v1172_v40 = vpop.f32.mrf.mxu1 }
 0x105   : > { %v1157_v37 = vpop.f32.mrf.mxu3 }
 0x106   : > { %v1183_v39 = vpop.f32.mrf.mxu2  ;;  %v1171_v60 = vadd.f32 %v1170_v36, %v1157_v37 }
 0x107   : > { %v1198_v42 = vpop.f32.mrf.mxu0 }
 0x108   : > { %v1184_v0 = vadd.f32 %v1183_v39, %v1171_v60 }
 0x10a   : > { %v1197_v8 = vadd.f32 %v1196_v38, %v1184_v0 }
 0x10d   : > { %v1159_v41 = vpop.f32.mrf.mxu3 }
 0x10e   : > { %v1185_v43 = vpop.f32.mrf.mxu2 }
 0x113   : > { %v1510_v44 = vpop.f32.mrf.mxu0 }
 0x11b   : > { %v1512_v47 = vpop.f32.mrf.mxu0 }
 0x11c   : > { %v1523_v45 = vpop.f32.mrf.mxu1 }
 0x11d   : > { %v1524_v61 = vadd.f32 %v1523_v45, %v1093_v21  ;;  %v1613_v21 = vmul.f32 512.0, %v2600_v20 }
 0x11e   : > { %v1536_v46 = vpop.f32.mrf.mxu2 }
 0x11f   : > { %v1537_v1 = vadd.f32 %v1536_v46, %v1524_v61  ;;  %v1614_v23 = vsub.f32 1.0, %v1613_v21 }
 0x121   : > { %v1599_v6 = vadd.f32 %v1596_v4, %v1537_v1  ;;  %v1615_v24 = vmul.f32 %v2600_v20, %v1614_v23 }
 0x123   : > { %v1604_v13 = vsel %vm1602_vm2, %v1599_v6, 0.0  ;;  %v1616_v25 = vadd.f32 %v2600_v20, %v1615_v24 }
 0x124   : > { %v1525_v50 = vpop.f32.mrf.mxu1 }
 0x125   : > { %v1497_v48 = vpop.f32.mrf.mxu3  ;;  %v1618_v51 = vsel %vm1617_vm3, %v2600_v20, %v1616_v25 }
 0x126   : > { %v1538_v49 = vpop.f32.mrf.mxu2  ;;  %v1498_v58 = vadd.f32 %v1497_v48, %v1041_v14 }
 0x128   : > { %v1511_v54 = vadd.f32 %v1510_v44, %v1498_v58 }
 0x12a   : > { %v1598_v5 = vadd.f32 %v1596_v4, %v1511_v54 }
 0x12c   : > { %v1603_v11 = vsel %vm1602_vm2, %v1598_v5, 0.0 }
 0x12d   : > { %v1499_v53 = vpop.f32.mrf.mxu3  ;;  %v1605_v15 = vadd.f32 %v1604_v13, %v1603_v11 }
 0x133   : > { %v1549_v55 = vpop.f32.mrf.mxu0 }
 0x134   : > { %v1588_v57 = vpop.f32.mrf.mxu1  ;;  %v1550_v62 = vadd.f32 %v1549_v55, %v1145_v34  ;;  %v1658_v55 = vstv %s1653_s14 }
 0x136   : > { %v1562_v56 = vpop.f32.mrf.mxu2 }
 0x137   : > { %v1563_v2 = vadd.f32 %v1562_v56, %v1550_v62 }
 0x139   : > { %v1600_v7 = vadd.f32 %v1596_v4, %v1563_v2 }
 0x13b   : > { %v1551_v63 = vpop.f32.mrf.mxu0  ;;  %v1606_v14 = vsel %vm1602_vm2, %v1600_v7, 0.0 }
 0x13c   : > { %v1590_v3 = vpop.f32.mrf.mxu1  ;;  %v1607_v17 = vadd.f32 %v1606_v14, %v1605_v15 }
 0x13e   : > { %v1564_v59 = vpop.f32.mrf.mxu2 }
 0x143   : > { %v1575_v9 = vpop.f32.mrf.mxu3 }
 0x144   : > { %v1576_v10 = vadd.f32 %v1575_v9, %v1197_v8 }
 0x146   : > { %v1589_v12 = vadd.f32 %v1588_v57, %v1576_v10 }
 0x148   : > { %v1601_v16 = vadd.f32 %v1596_v4, %v1589_v12 }
 0x14a   : > { %v1608_v22 = vsel %vm1602_vm2, %v1601_v16, 0.0 }
 0x14b   : > { %v1577_v18 = vpop.f32.mrf.mxu3  ;;  %v1609_v19 = vadd.f32 %v1608_v22, %v1607_v17 }
 0x14d   : > { %1610 = vadd.xlane.f32.xlu0 %v1609_v19 }
 0x1c0   : > { %v1611_v26 = vpop.xlane.xlu0 %1610 }
 0x1c1   : > { %v1619_v27 = vmul.f32 %v1618_v51, %v1611_v26 }
 0x1c3   : > { %v1620_v28 = vsub.f32 %v1598_v5, %v1619_v27  ;;  %v1621_v29 = vsub.f32 %v1599_v6, %v1619_v27  ;;  %v1622_v30 = vsub.f32 %v1600_v7, %v1619_v27  ;;  %v1623_v31 = vsub.f32 %v1601_v16, %v1619_v27 }
 0x1c5   : > { %v1624_v32 = vmul.f32 %v1620_v28, %v1620_v28  ;;  %v1625_v33 = vmul.f32 %v1621_v29, %v1621_v29  ;;  %v1626_v34 = vmul.f32 %v1622_v30, %v1622_v30  ;;  %v1627_v35 = vmul.f32 %v1623_v31, %v1623_v31 }
 0x1c7   : > { %v1628_v36 = vsel %vm1602_vm2, %v1624_v32, 0.0  ;;  %v1629_v37 = vsel %vm1602_vm2, %v1625_v33, 0.0  ;;  %v1631_v39 = vsel %vm1602_vm2, %v1626_v34, 0.0  ;;  %v1633_v41 = vsel %vm1602_vm2, %v1627_v35, 0.0 }
 0x1c8   : > { %v1630_v38 = vadd.f32 %v1629_v37, %v1628_v36 }
 0x1ca   : > { %v1632_v40 = vadd.f32 %v1631_v39, %v1630_v38 }
 0x1cc   : > { %v1634_v42 = vadd.f32 %v1633_v41, %v1632_v40 }
 0x1ce   : > { %1635 = vadd.xlane.f32.xlu1 %v1634_v42 }
 0x241   : > { %v1636_v43 = vpop.xlane.xlu1 %1635 }
 0x242   : > { %v1637_v44 = vmul.f32 %v1636_v43, %v1618_v51 }
 0x244   : > { %v1638_v45 = vadd.f32 1e-05, %v1637_v44 }
 0x246   : > { %2601 = vrsqrt.f32 %v1638_v45  ;;  %vm1645_vm5 = vweird.f32 %v1638_v45 }
 0x24c   : > { %v2602_v46 = vpop.eup %2601 }
 0x24d   : > { %v1640_v47 = vmul.f32 %v2602_v46, %v1638_v45  ;;  %vm1646_vm4 = vweird.f32 %v2602_v46 }
 0x24e   : > { %vm1647_vm6 = vmor %vm1645_vm5, %vm1646_vm4 }
 0x24f   : > { %v1641_v48 = vmul.f32 %v2602_v46, %v1640_v47 }
 0x251   : > { %v1642_v49 = vmul.f32 0.5, %v1641_v48 }
 0x253   : > { %v1643_v50 = vsub.f32 1.5, %v1642_v49 }
 0x255   : > { %v1644_v53 = vmul.f32 %v2602_v46, %v1643_v50 }
 0x257   : > { %v1648_v56 = vsel %vm1647_vm6, %v2602_v46, %v1644_v53 }
 0x258   : > { %v1649_v57 = vmul.f32 %v1648_v56, %v1620_v28  ;;  %v1650_v58 = vmul.f32 %v1648_v56, %v1621_v29  ;;  %v1651_v60 = vmul.f32 %v1648_v56, %v1622_v30  ;;  %v1652_v61 = vmul.f32 %v1648_v56, %v1623_v31 }
 0x25a   : > { %vm1655_vm7 = vcmp.ge.f32.partialorder %v1650_v58, 0.0  ;;  %vm1657_vm8 = vcmp.ge.f32.partialorder %v1652_v61, 0.0  ;;  %v1659_v62 = vmul.f32 %v1658_v55, %v1649_v57  ;;  %v1660_v54 = vmul.f32 %v1658_v55, %v1650_v58 }
 0x25b   : > { %v1661_v63 = vmul.f32 %v1658_v55, %v1651_v60  ;;  %v1662_v59 = vmul.f32 %v1658_v55, %v1652_v61  ;;  %vm1654_vm9 = vcmp.ge.f32.partialorder %v1649_v57, 0.0  ;;  %vm1656_vm10 = vcmp.ge.f32.partialorder %v1651_v60, 0.0 }
 0x25c   : > { %v1664_v0 = vsel %vm1655_vm7, %v1650_v58, %v1660_v54  ;;  %v1663_v4 = vsel %vm1654_vm9, %v1649_v57, %v1659_v62 }
 0x25d   : > { %v1666_v1 = vsel %vm1657_vm8, %v1652_v61, %v1662_v59  ;;  %v1671_v2 = vrot.slane %v1664_v0, 4  ;;  %v1665_v5 = vsel %vm1656_vm10, %v1651_v60, %v1661_v63 }
 0x25e   : > { %v1672_v3 = vrot.slane %v1666_v1, 4 }
 0x25f   : > { %v1673_v6 = vsel %vm1602_vm2, %v1663_v4, %v1671_v2 }
 0x260   : > { %v1674_v7 = vsel %vm1602_vm2, %v1665_v5, %v1672_v3  ;;  %1677 = vst [vmem:[%s272_s18] sm:$0xff] %v1673_v6 }
 0x261   : > { %1678 = vst [vmem:[%s272_s18 + $0x8] sm:$0xff] %v1674_v7 }
 0x262 PF: > { %s17_s23 = sadd.s32 1, %s2609_s23  }
 0x263   : > { %p14_p4 = scmp.ge.s32.totalorder %s17_s23, 4  }
 0x265   :  { %16 = sbr.rel (!%p14_p4) target bundleno = 2 (0x2), region = 77 }

// kernel: monai_unet_forward.9
= control target key start
LH: loop header
LB: loop body
LE: loop exit
PB: predicated region body
PF: predicated region fallthrough
CT: control target
= control target key end

     0   :  { %s6380_s21 = smov 0   ;;  %s7623_s0 = inlined_call_operand.vmem [shape: bf16[2,112,4096], index: 0, kind: input, shape index: {}]   ;;  %s7624_s1 = inlined_call_operand.vmem [shape: bf16[2,112,4096], index: 1, kind: input, shape index: {}]   ;;  %s7625_s2 = inlined_call_operand.vmem [shape: bf16[2,112], index: 2, kind: input, shape index: {}]   ;;  %s7626_s3 = inlined_call_operand.vmem [shape: bf16[2,112], index: 3, kind: input, shape index: {}]   ;;  %s7627_s4 = inlined_call_operand.vmem [shape: f32[2,1], index: 4, kind: input, shape index: {}]   ;;  %s7628_s5 = inlined_call_operand.<no memory space> [shape: f32[1], index: 5, kind: input, shape index: {}]   ;;  %s7629_s6 = inlined_call_operand.vmem [shape: f32[2,2,4096], index: 6, kind: output, shape index: {}]  }
   0x1 LB: > { %s4007_s22 = sadd.s32 4294967295, %s6342_s21   ;;  %p4011_p0 = scmp.ge.s32.totalorder %s6342_s21, 1  ;;  %s6342_s21 = sphi %s6380_s21, %s17_s21  }
   0x2   : > { %p223_p1 = scmp.lt.s32.totalorder %s6342_s21, 3 }
   0x4   : > { %p224_p2 = pnand %p4011_p0, %p223_p1 }
   0x5   : > { %p258_p3 = scmp.lt.s32.totalorder (!%p224_p2), %s4007_s22, 1 }
   0x6   : > { %227 = sbr.rel (%p224_p2) target bundleno = 609 (0x261), region = 44 }
   0xb   : > { %s7631_s22 = smov (!%p258_p3, %s4007_s22), 1  ;;  %vm1844_vm0 = vcmask 916480   ;;  %vm3897_vm1 = vcmask 1041408   ;;  %vm3899_vm2 = vcmask 1045508   ;;  %vm3901_vm3 = vcmask 1043456  }
   0xc   : > { %s6323_s5 = smul.u32 1792, %s7631_s22  ;;  %s5874_s15 = sshll.u32 %s7631_s22, 6 }
   0xd   : > { %s7440_s18 = scalar_lea.vmem %s7629_s6, %s5874_s15 }
   0xe   : > { %s6396_s25 = scalar_lea.vmem %s7624_s1, %s6323_s5  ;;  %s6925_s8 = scalar_lea.vmem %s7623_s0, %s6323_s5 }
   0xf   : > { %v4786_v0 = vld [vmem:[%s6396_s25 + $0x600] sm:$0xf]  ;;  %v6291_v2 = vld [vmem:[%s6396_s25 + $0x604] sm:$0xf]  ;;  %v4794_v5 = vld [vmem:[%s6396_s25 + $0x608] sm:$0xf] }
  0x10   : > { %v6307_v1 = vld [vmem:[%s6396_s25 + $0x67c] sm:$0xf0]  ;;  %v4788_v4 = vld [vmem:[%s6396_s25 + $0x680] sm:$0xf0]  ;;  %v6308_v6 = vld [vmem:[%s6396_s25 + $0x684] sm:$0xf0] }
  0x11   : > { %v4787_v3 = vor.u32 %v6307_v1, %v4786_v0  ;;  %v4791_v7 = vor.u32 %v6291_v2, %v4788_v4  ;;  %v4795_v8 = vor.u32 %v6308_v6, %v4794_v5  ;;  %v6292_v9 = vld [vmem:[%s6396_s25 + $0x60c] sm:$0xf]  ;;  %v4658_v11 = vld [vmem:[%s6396_s25 + $0x500] sm:$0xf]  ;;  %v6259_v14 = vld [vmem:[%s6396_s25 + $0x504] sm:$0xf] }
  0x12   : > { %v4796_v10 = vld [vmem:[%s6396_s25 + $0x688] sm:$0xf0]  ;;  %v6275_v13 = vld [vmem:[%s6396_s25 + $0x57c] sm:$0xf0]  ;;  %v4660_v15 = vld [vmem:[%s6396_s25 + $0x580] sm:$0xf0] }
  0x13   : > { %1849 = vmatpush.bf16.msra.mxu0 %v4787_v3  ;;  %v4799_v12 = vor.u32 %v6292_v9, %v4796_v10  ;;  %1862 = vmatpush.bf16.msra.mxu1 %v4791_v7  ;;  %v4659_v16 = vor.u32 %v6275_v13, %v4658_v11  ;;  %v4663_v17 = vor.u32 %v6259_v14, %v4660_v15  ;;  %v4666_v18 = vld [vmem:[%s6396_s25 + $0x508] sm:$0xf]  ;;  %v6260_v20 = vld [vmem:[%s6396_s25 + $0x50c] sm:$0xf]  ;;  %v4530_v23 = vld [vmem:[%s6396_s25 + $0x400] sm:$0xf] }
  0x14   : > { %1875 = vmatpush.bf16.msra.mxu2 %v4795_v8  ;;  %v6276_v19 = vld [vmem:[%s6396_s25 + $0x584] sm:$0xf0]  ;;  %v4668_v22 = vld [vmem:[%s6396_s25 + $0x588] sm:$0xf0]  ;;  %v6243_v24 = vld [vmem:[%s6396_s25 + $0x47c] sm:$0xf0] }
  0x15   : > { %1888 = vmatpush.bf16.msra.mxu3 %v4799_v12  ;;  %v4667_v21 = vor.u32 %v6276_v19, %v4666_v18  ;;  %v4671_v25 = vor.u32 %v6260_v20, %v4668_v22  ;;  %v6227_v26 = vld [vmem:[%s6396_s25 + $0x404] sm:$0xf]  ;;  %v4538_v28 = vld [vmem:[%s6396_s25 + $0x408] sm:$0xf]  ;;  %v4531_v29 = vor.u32 %v6243_v24, %v4530_v23  ;;  %v6228_v31 = vld [vmem:[%s6396_s25 + $0x40c] sm:$0xf] }
  0x16   : > { %v4532_v27 = vld [vmem:[%s6396_s25 + $0x480] sm:$0xf0]  ;;  %v6244_v30 = vld [vmem:[%s6396_s25 + $0x484] sm:$0xf0]  ;;  %v4540_v32 = vld [vmem:[%s6396_s25 + $0x488] sm:$0xf0] }
  0x17   : > { %1850 = vmatpush.bf16.msra.mxu0 %v4659_v16  ;;  %1863 = vmatpush.bf16.msra.mxu1 %v4663_v17  ;;  %v4535_v33 = vor.u32 %v6227_v26, %v4532_v27  ;;  %v4539_v34 = vor.u32 %v6244_v30, %v4538_v28  ;;  %v4402_v35 = vld [vmem:[%s6396_s25 + $0x300] sm:$0xf]  ;;  %v6195_v37 = vld [vmem:[%s6396_s25 + $0x304] sm:$0xf]  ;;  %v4543_v38 = vor.u32 %v6228_v31, %v4540_v32  ;;  %v4410_v40 = vld [vmem:[%s6396_s25 + $0x308] sm:$0xf] }
  0x18   : > { %1876 = vmatpush.bf16.msra.mxu2 %v4667_v21  ;;  %v6211_v36 = vld [vmem:[%s6396_s25 + $0x37c] sm:$0xf0]  ;;  %v4404_v39 = vld [vmem:[%s6396_s25 + $0x380] sm:$0xf0]  ;;  %v6212_v41 = vld [vmem:[%s6396_s25 + $0x384] sm:$0xf0] }
  0x19   : > { %1889 = vmatpush.bf16.msra.mxu3 %v4671_v25  ;;  %v6196_v42 = vld [vmem:[%s6396_s25 + $0x30c] sm:$0xf]  ;;  %v4403_v44 = vor.u32 %v6211_v36, %v4402_v35  ;;  %v4407_v45 = vor.u32 %v6195_v37, %v4404_v39  ;;  %v4411_v46 = vor.u32 %v6212_v41, %v4410_v40  ;;  %v4274_v47 = vld [vmem:[%s6396_s25 + $0x200] sm:$0xf]  ;;  %v6163_v49 = vld [vmem:[%s6396_s25 + $0x204] sm:$0xf] }
  0x1a   : > { %v4412_v43 = vld [vmem:[%s6396_s25 + $0x388] sm:$0xf0]  ;;  %v6179_v48 = vld [vmem:[%s6396_s25 + $0x27c] sm:$0xf0]  ;;  %v4276_v51 = vld [vmem:[%s6396_s25 + $0x280] sm:$0xf0] }
  0x1b   : > { %1851 = vmatpush.bf16.msra.mxu0 %v4531_v29  ;;  %1864 = vmatpush.bf16.msra.mxu1 %v4535_v33  ;;  %v4415_v50 = vor.u32 %v6196_v42, %v4412_v43  ;;  %v4282_v52 = vld [vmem:[%s6396_s25 + $0x208] sm:$0xf]  ;;  %v6164_v54 = vld [vmem:[%s6396_s25 + $0x20c] sm:$0xf]  ;;  %v4275_v56 = vor.u32 %v6179_v48, %v4274_v47  ;;  %v4279_v57 = vor.u32 %v6163_v49, %v4276_v51  ;;  %v4146_v59 = vld [vmem:[%s6396_s25 + $0x100] sm:$0xf] }
  0x1c   : > { %1877 = vmatpush.bf16.msra.mxu2 %v4539_v34  ;;  %v6180_v53 = vld [vmem:[%s6396_s25 + $0x284] sm:$0xf0]  ;;  %v4284_v55 = vld [vmem:[%s6396_s25 + $0x288] sm:$0xf0]  ;;  %v6147_v60 = vld [vmem:[%s6396_s25 + $0x17c] sm:$0xf0] }
  0x1d   : > { %1890 = vmatpush.bf16.msra.mxu3 %v4543_v38  ;;  %v4283_v58 = vor.u32 %v6180_v53, %v4282_v52  ;;  %v6131_v61 = vld [vmem:[%s6396_s25 + $0x104] sm:$0xf]  ;;  %v4287_v62 = vor.u32 %v6164_v54, %v4284_v55  ;;  %v4154_v0 = vld [vmem:[%s6396_s25 + $0x108] sm:$0xf]  ;;  %v6132_v2 = vld [vmem:[%s6396_s25 + $0x10c] sm:$0xf]  ;;  %v4147_v4 = vor.u32 %v6147_v60, %v4146_v59 }
  0x1e   : > { %v4148_v63 = vld [vmem:[%s6396_s25 + $0x180] sm:$0xf0]  ;;  %v6148_v1 = vld [vmem:[%s6396_s25 + $0x184] sm:$0xf0]  ;;  %v4156_v3 = vld [vmem:[%s6396_s25 + $0x188] sm:$0xf0] }
  0x1f   : > { %1852 = vmatpush.bf16.msra.mxu0 %v4403_v44  ;;  %1865 = vmatpush.bf16.msra.mxu1 %v4407_v45  ;;  %v4018_v5 = vld [vmem:[%s6396_s25] sm:$0xf]  ;;  %v4151_v7 = vor.u32 %v6131_v61, %v4148_v63  ;;  %v4155_v8 = vor.u32 %v6148_v1, %v4154_v0  ;;  %v6099_v9 = vld [vmem:[%s6396_s25 + $0x4] sm:$0xf]  ;;  %v4026_v11 = vld [vmem:[%s6396_s25 + $0x8] sm:$0xf]  ;;  %v4159_v12 = vor.u32 %v6132_v2, %v4156_v3 }
  0x20   : > { %1878 = vmatpush.bf16.msra.mxu2 %v4411_v46  ;;  %v6115_v6 = vld [vmem:[%s6396_s25 + $0x7c] sm:$0xf0]  ;;  %v4020_v10 = vld [vmem:[%s6396_s25 + $0x80] sm:$0xf0]  ;;  %v6116_v13 = vld [vmem:[%s6396_s25 + $0x84] sm:$0xf0] }
  0x21   : > { %1891 = vmatpush.bf16.msra.mxu3 %v4415_v50  ;;  %v6100_v14 = vld [vmem:[%s6396_s25 + $0xc] sm:$0xf]  ;;  %v4802_v16 = vld [vmem:[%s6396_s25 + $0x610] sm:$0xf]  ;;  %v6293_v18 = vld [vmem:[%s6396_s25 + $0x614] sm:$0xf]  ;;  %v4019_v19 = vor.u32 %v6115_v6, %v4018_v5  ;;  %v4023_v23 = vor.u32 %v6099_v9, %v4020_v10  ;;  %v4027_v24 = vor.u32 %v6116_v13, %v4026_v11 }
  0x22   : > { %v4028_v15 = vld [vmem:[%s6396_s25 + $0x88] sm:$0xf0]  ;;  %v6309_v17 = vld [vmem:[%s6396_s25 + $0x68c] sm:$0xf0]  ;;  %v4804_v20 = vld [vmem:[%s6396_s25 + $0x690] sm:$0xf0] }
  0x23   : > { %1853 = vmatpush.bf16.msra.mxu0 %v4275_v56  ;;  %1866 = vmatpush.bf16.msra.mxu1 %v4279_v57  ;;  %v4810_v21 = vld [vmem:[%s6396_s25 + $0x618] sm:$0xf]  ;;  %v6294_v25 = vld [vmem:[%s6396_s25 + $0x61c] sm:$0xf]  ;;  %v4031_v27 = vor.u32 %v6100_v14, %v4028_v15  ;;  %v4803_v28 = vor.u32 %v6309_v17, %v4802_v16  ;;  %v4807_v29 = vor.u32 %v6293_v18, %v4804_v20  ;;  %v4674_v31 = vld [vmem:[%s6396_s25 + $0x510] sm:$0xf] }
  0x24   : > { %1879 = vmatpush.bf16.msra.mxu2 %v4283_v58  ;;  %v6310_v22 = vld [vmem:[%s6396_s25 + $0x694] sm:$0xf0]  ;;  %v4812_v26 = vld [vmem:[%s6396_s25 + $0x698] sm:$0xf0]  ;;  %v6277_v32 = vld [vmem:[%s6396_s25 + $0x58c] sm:$0xf0] }
  0x25   : > { %1892 = vmatpush.bf16.msra.mxu3 %v4287_v62  ;;  %v4811_v30 = vor.u32 %v6310_v22, %v4810_v21  ;;  %v6261_v33 = vld [vmem:[%s6396_s25 + $0x514] sm:$0xf]  ;;  %v4815_v34 = vor.u32 %v6294_v25, %v4812_v26  ;;  %v4682_v36 = vld [vmem:[%s6396_s25 + $0x518] sm:$0xf]  ;;  %v6262_v38 = vld [vmem:[%s6396_s25 + $0x51c] sm:$0xf]  ;;  %v4675_v40 = vor.u32 %v6277_v32, %v4674_v31 }
  0x26   : > { %v4676_v35 = vld [vmem:[%s6396_s25 + $0x590] sm:$0xf0]  ;;  %v6278_v37 = vld [vmem:[%s6396_s25 + $0x594] sm:$0xf0]  ;;  %v4684_v39 = vld [vmem:[%s6396_s25 + $0x598] sm:$0xf0] }
  0x27   : > { %1854 = vmatpush.bf16.msra.mxu0 %v4147_v4  ;;  %1867 = vmatpush.bf16.msra.mxu1 %v4151_v7  ;;  %v4546_v41 = vld [vmem:[%s6396_s25 + $0x410] sm:$0xf]  ;;  %v4679_v42 = vor.u32 %v6261_v33, %v4676_v35  ;;  %v4683_v43 = vor.u32 %v6278_v37, %v4682_v36  ;;  %v6229_v45 = vld [vmem:[%s6396_s25 + $0x414] sm:$0xf]  ;;  %v4687_v47 = vor.u32 %v6262_v38, %v4684_v39  ;;  %v4554_v48 = vld [vmem:[%s6396_s25 + $0x418] sm:$0xf] }
  0x28   : > { %1880 = vmatpush.bf16.msra.mxu2 %v4155_v8  ;;  %v6245_v44 = vld [vmem:[%s6396_s25 + $0x48c] sm:$0xf0]  ;;  %v4548_v46 = vld [vmem:[%s6396_s25 + $0x490] sm:$0xf0]  ;;  %v6246_v49 = vld [vmem:[%s6396_s25 + $0x494] sm:$0xf0] }
  0x29   : > { %1893 = vmatpush.bf16.msra.mxu3 %v4159_v12  ;;  %v6230_v50 = vld [vmem:[%s6396_s25 + $0x41c] sm:$0xf]  ;;  %v6481_v52 = vld [vmem:[%s7626_s3] sm:$0x1]  ;;  %v4547_v53 = vor.u32 %v6245_v44, %v4546_v41  ;;  %v4551_v54 = vor.u32 %v6229_v45, %v4548_v46  ;;  %v4555_v55 = vor.u32 %v6246_v49, %v4554_v48  ;;  %v4418_v56 = vld [vmem:[%s6396_s25 + $0x310] sm:$0xf] }
  0x2a   : > { %v4556_v51 = vld [vmem:[%s6396_s25 + $0x498] sm:$0xf0]  ;;  %v6213_v57 = vld [vmem:[%s6396_s25 + $0x38c] sm:$0xf0]  ;;  %v6197_v58 = vld [vmem:[%s6396_s25 + $0x314] sm:$0xf] }
  0x2b   : > { %1855 = vmatpush.bf16.msra.mxu0 %v4019_v19  ;;  %1868 = vmatpush.bf16.msra.mxu1 %v4023_v23  ;;  %v4559_v59 = vor.u32 %v6230_v50, %v4556_v51  ;;  %v4420_v60 = vld [vmem:[%s6396_s25 + $0x390] sm:$0xf0]  ;;  %v4426_v61 = vld [vmem:[%s6396_s25 + $0x318] sm:$0xf]  ;;  %v6198_v63 = vld [vmem:[%s6396_s25 + $0x31c] sm:$0xf]  ;;  %v4419_v1 = vor.u32 %v6213_v57, %v4418_v56 }
  0x2c   : > { %1881 = vmatpush.bf16.msra.mxu2 %v4027_v24  ;;  %v6214_v62 = vld [vmem:[%s6396_s25 + $0x394] sm:$0xf0]  ;;  %v4428_v0 = vld [vmem:[%s6396_s25 + $0x398] sm:$0xf0]  ;;  %v4423_v2 = vor.u32 %v6197_v58, %v4420_v60  ;;  %v4290_v4 = vld [vmem:[%s6396_s25 + $0x210] sm:$0xf] }
  0x2d   : > { %1894 = vmatpush.bf16.msra.mxu3 %v4031_v27  ;;  %v4427_v3 = vor.u32 %v6214_v62, %v4426_v61  ;;  %v6181_v5 = vld [vmem:[%s6396_s25 + $0x28c] sm:$0xf0]  ;;  %v6165_v6 = vld [vmem:[%s6396_s25 + $0x214] sm:$0xf]  ;;  %v4431_v7 = vor.u32 %v6198_v63, %v4428_v0  ;;  %v4298_v9 = vld [vmem:[%s6396_s25 + $0x218] sm:$0xf] }
  0x2e   : > { %4913 = vmatmul.msk.bf16.vlgmr.msra.gmra.mxu1 %vm1844_vm0, %v6481_v52  ;;  %4912 = vmatmul.msk.bf16.vlgmr.msra.gmra.mxu0 %vm1844_vm0, %v6481_v52  ;;  %v4292_v8 = vld [vmem:[%s6396_s25 + $0x290] sm:$0xf0]  ;;  %v6182_v10 = vld [vmem:[%s6396_s25 + $0x294] sm:$0xf0]  ;;  %v6166_v11 = vld [vmem:[%s6396_s25 + $0x21c] sm:$0xf]  ;;  %v4291_v13 = vor.u32 %v6181_v5, %v4290_v4 }
  0x2f   : > { %1901 = vmatpush.bf16.msrb.mxu0 %v4803_v28  ;;  %1914 = vmatpush.bf16.msrb.mxu1 %v4807_v29  ;;  %v4300_v12 = vld [vmem:[%s6396_s25 + $0x298] sm:$0xf0]  ;;  %v4295_v14 = vor.u32 %v6165_v6, %v4292_v8  ;;  %v4299_v15 = vor.u32 %v6182_v10, %v4298_v9  ;;  %v4162_v16 = vld [vmem:[%s6396_s25 + $0x110] sm:$0xf]  ;;  %v6133_v18 = vld [vmem:[%s6396_s25 + $0x114] sm:$0xf] }
  0x30   : > { %1927 = vmatpush.bf16.msrb.mxu2 %v4811_v30  ;;  %4915 = vmatmul.msk.bf16.vlgmr.msra.gmra.mxu3 %vm1844_vm0, %v6481_v52  ;;  %v6149_v17 = vld [vmem:[%s6396_s25 + $0x18c] sm:$0xf0]  ;;  %v4303_v19 = vor.u32 %v6166_v11, %v4300_v12  ;;  %v4164_v20 = vld [vmem:[%s6396_s25 + $0x190] sm:$0xf0]  ;;  %v4170_v21 = vld [vmem:[%s6396_s25 + $0x118] sm:$0xf] }
  0x31   : > { %1940 = vmatpush.bf16.msrb.mxu3 %v4815_v34  ;;  %4914 = vmatmul.msk.bf16.vlgmr.msra.gmra.mxu2 %vm1844_vm0, %v6481_v52  ;;  %v6150_v22 = vld [vmem:[%s6396_s25 + $0x194] sm:$0xf0]  ;;  %v6134_v23 = vld [vmem:[%s6396_s25 + $0x11c] sm:$0xf]  ;;  %v4163_v25 = vor.u32 %v6149_v17, %v4162_v16  ;;  %v4034_v26 = vld [vmem:[%s6396_s25 + $0x10] sm:$0xf]  ;;  %v4167_v28 = vor.u32 %v6133_v18, %v4164_v20 }
  0x32   : > { %v4172_v24 = vld [vmem:[%s6396_s25 + $0x198] sm:$0xf0]  ;;  %v6117_v27 = vld [vmem:[%s6396_s25 + $0x8c] sm:$0xf0]  ;;  %v4171_v29 = vor.u32 %v6150_v22, %v4170_v21  ;;  %v6101_v30 = vld [vmem:[%s6396_s25 + $0x14] sm:$0xf] }
  0x33   : > { %1902 = vmatpush.bf16.msrb.mxu0 %v4675_v40  ;;  %1915 = vmatpush.bf16.msrb.mxu1 %v4679_v42  ;;  %v4036_v31 = vld [vmem:[%s6396_s25 + $0x90] sm:$0xf0]  ;;  %v4042_v32 = vld [vmem:[%s6396_s25 + $0x18] sm:$0xf]  ;;  %v4175_v33 = vor.u32 %v6134_v23, %v4172_v24  ;;  %v6102_v35 = vld [vmem:[%s6396_s25 + $0x1c] sm:$0xf]  ;;  %v4035_v40 = vor.u32 %v6117_v27, %v4034_v26 }
  0x34   : > { %1928 = vmatpush.bf16.msrb.mxu2 %v4683_v43  ;;  %v6118_v34 = vld [vmem:[%s6396_s25 + $0x94] sm:$0xf0]  ;;  %v4044_v36 = vld [vmem:[%s6396_s25 + $0x98] sm:$0xf0]  ;;  %v4818_v37 = vld [vmem:[%s6396_s25 + $0x620] sm:$0xf]  ;;  %v4039_v44 = vor.u32 %v6101_v30, %v4036_v31 }
  0x35   : > { %1941 = vmatpush.bf16.msrb.mxu3 %v4687_v47  ;;  %v6311_v38 = vld [vmem:[%s6396_s25 + $0x69c] sm:$0xf0]  ;;  %v6295_v39 = vld [vmem:[%s6396_s25 + $0x624] sm:$0xf]  ;;  %v4826_v42 = vld [vmem:[%s6396_s25 + $0x628] sm:$0xf]  ;;  %v4043_v45 = vor.u32 %v6118_v34, %v4042_v32  ;;  %v4047_v48 = vor.u32 %v6102_v35, %v4044_v36 }
  0x36   : > { %v4820_v41 = vld [vmem:[%s6396_s25 + $0x6a0] sm:$0xf0]  ;;  %v6312_v43 = vld [vmem:[%s6396_s25 + $0x6a4] sm:$0xf0]  ;;  %v6296_v46 = vld [vmem:[%s6396_s25 + $0x62c] sm:$0xf]  ;;  %v4819_v49 = vor.u32 %v6311_v38, %v4818_v37 }
  0x37   : > { %1903 = vmatpush.bf16.msrb.mxu0 %v4547_v53  ;;  %1916 = vmatpush.bf16.msrb.mxu1 %v4551_v54  ;;  %v4828_v47 = vld [vmem:[%s6396_s25 + $0x6a8] sm:$0xf0]  ;;  %v4823_v50 = vor.u32 %v6295_v39, %v4820_v41  ;;  %v4827_v51 = vor.u32 %v6312_v43, %v4826_v42  ;;  %v4690_v53 = vld [vmem:[%s6396_s25 + $0x520] sm:$0xf]  ;;  %v4692_v57 = vld [vmem:[%s6396_s25 + $0x5a0] sm:$0xf0] }
  0x38   : > { %1929 = vmatpush.bf16.msrb.mxu2 %v4555_v55  ;;  %v6279_v54 = vld [vmem:[%s6396_s25 + $0x59c] sm:$0xf0]  ;;  %v6263_v55 = vld [vmem:[%s6396_s25 + $0x524] sm:$0xf]  ;;  %v4831_v56 = vor.u32 %v6296_v46, %v4828_v47  ;;  %v4698_v58 = vld [vmem:[%s6396_s25 + $0x528] sm:$0xf] }
  0x39   : > { %1942 = vmatpush.bf16.msrb.mxu3 %v4559_v59  ;;  %v6280_v59 = vld [vmem:[%s6396_s25 + $0x5a4] sm:$0xf0]  ;;  %v6264_v60 = vld [vmem:[%s6396_s25 + $0x52c] sm:$0xf]  ;;  %v4691_v62 = vor.u32 %v6279_v54, %v4690_v53  ;;  %v4695_v63 = vor.u32 %v6263_v55, %v4692_v57  ;;  %v4564_v5 = vld [vmem:[%s6396_s25 + $0x4a0] sm:$0xf0] }
  0x3a   : > { %v4700_v61 = vld [vmem:[%s6396_s25 + $0x5a8] sm:$0xf0]  ;;  %v4699_v0 = vor.u32 %v6280_v59, %v4698_v58  ;;  %v4570_v6 = vld [vmem:[%s6396_s25 + $0x428] sm:$0xf]  ;;  %v4436_v17 = vld [vmem:[%s6396_s25 + $0x3a0] sm:$0xf0] }
  0x3b   : > { %1904 = vmatpush.bf16.msrb.mxu0 %v4419_v1  ;;  %1917 = vmatpush.bf16.msrb.mxu1 %v4423_v2  ;;  %v4562_v1 = vld [vmem:[%s6396_s25 + $0x420] sm:$0xf]  ;;  %v4703_v4 = vor.u32 %v6264_v60, %v4700_v61  ;;  %v6232_v8 = vld [vmem:[%s6396_s25 + $0x42c] sm:$0xf]  ;;  %v4442_v18 = vld [vmem:[%s6396_s25 + $0x328] sm:$0xf] }
  0x3c   : > { %1930 = vmatpush.bf16.msrb.mxu2 %v4427_v3  ;;  %v6247_v2 = vld [vmem:[%s6396_s25 + $0x49c] sm:$0xf0]  ;;  %v6231_v3 = vld [vmem:[%s6396_s25 + $0x424] sm:$0xf]  ;;  %v4572_v9 = vld [vmem:[%s6396_s25 + $0x4a8] sm:$0xf0] }
  0x3d   : > { %1943 = vmatpush.bf16.msrb.mxu3 %v4431_v7  ;;  %v6248_v7 = vld [vmem:[%s6396_s25 + $0x4a4] sm:$0xf0]  ;;  %v4563_v10 = vor.u32 %v6247_v2, %v4562_v1  ;;  %v4567_v11 = vor.u32 %v6231_v3, %v4564_v5  ;;  %v4575_v16 = vor.u32 %v6232_v8, %v4572_v9  ;;  %v6200_v20 = vld [vmem:[%s6396_s25 + $0x32c] sm:$0xf]  ;;  %v6183_v26 = vld [vmem:[%s6396_s25 + $0x29c] sm:$0xf0] }
  0x3e   : > { %v4571_v12 = vor.u32 %v6248_v7, %v4570_v6  ;;  %v4444_v21 = vld [vmem:[%s6396_s25 + $0x3a8] sm:$0xf0]  ;;  %v6167_v27 = vld [vmem:[%s6396_s25 + $0x224] sm:$0xf]  ;;  %v4314_v30 = vld [vmem:[%s6396_s25 + $0x228] sm:$0xf] }
  0x3f   : > { %1905 = vmatpush.bf16.msrb.mxu0 %v4291_v13  ;;  %1918 = vmatpush.bf16.msrb.mxu1 %v4295_v14  ;;  %v4434_v13 = vld [vmem:[%s6396_s25 + $0x320] sm:$0xf]  ;;  %v6184_v31 = vld [vmem:[%s6396_s25 + $0x2a4] sm:$0xf0]  ;;  %v6168_v32 = vld [vmem:[%s6396_s25 + $0x22c] sm:$0xf] }
  0x40   : > { %1931 = vmatpush.bf16.msrb.mxu2 %v4299_v15  ;;  %v6215_v14 = vld [vmem:[%s6396_s25 + $0x39c] sm:$0xf0]  ;;  %v6199_v15 = vld [vmem:[%s6396_s25 + $0x324] sm:$0xf]  ;;  %v4315_v36 = vor.u32 %v6184_v31, %v4314_v30  ;;  %v4186_v42 = vld [vmem:[%s6396_s25 + $0x128] sm:$0xf] }
  0x41   : > { %1944 = vmatpush.bf16.msrb.mxu3 %v4303_v19  ;;  %v6216_v19 = vld [vmem:[%s6396_s25 + $0x3a4] sm:$0xf0]  ;;  %v4435_v22 = vor.u32 %v6215_v14, %v4434_v13  ;;  %v4439_v23 = vor.u32 %v6199_v15, %v4436_v17  ;;  %v4178_v37 = vld [vmem:[%s6396_s25 + $0x120] sm:$0xf]  ;;  %v6135_v39 = vld [vmem:[%s6396_s25 + $0x124] sm:$0xf] }
  0x42   : > { %v4443_v24 = vor.u32 %v6216_v19, %v4442_v18  ;;  %v6151_v38 = vld [vmem:[%s6396_s25 + $0x19c] sm:$0xf0]  ;;  %v4180_v41 = vld [vmem:[%s6396_s25 + $0x1a0] sm:$0xf0]  ;;  %v6152_v43 = vld [vmem:[%s6396_s25 + $0x1a4] sm:$0xf0] }
  0x43   : > { %1906 = vmatpush.bf16.msrb.mxu0 %v4163_v25  ;;  %1919 = vmatpush.bf16.msrb.mxu1 %v4167_v28  ;;  %v4306_v25 = vld [vmem:[%s6396_s25 + $0x220] sm:$0xf]  ;;  %v4447_v28 = vor.u32 %v6200_v20, %v4444_v21  ;;  %v4179_v46 = vor.u32 %v6151_v38, %v4178_v37  ;;  %v4052_v53 = vld [vmem:[%s6396_s25 + $0xa0] sm:$0xf0]  ;;  %v4058_v54 = vld [vmem:[%s6396_s25 + $0x28] sm:$0xf] }
  0x44   : > { %1932 = vmatpush.bf16.msrb.mxu2 %v4171_v29  ;;  %v4308_v29 = vld [vmem:[%s6396_s25 + $0x2a0] sm:$0xf0]  ;;  %v4307_v34 = vor.u32 %v6183_v26, %v4306_v25  ;;  %v4050_v47 = vld [vmem:[%s6396_s25 + $0x20] sm:$0xf]  ;;  %v6104_v57 = vld [vmem:[%s6396_s25 + $0x2c] sm:$0xf] }
  0x45   : > { %1945 = vmatpush.bf16.msrb.mxu3 %v4175_v33  ;;  %v4316_v33 = vld [vmem:[%s6396_s25 + $0x2a8] sm:$0xf0]  ;;  %v4311_v35 = vor.u32 %v6167_v27, %v4308_v29  ;;  %v4834_v59 = vld [vmem:[%s6396_s25 + $0x630] sm:$0xf]  ;;  %v6297_v61 = vld [vmem:[%s6396_s25 + $0x634] sm:$0xf] }
  0x46   : > { %v4060_v58 = vld [vmem:[%s6396_s25 + $0xa8] sm:$0xf0]  ;;  %v6313_v60 = vld [vmem:[%s6396_s25 + $0x6ac] sm:$0xf0]  ;;  %v6314_v1 = vld [vmem:[%s6396_s25 + $0x6b4] sm:$0xf0] }
  0x47   : > { %1907 = vmatpush.bf16.msrb.mxu0 %v4035_v40  ;;  %1920 = vmatpush.bf16.msrb.mxu1 %v4039_v44  ;;  %v4319_v40 = vor.u32 %v6168_v32, %v4316_v33  ;;  %v6136_v44 = vld [vmem:[%s6396_s25 + $0x12c] sm:$0xf]  ;;  %v4844_v5 = vld [vmem:[%s6396_s25 + $0x6b8] sm:$0xf0]  ;;  %v4063_v6 = vor.u32 %v6104_v57, %v4060_v58  ;;  %v4835_v7 = vor.u32 %v6313_v60, %v4834_v59  ;;  %v4708_v14 = vld [vmem:[%s6396_s25 + $0x5b0] sm:$0xf0] }
  0x48   : > { %1933 = vmatpush.bf16.msrb.mxu2 %v4043_v45  ;;  %v4188_v45 = vld [vmem:[%s6396_s25 + $0x1a8] sm:$0xf0]  ;;  %v4714_v15 = vld [vmem:[%s6396_s25 + $0x538] sm:$0xf]  ;;  %v6266_v17 = vld [vmem:[%s6396_s25 + $0x53c] sm:$0xf] }
  0x49   : > { %1946 = vmatpush.bf16.msrb.mxu3 %v4047_v48  ;;  %v6119_v48 = vld [vmem:[%s6396_s25 + $0x9c] sm:$0xf0]  ;;  %v4191_v55 = vor.u32 %v6136_v44, %v4188_v45  ;;  %v4716_v18 = vld [vmem:[%s6396_s25 + $0x5b8] sm:$0xf0]  ;;  %v4580_v26 = vld [vmem:[%s6396_s25 + $0x4b0] sm:$0xf0] }
  0x4a   : > { %4917 = vmatmul.msk.bf16.vlgmr.msrb.gmra.mxu1 %vm1844_vm0, %v6481_v52  ;;  %4916 = vmatmul.msk.bf16.vlgmr.msrb.gmra.mxu0 %vm1844_vm0, %v6481_v52  ;;  %v4719_v25 = vor.u32 %v6266_v17, %v4716_v18  ;;  %v4586_v27 = vld [vmem:[%s6396_s25 + $0x438] sm:$0xf]  ;;  %v6234_v29 = vld [vmem:[%s6396_s25 + $0x43c] sm:$0xf]  ;;  %v4452_v38 = vld [vmem:[%s6396_s25 + $0x3b0] sm:$0xf0] }
  0x4b   : > { %1953 = vmatpush.bf16.msra.mxu0 %v4819_v49  ;;  %1966 = vmatpush.bf16.msra.mxu1 %v4823_v50  ;;  %v4183_v49 = vor.u32 %v6135_v39, %v4180_v41  ;;  %v4187_v50 = vor.u32 %v6152_v43, %v4186_v42  ;;  %v4588_v30 = vld [vmem:[%s6396_s25 + $0x4b8] sm:$0xf0]  ;;  %v4458_v39 = vld [vmem:[%s6396_s25 + $0x338] sm:$0xf]  ;;  %v4194_v59 = vld [vmem:[%s6396_s25 + $0x130] sm:$0xf] }
  0x4c   : > { %1979 = vmatpush.bf16.msra.mxu2 %v4827_v51  ;;  %4919 = vmatmul.msk.bf16.vlgmr.msrb.gmra.mxu3 %vm1844_vm0, %v6481_v52  ;;  %v6103_v51 = vld [vmem:[%s6396_s25 + $0x24] sm:$0xf]  ;;  %v4591_v37 = vor.u32 %v6234_v29, %v4588_v30  ;;  %v6202_v41 = vld [vmem:[%s6396_s25 + $0x33c] sm:$0xf]  ;;  %v6153_v60 = vld [vmem:[%s6396_s25 + $0x1ac] sm:$0xf0] }
  0x4d   : > { %1992 = vmatpush.bf16.msra.mxu3 %v4831_v56  ;;  %4918 = vmatmul.msk.bf16.vlgmr.msrb.gmra.mxu2 %vm1844_vm0, %v6481_v52  ;;  %v6120_v56 = vld [vmem:[%s6396_s25 + $0xa4] sm:$0xf0]  ;;  %v4055_v2 = vor.u32 %v6103_v51, %v4052_v53  ;;  %v4460_v42 = vld [vmem:[%s6396_s25 + $0x3b8] sm:$0xf0]  ;;  %v4330_v51 = vld [vmem:[%s6396_s25 + $0x238] sm:$0xf] }
  0x4e   : > { %v4059_v3 = vor.u32 %v6120_v56, %v4058_v54  ;;  %v6186_v53 = vld [vmem:[%s6396_s25 + $0x2b4] sm:$0xf0]  ;;  %v6170_v54 = vld [vmem:[%s6396_s25 + $0x23c] sm:$0xf]  ;;  %v6315_v17 = vld [vmem:[%s6396_s25 + $0x6bc] sm:$0xf0] }
  0x4f   : > { %1954 = vmatpush.bf16.msra.mxu0 %v4691_v62  ;;  %1967 = vmatpush.bf16.msra.mxu1 %v4695_v63  ;;  %v4051_v62 = vor.u32 %v6119_v48, %v4050_v47  ;;  %v4836_v63 = vld [vmem:[%s6396_s25 + $0x6b0] sm:$0xf0]  ;;  %v6185_v47 = vld [vmem:[%s6396_s25 + $0x2ac] sm:$0xf0]  ;;  %v4331_v58 = vor.u32 %v6186_v53, %v4330_v51  ;;  %v6299_v18 = vld [vmem:[%s6396_s25 + $0x644] sm:$0xf] }
  0x50   : > { %1980 = vmatpush.bf16.msra.mxu2 %v4699_v0  ;;  %v4842_v0 = vld [vmem:[%s6396_s25 + $0x638] sm:$0xf]  ;;  %v4839_v8 = vor.u32 %v6297_v61, %v4836_v63  ;;  %v6169_v48 = vld [vmem:[%s6396_s25 + $0x234] sm:$0xf]  ;;  %v4604_v51 = vld [vmem:[%s6396_s25 + $0x4c8] sm:$0xf0] }
  0x51   : > { %1993 = vmatpush.bf16.msra.mxu3 %v4703_v4  ;;  %v6298_v4 = vld [vmem:[%s6396_s25 + $0x63c] sm:$0xf]  ;;  %v4843_v9 = vor.u32 %v6314_v1, %v4842_v0  ;;  %v6137_v61 = vld [vmem:[%s6396_s25 + $0x134] sm:$0xf]  ;;  %v4202_v0 = vld [vmem:[%s6396_s25 + $0x138] sm:$0xf] }
  0x52   : > { %v4847_v13 = vor.u32 %v6298_v4, %v4844_v5  ;;  %v4196_v63 = vld [vmem:[%s6396_s25 + $0x1b0] sm:$0xf0]  ;;  %v6154_v1 = vld [vmem:[%s6396_s25 + $0x1b4] sm:$0xf0]  ;;  %v4195_v4 = vor.u32 %v6153_v60, %v4194_v59  ;;  %v4066_v5 = vld [vmem:[%s6396_s25 + $0x30] sm:$0xf] }
  0x53   : > { %1955 = vmatpush.bf16.msra.mxu0 %v4563_v10  ;;  %1968 = vmatpush.bf16.msra.mxu1 %v4567_v11  ;;  %v4706_v10 = vld [vmem:[%s6396_s25 + $0x530] sm:$0xf]  ;;  %v4468_v60 = vld [vmem:[%s6396_s25 + $0x3c0] sm:$0xf0] }
  0x54   : > { %1981 = vmatpush.bf16.msra.mxu2 %v4571_v12  ;;  %v6281_v11 = vld [vmem:[%s6396_s25 + $0x5ac] sm:$0xf0]  ;;  %v6265_v12 = vld [vmem:[%s6396_s25 + $0x534] sm:$0xf] }
  0x55   : > { %1994 = vmatpush.bf16.msra.mxu3 %v4575_v16  ;;  %v6282_v16 = vld [vmem:[%s6396_s25 + $0x5b4] sm:$0xf0]  ;;  %v4707_v19 = vor.u32 %v6281_v11, %v4706_v10  ;;  %v4711_v20 = vor.u32 %v6265_v12, %v4708_v14  ;;  %v4068_v10 = vld [vmem:[%s6396_s25 + $0xb0] sm:$0xf0]  ;;  %v6106_v14 = vld [vmem:[%s6396_s25 + $0x3c] sm:$0xf] }
  0x56   : > { %v4715_v21 = vor.u32 %v6282_v16, %v4714_v15  ;;  %v4074_v11 = vld [vmem:[%s6396_s25 + $0x38] sm:$0xf]  ;;  %v4076_v15 = vld [vmem:[%s6396_s25 + $0xb8] sm:$0xf0]  ;;  %v4850_v16 = vld [vmem:[%s6396_s25 + $0x640] sm:$0xf] }
  0x57   : > { %1956 = vmatpush.bf16.msra.mxu0 %v4435_v22  ;;  %1969 = vmatpush.bf16.msra.mxu1 %v4439_v23  ;;  %v4578_v22 = vld [vmem:[%s6396_s25 + $0x430] sm:$0xf] }
  0x58   : > { %1982 = vmatpush.bf16.msra.mxu2 %v4443_v24  ;;  %v6249_v23 = vld [vmem:[%s6396_s25 + $0x4ac] sm:$0xf0]  ;;  %v6233_v24 = vld [vmem:[%s6396_s25 + $0x434] sm:$0xf] }
  0x59   : > { %1995 = vmatpush.bf16.msra.mxu3 %v4447_v28  ;;  %v6250_v28 = vld [vmem:[%s6396_s25 + $0x4b4] sm:$0xf0]  ;;  %v4579_v31 = vor.u32 %v6249_v23, %v4578_v22  ;;  %v4583_v32 = vor.u32 %v6233_v24, %v4580_v26  ;;  %v6316_v22 = vld [vmem:[%s6396_s25 + $0x6c4] sm:$0xf0]  ;;  %v4860_v26 = vld [vmem:[%s6396_s25 + $0x6c8] sm:$0xf0] }
  0x5a   : > { %v4587_v33 = vor.u32 %v6250_v28, %v4586_v27  ;;  %v4079_v27 = vor.u32 %v6106_v14, %v4076_v15  ;;  %v4851_v28 = vor.u32 %v6315_v17, %v4850_v16  ;;  %v4210_v16 = vld [vmem:[%s6396_s25 + $0x140] sm:$0xf] }
  0x5b   : > { %1957 = vmatpush.bf16.msra.mxu0 %v4307_v34  ;;  %1970 = vmatpush.bf16.msra.mxu1 %v4311_v35  ;;  %v4450_v34 = vld [vmem:[%s6396_s25 + $0x330] sm:$0xf]  ;;  %v6155_v17 = vld [vmem:[%s6396_s25 + $0x1bc] sm:$0xf0] }
  0x5c   : > { %1983 = vmatpush.bf16.msra.mxu2 %v4315_v36  ;;  %v6217_v35 = vld [vmem:[%s6396_s25 + $0x3ac] sm:$0xf0]  ;;  %v6201_v36 = vld [vmem:[%s6396_s25 + $0x334] sm:$0xf] }
  0x5d   : > { %1996 = vmatpush.bf16.msra.mxu3 %v4319_v40  ;;  %v6218_v40 = vld [vmem:[%s6396_s25 + $0x3b4] sm:$0xf0]  ;;  %v4451_v43 = vor.u32 %v6217_v35, %v4450_v34  ;;  %v4455_v44 = vor.u32 %v6201_v36, %v4452_v38  ;;  %v4724_v35 = vld [vmem:[%s6396_s25 + $0x5c0] sm:$0xf0]  ;;  %v4730_v36 = vld [vmem:[%s6396_s25 + $0x548] sm:$0xf] }
  0x5e   : > { %v4459_v45 = vor.u32 %v6218_v40, %v4458_v39  ;;  %v6268_v38 = vld [vmem:[%s6396_s25 + $0x54c] sm:$0xf] }
  0x5f   : > { %1958 = vmatpush.bf16.msra.mxu0 %v4179_v46  ;;  %1971 = vmatpush.bf16.msra.mxu1 %v4183_v49  ;;  %v4322_v46 = vld [vmem:[%s6396_s25 + $0x230] sm:$0xf]  ;;  %v4463_v49 = vor.u32 %v6202_v41, %v4460_v42  ;;  %v4732_v39 = vld [vmem:[%s6396_s25 + $0x5c8] sm:$0xf0] }
  0x60   : > { %1984 = vmatpush.bf16.msra.mxu2 %v4187_v50  ;;  %v4324_v50 = vld [vmem:[%s6396_s25 + $0x2b0] sm:$0xf0]  ;;  %v4323_v56 = vor.u32 %v6185_v47, %v4322_v46  ;;  %v4735_v46 = vor.u32 %v6268_v38, %v4732_v39  ;;  %v4596_v47 = vld [vmem:[%s6396_s25 + $0x4c0] sm:$0xf0]  ;;  %v6317_v38 = vld [vmem:[%s6396_s25 + $0x6cc] sm:$0xf0] }
  0x61   : > { %1997 = vmatpush.bf16.msra.mxu3 %v4191_v55  ;;  %v4332_v55 = vld [vmem:[%s6396_s25 + $0x2b8] sm:$0xf0]  ;;  %v4327_v57 = vor.u32 %v6169_v48, %v4324_v50  ;;  %v4602_v48 = vld [vmem:[%s6396_s25 + $0x448] sm:$0xf]  ;;  %v6236_v50 = vld [vmem:[%s6396_s25 + $0x44c] sm:$0xf] }
  0x62   : > { %v4607_v59 = vor.u32 %v6236_v50, %v4604_v51  ;;  %v6301_v39 = vld [vmem:[%s6396_s25 + $0x654] sm:$0xf] }
  0x63   : > { %1959 = vmatpush.bf16.msra.mxu0 %v4051_v62  ;;  %1972 = vmatpush.bf16.msra.mxu1 %v4055_v2  ;;  %v4335_v62 = vor.u32 %v6170_v54, %v4332_v55  ;;  %v6138_v2 = vld [vmem:[%s6396_s25 + $0x13c] sm:$0xf] }
  0x64   : > { %1985 = vmatpush.bf16.msra.mxu2 %v4059_v3  ;;  %v4204_v3 = vld [vmem:[%s6396_s25 + $0x1b8] sm:$0xf0] }
  0x65   : > { %1998 = vmatpush.bf16.msra.mxu3 %v4063_v6  ;;  %v6121_v6 = vld [vmem:[%s6396_s25 + $0xac] sm:$0xf0]  ;;  %v4207_v12 = vor.u32 %v6138_v2, %v4204_v3 }
  0x66   : > { %4921 = vmatmul.msk.bf16.vlgmr.msra.gmra.mxu1 %vm1844_vm0, %v6481_v52  ;;  %4920 = vmatmul.msk.bf16.vlgmr.msra.gmra.mxu0 %vm1844_vm0, %v6481_v52 }
  0x67   : > { %2005 = vmatpush.bf16.msrb.mxu0 %v4835_v7  ;;  %2018 = vmatpush.bf16.msrb.mxu1 %v4839_v8  ;;  %v4199_v7 = vor.u32 %v6137_v61, %v4196_v63  ;;  %v4203_v8 = vor.u32 %v6154_v1, %v4202_v0  ;;  %v4474_v61 = vld [vmem:[%s6396_s25 + $0x348] sm:$0xf]  ;;  %v6204_v63 = vld [vmem:[%s6396_s25 + $0x34c] sm:$0xf] }
  0x68   : > { %2031 = vmatpush.bf16.msrb.mxu2 %v4843_v9  ;;  %4923 = vmatmul.msk.bf16.vlgmr.msra.gmra.mxu3 %vm1844_vm0, %v6481_v52  ;;  %v6105_v9 = vld [vmem:[%s6396_s25 + $0x34] sm:$0xf]  ;;  %v4476_v0 = vld [vmem:[%s6396_s25 + $0x3c8] sm:$0xf0] }
  0x69   : > { %2044 = vmatpush.bf16.msrb.mxu3 %v4847_v13  ;;  %4922 = vmatmul.msk.bf16.vlgmr.msra.gmra.mxu2 %vm1844_vm0, %v6481_v52  ;;  %v6122_v13 = vld [vmem:[%s6396_s25 + $0xb4] sm:$0xf0]  ;;  %v4071_v23 = vor.u32 %v6105_v9, %v4068_v10  ;;  %v4346_v9 = vld [vmem:[%s6396_s25 + $0x248] sm:$0xf] }
  0x6a   : > { %v4075_v24 = vor.u32 %v6122_v13, %v4074_v11  ;;  %v6188_v10 = vld [vmem:[%s6396_s25 + $0x2c4] sm:$0xf0]  ;;  %v6172_v11 = vld [vmem:[%s6396_s25 + $0x24c] sm:$0xf] }
  0x6b   : > { %2006 = vmatpush.bf16.msrb.mxu0 %v4707_v19  ;;  %2019 = vmatpush.bf16.msrb.mxu1 %v4711_v20  ;;  %v4067_v19 = vor.u32 %v6121_v6, %v4066_v5  ;;  %v4852_v20 = vld [vmem:[%s6396_s25 + $0x6c0] sm:$0xf0]  ;;  %v6187_v5 = vld [vmem:[%s6396_s25 + $0x2bc] sm:$0xf0]  ;;  %v4347_v15 = vor.u32 %v6188_v10, %v4346_v9  ;;  %v4620_v9 = vld [vmem:[%s6396_s25 + $0x4d8] sm:$0xf0] }
  0x6c   : > { %2032 = vmatpush.bf16.msrb.mxu2 %v4715_v21  ;;  %v4858_v21 = vld [vmem:[%s6396_s25 + $0x648] sm:$0xf]  ;;  %v4855_v29 = vor.u32 %v6299_v18, %v4852_v20  ;;  %v6171_v6 = vld [vmem:[%s6396_s25 + $0x244] sm:$0xf] }
  0x6d   : > { %2045 = vmatpush.bf16.msrb.mxu3 %v4719_v25  ;;  %v6300_v25 = vld [vmem:[%s6396_s25 + $0x64c] sm:$0xf]  ;;  %v4859_v30 = vor.u32 %v6316_v22, %v4858_v21  ;;  %v6139_v18 = vld [vmem:[%s6396_s25 + $0x144] sm:$0xf]  ;;  %v4218_v21 = vld [vmem:[%s6396_s25 + $0x148] sm:$0xf] }
  0x6e   : > { %v4863_v34 = vor.u32 %v6300_v25, %v4860_v26  ;;  %v4212_v20 = vld [vmem:[%s6396_s25 + $0x1c0] sm:$0xf0]  ;;  %v6156_v22 = vld [vmem:[%s6396_s25 + $0x1c4] sm:$0xf0]  ;;  %v4211_v25 = vor.u32 %v6155_v17, %v4210_v16  ;;  %v4082_v26 = vld [vmem:[%s6396_s25 + $0x40] sm:$0xf] }
  0x6f   : > { %2007 = vmatpush.bf16.msrb.mxu0 %v4579_v31  ;;  %2020 = vmatpush.bf16.msrb.mxu1 %v4583_v32  ;;  %v4722_v31 = vld [vmem:[%s6396_s25 + $0x540] sm:$0xf]  ;;  %v4484_v17 = vld [vmem:[%s6396_s25 + $0x3d0] sm:$0xf0] }
  0x70   : > { %2033 = vmatpush.bf16.msrb.mxu2 %v4587_v33  ;;  %v6283_v32 = vld [vmem:[%s6396_s25 + $0x5bc] sm:$0xf0]  ;;  %v6267_v33 = vld [vmem:[%s6396_s25 + $0x544] sm:$0xf] }
  0x71   : > { %2046 = vmatpush.bf16.msrb.mxu3 %v4591_v37  ;;  %v6284_v37 = vld [vmem:[%s6396_s25 + $0x5c4] sm:$0xf0]  ;;  %v4723_v40 = vor.u32 %v6283_v32, %v4722_v31  ;;  %v4727_v41 = vor.u32 %v6267_v33, %v4724_v35  ;;  %v4084_v31 = vld [vmem:[%s6396_s25 + $0xc0] sm:$0xf0]  ;;  %v6108_v35 = vld [vmem:[%s6396_s25 + $0x4c] sm:$0xf] }
  0x72   : > { %v4731_v42 = vor.u32 %v6284_v37, %v4730_v36  ;;  %v4090_v32 = vld [vmem:[%s6396_s25 + $0x48] sm:$0xf]  ;;  %v4092_v36 = vld [vmem:[%s6396_s25 + $0xc8] sm:$0xf0]  ;;  %v4866_v37 = vld [vmem:[%s6396_s25 + $0x650] sm:$0xf] }
  0x73   : > { %2008 = vmatpush.bf16.msrb.mxu0 %v4451_v43  ;;  %2021 = vmatpush.bf16.msrb.mxu1 %v4455_v44  ;;  %v4594_v43 = vld [vmem:[%s6396_s25 + $0x440] sm:$0xf] }
  0x74   : > { %2034 = vmatpush.bf16.msrb.mxu2 %v4459_v45  ;;  %v6251_v44 = vld [vmem:[%s6396_s25 + $0x4bc] sm:$0xf0]  ;;  %v6235_v45 = vld [vmem:[%s6396_s25 + $0x444] sm:$0xf] }
  0x75   : > { %2047 = vmatpush.bf16.msrb.mxu3 %v4463_v49  ;;  %v6252_v49 = vld [vmem:[%s6396_s25 + $0x4c4] sm:$0xf0]  ;;  %v4595_v53 = vor.u32 %v6251_v44, %v4594_v43  ;;  %v4599_v54 = vor.u32 %v6235_v45, %v4596_v47  ;;  %v6318_v43 = vld [vmem:[%s6396_s25 + $0x6d4] sm:$0xf0]  ;;  %v4876_v47 = vld [vmem:[%s6396_s25 + $0x6d8] sm:$0xf0] }
  0x76   : > { %v4603_v55 = vor.u32 %v6252_v49, %v4602_v48  ;;  %v4095_v48 = vor.u32 %v6108_v35, %v4092_v36  ;;  %v4867_v49 = vor.u32 %v6317_v38, %v4866_v37  ;;  %v4226_v36 = vld [vmem:[%s6396_s25 + $0x150] sm:$0xf]  ;;  %v6141_v38 = vld [vmem:[%s6396_s25 + $0x154] sm:$0xf] }
  0x77   : > { %2009 = vmatpush.bf16.msrb.mxu0 %v4323_v56  ;;  %2022 = vmatpush.bf16.msrb.mxu1 %v4327_v57  ;;  %v4466_v56 = vld [vmem:[%s6396_s25 + $0x340] sm:$0xf]  ;;  %v6157_v37 = vld [vmem:[%s6396_s25 + $0x1cc] sm:$0xf0] }
  0x78   : > { %2035 = vmatpush.bf16.msrb.mxu2 %v4331_v58  ;;  %v6219_v57 = vld [vmem:[%s6396_s25 + $0x3bc] sm:$0xf0]  ;;  %v6203_v58 = vld [vmem:[%s6396_s25 + $0x344] sm:$0xf] }
  0x79   : > { %2048 = vmatpush.bf16.msrb.mxu3 %v4335_v62  ;;  %v6220_v62 = vld [vmem:[%s6396_s25 + $0x3c4] sm:$0xf0]  ;;  %v4467_v1 = vor.u32 %v6219_v57, %v4466_v56  ;;  %v4471_v2 = vor.u32 %v6203_v58, %v4468_v60  ;;  %v4740_v57 = vld [vmem:[%s6396_s25 + $0x5d0] sm:$0xf0]  ;;  %v4746_v58 = vld [vmem:[%s6396_s25 + $0x558] sm:$0xf] }
  0x7a   : > { %v4475_v3 = vor.u32 %v6220_v62, %v4474_v61  ;;  %v6270_v60 = vld [vmem:[%s6396_s25 + $0x55c] sm:$0xf] }
  0x7b   : > { %2010 = vmatpush.bf16.msrb.mxu0 %v4195_v4  ;;  %2023 = vmatpush.bf16.msrb.mxu1 %v4199_v7  ;;  %v4338_v4 = vld [vmem:[%s6396_s25 + $0x240] sm:$0xf]  ;;  %v4479_v7 = vor.u32 %v6204_v63, %v4476_v0  ;;  %v4748_v61 = vld [vmem:[%s6396_s25 + $0x5d8] sm:$0xf0] }
  0x7c   : > { %2036 = vmatpush.bf16.msrb.mxu2 %v4203_v8  ;;  %v4340_v8 = vld [vmem:[%s6396_s25 + $0x2c0] sm:$0xf0]  ;;  %v4339_v13 = vor.u32 %v6187_v5, %v4338_v4  ;;  %v4751_v4 = vor.u32 %v6270_v60, %v4748_v61  ;;  %v4612_v5 = vld [vmem:[%s6396_s25 + $0x4d0] sm:$0xf0] }
  0x7d   : > { %2049 = vmatpush.bf16.msrb.mxu3 %v4207_v12  ;;  %v4348_v12 = vld [vmem:[%s6396_s25 + $0x2c8] sm:$0xf0]  ;;  %v4343_v14 = vor.u32 %v6171_v6, %v4340_v8  ;;  %v4618_v6 = vld [vmem:[%s6396_s25 + $0x458] sm:$0xf]  ;;  %v6238_v8 = vld [vmem:[%s6396_s25 + $0x45c] sm:$0xf] }
  0x7e   : > { %v4623_v16 = vor.u32 %v6238_v8, %v4620_v9  ;;  %v6303_v60 = vld [vmem:[%s6396_s25 + $0x664] sm:$0xf]  ;;  %v4754_v9 = vld [vmem:[%s6396_s25 + $0x560] sm:$0xf] }
  0x7f   : > { %2011 = vmatpush.bf16.msrb.mxu0 %v4067_v19  ;;  %2024 = vmatpush.bf16.msrb.mxu1 %v4071_v23  ;;  %v4351_v19 = vor.u32 %v6172_v11, %v4348_v12  ;;  %v6140_v23 = vld [vmem:[%s6396_s25 + $0x14c] sm:$0xf] }
  0x80   : > { %2037 = vmatpush.bf16.msrb.mxu2 %v4075_v24  ;;  %v4220_v24 = vld [vmem:[%s6396_s25 + $0x1c8] sm:$0xf0] }
  0x81   : > { %2050 = vmatpush.bf16.msrb.mxu3 %v4079_v27  ;;  %v6123_v27 = vld [vmem:[%s6396_s25 + $0xbc] sm:$0xf0]  ;;  %v4223_v33 = vor.u32 %v6140_v23, %v4220_v24 }
  0x82   : > { %4925 = vmatmul.msk.bf16.vlgmr.msrb.gmra.mxu1 %vm1844_vm0, %v6481_v52  ;;  %4924 = vmatmul.msk.bf16.vlgmr.msrb.gmra.mxu0 %vm1844_vm0, %v6481_v52 }
  0x83   : > { %2057 = vmatpush.bf16.msra.mxu0 %v4851_v28  ;;  %2070 = vmatpush.bf16.msra.mxu1 %v4855_v29  ;;  %v4215_v28 = vor.u32 %v6139_v18, %v4212_v20  ;;  %v4219_v29 = vor.u32 %v6156_v22, %v4218_v21  ;;  %v4490_v18 = vld [vmem:[%s6396_s25 + $0x358] sm:$0xf]  ;;  %v6206_v20 = vld [vmem:[%s6396_s25 + $0x35c] sm:$0xf] }
  0x84   : > { %2083 = vmatpush.bf16.msra.mxu2 %v4859_v30  ;;  %4927 = vmatmul.msk.bf16.vlgmr.msrb.gmra.mxu3 %vm1844_vm0, %v6481_v52  ;;  %v6107_v30 = vld [vmem:[%s6396_s25 + $0x44] sm:$0xf]  ;;  %v4492_v21 = vld [vmem:[%s6396_s25 + $0x3d8] sm:$0xf0] }
  0x85   : > { %2096 = vmatpush.bf16.msra.mxu3 %v4863_v34  ;;  %4926 = vmatmul.msk.bf16.vlgmr.msrb.gmra.mxu2 %vm1844_vm0, %v6481_v52  ;;  %v6124_v34 = vld [vmem:[%s6396_s25 + $0xc4] sm:$0xf0]  ;;  %v4087_v44 = vor.u32 %v6107_v30, %v4084_v31  ;;  %v6190_v30 = vld [vmem:[%s6396_s25 + $0x2d4] sm:$0xf0]  ;;  %v6174_v31 = vld [vmem:[%s6396_s25 + $0x25c] sm:$0xf] }
  0x86   : > { %v4091_v45 = vor.u32 %v6124_v34, %v4090_v32  ;;  %v4364_v32 = vld [vmem:[%s6396_s25 + $0x2d8] sm:$0xf0] }
  0x87   : > { %2058 = vmatpush.bf16.msra.mxu0 %v4723_v40  ;;  %2071 = vmatpush.bf16.msra.mxu1 %v4727_v41  ;;  %v4083_v40 = vor.u32 %v6123_v27, %v4082_v26  ;;  %v4868_v41 = vld [vmem:[%s6396_s25 + $0x6d0] sm:$0xf0]  ;;  %v6189_v26 = vld [vmem:[%s6396_s25 + $0x2cc] sm:$0xf0] }
  0x88   : > { %2084 = vmatpush.bf16.msra.mxu2 %v4731_v42  ;;  %v4874_v42 = vld [vmem:[%s6396_s25 + $0x658] sm:$0xf]  ;;  %v4871_v50 = vor.u32 %v6301_v39, %v4868_v41  ;;  %v6173_v27 = vld [vmem:[%s6396_s25 + $0x254] sm:$0xf]  ;;  %v4367_v39 = vor.u32 %v6174_v31, %v4364_v32  ;;  %v4636_v31 = vld [vmem:[%s6396_s25 + $0x4e8] sm:$0xf0] }
  0x89   : > { %2097 = vmatpush.bf16.msra.mxu3 %v4735_v46  ;;  %v6302_v46 = vld [vmem:[%s6396_s25 + $0x65c] sm:$0xf]  ;;  %v4875_v51 = vor.u32 %v6318_v43, %v4874_v42  ;;  %v4234_v41 = vld [vmem:[%s6396_s25 + $0x158] sm:$0xf] }
  0x8a   : > { %v4879_v56 = vor.u32 %v6302_v46, %v4876_v47  ;;  %v6158_v42 = vld [vmem:[%s6396_s25 + $0x1d4] sm:$0xf0]  ;;  %v6142_v43 = vld [vmem:[%s6396_s25 + $0x15c] sm:$0xf]  ;;  %v4098_v46 = vld [vmem:[%s6396_s25 + $0x50] sm:$0xf] }
  0x8b   : > { %2059 = vmatpush.bf16.msra.mxu0 %v4595_v53  ;;  %2072 = vmatpush.bf16.msra.mxu1 %v4599_v54  ;;  %v4738_v53 = vld [vmem:[%s6396_s25 + $0x550] sm:$0xf] }
  0x8c   : > { %2085 = vmatpush.bf16.msra.mxu2 %v4603_v55  ;;  %v6285_v54 = vld [vmem:[%s6396_s25 + $0x5cc] sm:$0xf0]  ;;  %v6269_v55 = vld [vmem:[%s6396_s25 + $0x554] sm:$0xf] }
  0x8d   : > { %2098 = vmatpush.bf16.msra.mxu3 %v4607_v59  ;;  %v6286_v59 = vld [vmem:[%s6396_s25 + $0x5d4] sm:$0xf0]  ;;  %v4739_v62 = vor.u32 %v6285_v54, %v4738_v53  ;;  %v4743_v63 = vor.u32 %v6269_v55, %v4740_v57  ;;  %v6125_v47 = vld [vmem:[%s6396_s25 + $0xcc] sm:$0xf0]  ;;  %v4108_v57 = vld [vmem:[%s6396_s25 + $0xd8] sm:$0xf0] }
  0x8e   : > { %v4747_v0 = vor.u32 %v6286_v59, %v4746_v58  ;;  %v4106_v53 = vld [vmem:[%s6396_s25 + $0x58] sm:$0xf]  ;;  %v4882_v58 = vld [vmem:[%s6396_s25 + $0x660] sm:$0xf]  ;;  %v4099_v61 = vor.u32 %v6125_v47, %v4098_v46 }
  0x8f   : > { %2060 = vmatpush.bf16.msra.mxu0 %v4467_v1  ;;  %2073 = vmatpush.bf16.msra.mxu1 %v4471_v2  ;;  %v4610_v1 = vld [vmem:[%s6396_s25 + $0x450] sm:$0xf]  ;;  %v6126_v55 = vld [vmem:[%s6396_s25 + $0xd4] sm:$0xf0]  ;;  %v6319_v59 = vld [vmem:[%s6396_s25 + $0x6dc] sm:$0xf0] }
  0x90   : > { %2086 = vmatpush.bf16.msra.mxu2 %v4475_v3  ;;  %v6253_v2 = vld [vmem:[%s6396_s25 + $0x4cc] sm:$0xf0]  ;;  %v6237_v3 = vld [vmem:[%s6396_s25 + $0x454] sm:$0xf] }
  0x91   : > { %2099 = vmatpush.bf16.msra.mxu3 %v4479_v7  ;;  %v6254_v7 = vld [vmem:[%s6396_s25 + $0x4d4] sm:$0xf0]  ;;  %v4611_v10 = vor.u32 %v6253_v2, %v4610_v1  ;;  %v4615_v11 = vor.u32 %v6237_v3, %v4612_v5  ;;  %v4107_v2 = vor.u32 %v6126_v55, %v4106_v53  ;;  %v6304_v3 = vld [vmem:[%s6396_s25 + $0x66c] sm:$0xf]  ;;  %v4372_v55 = vld [vmem:[%s6396_s25 + $0x2e0] sm:$0xf0] }
  0x92   : > { %v4619_v12 = vor.u32 %v6254_v7, %v4618_v6  ;;  %v4883_v6 = vor.u32 %v6319_v59, %v4882_v58  ;;  %v6176_v59 = vld [vmem:[%s6396_s25 + $0x26c] sm:$0xf] }
  0x93   : > { %2061 = vmatpush.bf16.msra.mxu0 %v4339_v13  ;;  %2074 = vmatpush.bf16.msra.mxu1 %v4343_v14  ;;  %v4482_v13 = vld [vmem:[%s6396_s25 + $0x350] sm:$0xf] }
  0x94   : > { %2087 = vmatpush.bf16.msra.mxu2 %v4347_v15  ;;  %v6221_v14 = vld [vmem:[%s6396_s25 + $0x3cc] sm:$0xf0]  ;;  %v6205_v15 = vld [vmem:[%s6396_s25 + $0x354] sm:$0xf] }
  0x95   : > { %2100 = vmatpush.bf16.msra.mxu3 %v4351_v19  ;;  %v6222_v19 = vld [vmem:[%s6396_s25 + $0x3d4] sm:$0xf0]  ;;  %v4483_v22 = vor.u32 %v6221_v14, %v4482_v13  ;;  %v4487_v23 = vor.u32 %v6205_v15, %v4484_v17  ;;  %v4756_v13 = vld [vmem:[%s6396_s25 + $0x5e0] sm:$0xf0]  ;;  %v4762_v14 = vld [vmem:[%s6396_s25 + $0x568] sm:$0xf] }
  0x96   : > { %v4491_v24 = vor.u32 %v6222_v19, %v4490_v18  ;;  %v6288_v15 = vld [vmem:[%s6396_s25 + $0x5e4] sm:$0xf0]  ;;  %v4764_v17 = vld [vmem:[%s6396_s25 + $0x5e8] sm:$0xf0] }
  0x97   : > { %2062 = vmatpush.bf16.msra.mxu0 %v4211_v25  ;;  %2075 = vmatpush.bf16.msra.mxu1 %v4215_v28  ;;  %v4354_v25 = vld [vmem:[%s6396_s25 + $0x250] sm:$0xf]  ;;  %v4495_v28 = vor.u32 %v6206_v20, %v4492_v21  ;;  %v4763_v20 = vor.u32 %v6288_v15, %v4762_v14  ;;  %v4626_v21 = vld [vmem:[%s6396_s25 + $0x460] sm:$0xf] }
  0x98   : > { %2088 = vmatpush.bf16.msra.mxu2 %v4219_v29  ;;  %v4362_v29 = vld [vmem:[%s6396_s25 + $0x258] sm:$0xf] }
  0x99   : > { %2101 = vmatpush.bf16.msra.mxu3 %v4223_v33  ;;  %v4355_v33 = vor.u32 %v6189_v26, %v4354_v25  ;;  %v4363_v35 = vor.u32 %v6190_v30, %v4362_v29  ;;  %v4628_v26 = vld [vmem:[%s6396_s25 + $0x4e0] sm:$0xf0]  ;;  %v6240_v30 = vld [vmem:[%s6396_s25 + $0x46c] sm:$0xf] }
  0x9b   : > { %2063 = vmatpush.bf16.msra.mxu0 %v4083_v40  ;;  %2076 = vmatpush.bf16.msra.mxu1 %v4087_v44  ;;  %v4228_v40 = vld [vmem:[%s6396_s25 + $0x1d0] sm:$0xf0]  ;;  %v4236_v44 = vld [vmem:[%s6396_s25 + $0x1d8] sm:$0xf0] }
  0x9c   : > { %2089 = vmatpush.bf16.msra.mxu2 %v4091_v45  ;;  %v4227_v45 = vor.u32 %v6157_v37, %v4226_v36  ;;  %v4239_v54 = vor.u32 %v6142_v43, %v4236_v44  ;;  %v6223_v36 = vld [vmem:[%s6396_s25 + $0x3dc] sm:$0xf0]  ;;  %v6207_v37 = vld [vmem:[%s6396_s25 + $0x364] sm:$0xf]  ;;  %v6208_v43 = vld [vmem:[%s6396_s25 + $0x36c] sm:$0xf] }
  0x9d   : > { %2102 = vmatpush.bf16.msra.mxu3 %v4095_v48  ;;  %v4231_v48 = vor.u32 %v6141_v38, %v4228_v40  ;;  %v4500_v40 = vld [vmem:[%s6396_s25 + $0x3e0] sm:$0xf0]  ;;  %v4508_v44 = vld [vmem:[%s6396_s25 + $0x3e8] sm:$0xf0] }
  0x9e   : > { %4929 = vmatmul.msk.bf16.vlgmr.msra.gmra.mxu1 %vm1844_vm0, %v6481_v52  ;;  %4928 = vmatmul.msk.bf16.vlgmr.msra.gmra.mxu0 %vm1844_vm0, %v6481_v52  ;;  %v4503_v47 = vor.u32 %v6207_v37, %v4500_v40 }
  0x9f   : > { %2109 = vmatpush.bf16.msrb.mxu0 %v4867_v49  ;;  %2122 = vmatpush.bf16.msrb.mxu1 %v4871_v50  ;;  %v4235_v49 = vor.u32 %v6158_v42, %v4234_v41  ;;  %v6109_v50 = vld [vmem:[%s6396_s25 + $0x54] sm:$0xf]  ;;  %v4506_v41 = vld [vmem:[%s6396_s25 + $0x368] sm:$0xf] }
  0xa0   : > { %2135 = vmatpush.bf16.msrb.mxu2 %v4875_v51  ;;  %4931 = vmatmul.msk.bf16.vlgmr.msra.gmra.mxu3 %vm1844_vm0, %v6481_v52  ;;  %v4100_v51 = vld [vmem:[%s6396_s25 + $0xd0] sm:$0xf0]  ;;  %v6224_v42 = vld [vmem:[%s6396_s25 + $0x3e4] sm:$0xf0] }
  0xa1   : > { %2148 = vmatpush.bf16.msrb.mxu3 %v4879_v56  ;;  %4930 = vmatmul.msk.bf16.vlgmr.msra.gmra.mxu2 %vm1844_vm0, %v6481_v52  ;;  %v4356_v52 = vld [vmem:[%s6396_s25 + $0x2d0] sm:$0xf0]  ;;  %v6110_v56 = vld [vmem:[%s6396_s25 + $0x5c] sm:$0xf]  ;;  %v4103_v1 = vor.u32 %v6109_v50, %v4100_v51  ;;  %v6191_v50 = vld [vmem:[%s6396_s25 + $0x2dc] sm:$0xf0] }
  0xa2   : > { %v4359_v34 = vor.u32 %v6173_v27, %v4356_v52  ;;  %v4111_v5 = vor.u32 %v6110_v56, %v4108_v57  ;;  %v4634_v27 = vld [vmem:[%s6396_s25 + $0x468] sm:$0xf]  ;;  %v6806_v52 = vld [vmem:[%s7626_s3] sm:$0x1]  ;;  %v6175_v51 = vld [vmem:[%s6396_s25 + $0x264] sm:$0xf] }
  0xa3   : > { %2110 = vmatpush.bf16.msrb.mxu0 %v4739_v62  ;;  %2123 = vmatpush.bf16.msrb.mxu1 %v4743_v63  ;;  %v4884_v62 = vld [vmem:[%s6396_s25 + $0x6e0] sm:$0xf0]  ;;  %v4890_v63 = vld [vmem:[%s6396_s25 + $0x668] sm:$0xf] }
  0xa4   : > { %2136 = vmatpush.bf16.msrb.mxu2 %v4747_v0  ;;  %v6320_v0 = vld [vmem:[%s6396_s25 + $0x6e4] sm:$0xf0]  ;;  %v4887_v7 = vor.u32 %v6303_v60, %v4884_v62  ;;  %v4380_v60 = vld [vmem:[%s6396_s25 + $0x2e8] sm:$0xf0]  ;;  %v4375_v62 = vor.u32 %v6175_v51, %v4372_v55  ;;  %v4780_v51 = vld [vmem:[%s6396_s25 + $0x5f8] sm:$0xf0] }
  0xa5   : > { %2149 = vmatpush.bf16.msrb.mxu3 %v4751_v4  ;;  %v4892_v4 = vld [vmem:[%s6396_s25 + $0x6e8] sm:$0xf0]  ;;  %v4891_v8 = vor.u32 %v6320_v0, %v4890_v63  ;;  %v4378_v56 = vld [vmem:[%s6396_s25 + $0x268] sm:$0xf]  ;;  %v4242_v0 = vld [vmem:[%s6396_s25 + $0x160] sm:$0xf] }
  0xa6   : > { %v6192_v57 = vld [vmem:[%s6396_s25 + $0x2e4] sm:$0xf0] }
  0xa7   : > { %2111 = vmatpush.bf16.msrb.mxu0 %v4611_v10  ;;  %2124 = vmatpush.bf16.msrb.mxu1 %v4615_v11  ;;  %v6287_v10 = vld [vmem:[%s6396_s25 + $0x5dc] sm:$0xf0]  ;;  %v6271_v11 = vld [vmem:[%s6396_s25 + $0x564] sm:$0xf]  ;;  %v4379_v63 = vor.u32 %v6192_v57, %v4378_v56  ;;  %v4642_v56 = vld [vmem:[%s6396_s25 + $0x470] sm:$0xf] }
  0xa8   : > { %2137 = vmatpush.bf16.msrb.mxu2 %v4619_v12  ;;  %v4895_v12 = vor.u32 %v6304_v3, %v4892_v4  ;;  %v4755_v18 = vor.u32 %v6287_v10, %v4754_v9  ;;  %v4759_v19 = vor.u32 %v6271_v11, %v4756_v13  ;;  %v4383_v4 = vor.u32 %v6176_v59, %v4380_v60  ;;  %v4252_v9 = vld [vmem:[%s6396_s25 + $0x1e8] sm:$0xf0]  ;;  %v4114_v11 = vld [vmem:[%s6396_s25 + $0x60] sm:$0xf]  ;;  %v6257_v57 = vld [vmem:[%s6396_s25 + $0x4ec] sm:$0xf0] }
  0xa9   : > { %2150 = vmatpush.bf16.msrb.mxu3 %v4623_v16  ;;  %v6272_v16 = vld [vmem:[%s6396_s25 + $0x56c] sm:$0xf] }
  0xaa   : > { %v4767_v25 = vor.u32 %v6272_v16, %v4764_v17  ;;  %v6111_v16 = vld [vmem:[%s6396_s25 + $0x64] sm:$0xf] }
  0xab   : > { %2112 = vmatpush.bf16.msrb.mxu0 %v4483_v22  ;;  %2125 = vmatpush.bf16.msrb.mxu1 %v4487_v23  ;;  %v6255_v22 = vld [vmem:[%s6396_s25 + $0x4dc] sm:$0xf0]  ;;  %v6239_v23 = vld [vmem:[%s6396_s25 + $0x464] sm:$0xf]  ;;  %v6810_v29 = vpop.f32.mrf.mxu0 }
  0xac   : > { %2138 = vmatpush.bf16.msrb.mxu2 %v4491_v24  ;;  %v6798_v24 = vpop.f32.mrf.mxu1  ;;  %v4627_v32 = vor.u32 %v6255_v22, %v4626_v21  ;;  %v4116_v17 = vld [vmem:[%s6396_s25 + $0xe0] sm:$0xf0]  ;;  %v6112_v21 = vld [vmem:[%s6396_s25 + $0x6c] sm:$0xf] }
  0xad   : > { %2151 = vmatpush.bf16.msrb.mxu3 %v4495_v28  ;;  %v6256_v28 = vld [vmem:[%s6396_s25 + $0x4e4] sm:$0xf0]  ;;  %v4124_v22 = vld [vmem:[%s6396_s25 + $0xe8] sm:$0xf0] }
  0xaf   : > { %2113 = vmatpush.bf16.msrb.mxu0 %v4355_v33  ;;  %2126 = vmatpush.bf16.msrb.mxu1 %v4359_v34  ;;  %v4631_v33 = vor.u32 %v6239_v23, %v4628_v26  ;;  %v4635_v34 = vor.u32 %v6256_v28, %v4634_v27  ;;  %v4898_v23 = vld [vmem:[%s6396_s25 + $0x670] sm:$0xf]  ;;  %v6305_v26 = vld [vmem:[%s6396_s25 + $0x674] sm:$0xf] }
  0xb0   : > { %2139 = vmatpush.bf16.msrb.mxu2 %v4363_v35  ;;  %v4498_v35 = vld [vmem:[%s6396_s25 + $0x360] sm:$0xf]  ;;  %v4900_v28 = vld [vmem:[%s6396_s25 + $0x6f0] sm:$0xf0] }
  0xb1   : > { %2152 = vmatpush.bf16.msrb.mxu3 %v4367_v39  ;;  %v4639_v39 = vor.u32 %v6240_v30, %v4636_v31  ;;  %v4906_v30 = vld [vmem:[%s6396_s25 + $0x678] sm:$0xf] }
  0xb2   : > { %v6322_v31 = vld [vmem:[%s6396_s25 + $0x6f4] sm:$0xf0] }
  0xb3   : > { %2114 = vmatpush.bf16.msrb.mxu0 %v4227_v45  ;;  %2127 = vmatpush.bf16.msrb.mxu1 %v4231_v48  ;;  %v4499_v45 = vor.u32 %v6223_v36, %v4498_v35  ;;  %v6830_v46 = vpop.f32.mrf.mxu3  ;;  %v4507_v48 = vor.u32 %v6224_v42, %v4506_v41  ;;  %v1859_v58 = vpop.f32.mrf.mxu0  ;;  %v4908_v35 = vld [vmem:[%s6396_s25 + $0x6f8] sm:$0xf0]  ;;  %v4127_v36 = vor.u32 %v6112_v21, %v4124_v22  ;;  %v4770_v41 = vld [vmem:[%s6396_s25 + $0x570] sm:$0xf]  ;;  %v6177_v22 = vld [vmem:[%s6396_s25 + $0x274] sm:$0xf] }
  0xb4   : > { %2140 = vmatpush.bf16.msrb.mxu2 %v4235_v49  ;;  %v6821_v38 = vpop.f32.mrf.mxu2  ;;  %v4370_v49 = vld [vmem:[%s6396_s25 + $0x260] sm:$0xf]  ;;  %v1872_v53 = vpop.f32.mrf.mxu1  ;;  %v4907_v40 = vor.u32 %v6322_v31, %v4906_v30  ;;  %v6289_v42 = vld [vmem:[%s6396_s25 + $0x5ec] sm:$0xf0]  ;;  %v6241_v58 = vld [vmem:[%s6396_s25 + $0x474] sm:$0xf] }
  0xb5   : > { %2153 = vmatpush.bf16.msrb.mxu3 %v4239_v54  ;;  %v4511_v54 = vor.u32 %v6208_v43, %v4508_v44  ;;  %v6273_v43 = vld [vmem:[%s6396_s25 + $0x574] sm:$0xf]  ;;  %v4771_v53 = vor.u32 %v6289_v42, %v4770_v41  ;;  %v6193_v21 = vld [vmem:[%s6396_s25 + $0x2ec] sm:$0xf0]  ;;  %v6178_v30 = vld [vmem:[%s6396_s25 + $0x27c] sm:$0xf] }
  0xb6   : > { %v4396_v31 = vld [vmem:[%s6396_s25 + $0x2f8] sm:$0xf0]  ;;  %v4260_v42 = vld [vmem:[%s6396_s25 + $0x1f0] sm:$0xf0] }
  0xb7   : > { %2115 = vmatpush.bf16.msrb.mxu0 %v4099_v61  ;;  %2128 = vmatpush.bf16.msrb.mxu1 %v4103_v1  ;;  %v4371_v61 = vor.u32 %v6191_v50, %v4370_v49  ;;  %v6159_v1 = vld [vmem:[%s6396_s25 + $0x1dc] sm:$0xf0]  ;;  %v6274_v50 = vld [vmem:[%s6396_s25 + $0x57c] sm:$0xf]  ;;  %v4399_v41 = vor.u32 %v6178_v30, %v4396_v31 }
  0xb8   : > { %2141 = vmatpush.bf16.msrb.mxu2 %v4107_v2  ;;  %v6143_v2 = vld [vmem:[%s6396_s25 + $0x164] sm:$0xf]  ;;  %v4243_v10 = vor.u32 %v6159_v1, %v4242_v0  ;;  %v4783_v60 = vor.u32 %v6274_v50, %v4780_v51  ;;  %v6242_v0 = vld [vmem:[%s6396_s25 + $0x47c] sm:$0xf]  ;;  %v4130_v50 = vld [vmem:[%s6396_s25 + $0x70] sm:$0xf] }
  0xb9   : > { %2154 = vmatpush.bf16.msrb.mxu3 %v4111_v5  ;;  %v4244_v5 = vld [vmem:[%s6396_s25 + $0x1e0] sm:$0xf0]  ;;  %v4652_v1 = vld [vmem:[%s6396_s25 + $0x4f8] sm:$0xf0]  ;;  %v6129_v51 = vld [vmem:[%s6396_s25 + $0xec] sm:$0xf0] }
  0xba   : > { %4933 = vmatmul.msk.bf16.vlgmr.msrb.gmra.mxu1 %vm1844_vm0, %v6806_v52  ;;  %4932 = vmatmul.msk.bf16.vlgmr.msrb.gmra.mxu0 %vm1844_vm0, %v6806_v52  ;;  %v4247_v14 = vor.u32 %v6143_v2, %v4244_v5  ;;  %v5458_v31 = vld [vmem:[%s6925_s8 + $0x400] sm:$0xf] }
  0xbb   : > { %2161 = vmatpush.bf16.msra.mxu0 %v4883_v6  ;;  %2174 = vmatpush.bf16.msra.mxu1 %v4887_v7  ;;  %v4250_v6 = vld [vmem:[%s6396_s25 + $0x168] sm:$0xf]  ;;  %v1898_v13 = vpop.f32.mrf.mxu3 }
  0xbc   : > { %2187 = vmatpush.bf16.msra.mxu2 %v4891_v8  ;;  %4935 = vmatmul.msk.bf16.vlgmr.msrb.gmra.mxu3 %vm1844_vm0, %v6806_v52  ;;  %v1885_v3 = vpop.f32.mrf.mxu2  ;;  %v6160_v7 = vld [vmem:[%s6396_s25 + $0x1e4] sm:$0xf0]  ;;  %v6144_v8 = vld [vmem:[%s6396_s25 + $0x16c] sm:$0xf]  ;;  %v6226_v13 = vld [vmem:[%s6396_s25 + $0x3f4] sm:$0xf0] }
  0xbd   : > { %2200 = vmatpush.bf16.msra.mxu3 %v4895_v12  ;;  %4934 = vmatmul.msk.bf16.vlgmr.msrb.gmra.mxu2 %vm1844_vm0, %v6806_v52  ;;  %v6127_v12 = vld [vmem:[%s6396_s25 + $0xdc] sm:$0xf0]  ;;  %v4251_v15 = vor.u32 %v6160_v7, %v4250_v6  ;;  %v4643_v3 = vor.u32 %v6257_v57, %v4642_v56  ;;  %v4514_v7 = vld [vmem:[%s6396_s25 + $0x370] sm:$0xf]  ;;  %v4132_v56 = vld [vmem:[%s6396_s25 + $0xf0] sm:$0xf0] }
  0xbe   : > { %v4115_v27 = vor.u32 %v6127_v12, %v4114_v11  ;;  %v4516_v11 = vld [vmem:[%s6396_s25 + $0x3f0] sm:$0xf0]  ;;  %v4522_v12 = vld [vmem:[%s6396_s25 + $0x378] sm:$0xf] }
  0xbf   : > { %2162 = vmatpush.bf16.msra.mxu0 %v4755_v18  ;;  %2175 = vmatpush.bf16.msra.mxu1 %v4759_v19  ;;  %v4122_v18 = vld [vmem:[%s6396_s25 + $0x68] sm:$0xf]  ;;  %v4255_v19 = vor.u32 %v6144_v8, %v4252_v9  ;;  %v6225_v8 = vld [vmem:[%s6396_s25 + $0x3ec] sm:$0xf0]  ;;  %v6209_v9 = vld [vmem:[%s6396_s25 + $0x374] sm:$0xf] }
  0xc0   : > { %2188 = vmatpush.bf16.msra.mxu2 %v4763_v20  ;;  %v6128_v20 = vld [vmem:[%s6396_s25 + $0xe4] sm:$0xf0]  ;;  %v4138_v57 = vld [vmem:[%s6396_s25 + $0x78] sm:$0xf] }
  0xc1   : > { %2201 = vmatpush.bf16.msra.mxu3 %v4767_v25  ;;  %v6321_v25 = vld [vmem:[%s6396_s25 + $0x6ec] sm:$0xf0] }
  0xc2   : > { %v4899_v37 = vor.u32 %v6321_v25, %v4898_v23 }
  0xc3   : > { %2163 = vmatpush.bf16.msra.mxu0 %v4627_v32  ;;  %2176 = vmatpush.bf16.msra.mxu1 %v4631_v33  ;;  %v4119_v32 = vor.u32 %v6111_v16, %v4116_v17  ;;  %v4123_v33 = vor.u32 %v6128_v20, %v4122_v18  ;;  %v4524_v16 = vld [vmem:[%s6396_s25 + $0x3f8] sm:$0xf0]  ;;  %v4515_v17 = vor.u32 %v6225_v8, %v4514_v7  ;;  %v4386_v20 = vld [vmem:[%s6396_s25 + $0x270] sm:$0xf]  ;;  %v6084_v7 = vld [vmem:[%s6925_s8 + $0x684] sm:$0xf0] }
  0xc4   : > { %2189 = vmatpush.bf16.msra.mxu2 %v4635_v34  ;;  %v6306_v34 = vld [vmem:[%s6396_s25 + $0x67c] sm:$0xf]  ;;  %v4519_v18 = vor.u32 %v6209_v9, %v4516_v11  ;;  %v5724_v11 = vld [vmem:[%s6925_s8 + $0x688] sm:$0xf0] }
  0xc5   : > { %2202 = vmatpush.bf16.msra.mxu3 %v4639_v39  ;;  %v4903_v39 = vor.u32 %v6305_v26, %v4900_v28  ;;  %v4911_v44 = vor.u32 %v6306_v34, %v4908_v35  ;;  %v4388_v26 = vld [vmem:[%s6396_s25 + $0x2f0] sm:$0xf0]  ;;  %v6194_v28 = vld [vmem:[%s6396_s25 + $0x2f4] sm:$0xf0] }
  0xc6   : > { %v4391_v35 = vor.u32 %v6177_v22, %v4388_v26  ;;  %v6052_v22 = vld [vmem:[%s6925_s8 + $0x584] sm:$0xf0]  ;;  %v5596_v26 = vld [vmem:[%s6925_s8 + $0x588] sm:$0xf0] }
  0xc7   : > { %2164 = vmatpush.bf16.msra.mxu0 %v4499_v45  ;;  %2177 = vmatpush.bf16.msra.mxu1 %v4503_v47  ;;  %v4772_v45 = vld [vmem:[%s6396_s25 + $0x5f0] sm:$0xf0]  ;;  %v4778_v47 = vld [vmem:[%s6396_s25 + $0x578] sm:$0xf]  ;;  %v6870_v49 = vpop.f32.mrf.mxu1  ;;  %v6877_v59 = vpop.f32.mrf.mxu0 }
  0xc8   : > { %2190 = vmatpush.bf16.msra.mxu2 %v4507_v48  ;;  %v6290_v48 = vld [vmem:[%s6396_s25 + $0x5f4] sm:$0xf0] }
  0xc9   : > { %2203 = vmatpush.bf16.msra.mxu3 %v4511_v54  ;;  %v4775_v54 = vor.u32 %v6273_v43, %v4772_v45  ;;  %v4779_v55 = vor.u32 %v6290_v48, %v4778_v47  ;;  %v4266_v43 = vld [vmem:[%s6396_s25 + $0x178] sm:$0xf]  ;;  %v6146_v45 = vld [vmem:[%s6396_s25 + $0x17c] sm:$0xf] }
  0xca   : > { %v4268_v47 = vld [vmem:[%s6396_s25 + $0x1f8] sm:$0xf0] }
  0xcb   : > { %2165 = vmatpush.bf16.msra.mxu0 %v4371_v61  ;;  %2178 = vmatpush.bf16.msra.mxu1 %v4375_v62  ;;  %v4644_v61 = vld [vmem:[%s6396_s25 + $0x4f0] sm:$0xf0]  ;;  %v4650_v62 = vld [vmem:[%s6396_s25 + $0x478] sm:$0xf] }
  0xcc   : > { %2191 = vmatpush.bf16.msra.mxu2 %v4379_v63  ;;  %v6258_v63 = vld [vmem:[%s6396_s25 + $0x4f4] sm:$0xf0]  ;;  %v4647_v5 = vor.u32 %v6241_v58, %v4644_v61  ;;  %v4271_v58 = vor.u32 %v6146_v45, %v4268_v47  ;;  %v6114_v61 = vld [vmem:[%s6396_s25 + $0x7c] sm:$0xf] }
  0xcd   : > { %2204 = vmatpush.bf16.msra.mxu3 %v4383_v4  ;;  %v4651_v6 = vor.u32 %v6258_v63, %v4650_v62  ;;  %v4140_v62 = vld [vmem:[%s6396_s25 + $0xf8] sm:$0xf0]  ;;  %v5714_v63 = vld [vmem:[%s6925_s8 + $0x600] sm:$0xf] }
  0xcf   : > { %2166 = vmatpush.bf16.msra.mxu0 %v4243_v10  ;;  %2179 = vmatpush.bf16.msra.mxu1 %v4247_v14  ;;  %v6894_v4 = vpop.f32.mrf.mxu3  ;;  %v4655_v10 = vor.u32 %v6242_v0, %v4652_v1  ;;  %v1924_v14 = vpop.f32.mrf.mxu1  ;;  %v6083_v0 = vld [vmem:[%s6925_s8 + $0x67c] sm:$0xf0]  ;;  %v6067_v1 = vld [vmem:[%s6925_s8 + $0x604] sm:$0xf] }
  0xd0   : > { %2192 = vmatpush.bf16.msra.mxu2 %v4251_v15  ;;  %v6890_v2 = vpop.f32.mrf.mxu2  ;;  %v6210_v15 = vld [vmem:[%s6396_s25 + $0x37c] sm:$0xf]  ;;  %v1911_v23 = vpop.f32.mrf.mxu0 }
  0xd1   : > { %2205 = vmatpush.bf16.msra.mxu3 %v4255_v19  ;;  %v4523_v19 = vor.u32 %v6226_v13, %v4522_v12  ;;  %v4527_v25 = vor.u32 %v6210_v15, %v4524_v16  ;;  %v4143_v12 = vor.u32 %v6114_v61, %v4140_v62  ;;  %v5715_v13 = vor.u32 %v6083_v0, %v5714_v63  ;;  %v5586_v16 = vld [vmem:[%s6925_s8 + $0x500] sm:$0xf] }
  0xd2   : > { %v3803_v61 = vld [vmem:[%s7627_s4] sm:$0x3] }
  0xd3   : > { %2167 = vmatpush.bf16.msra.mxu0 %v4115_v27  ;;  %2180 = vmatpush.bf16.msra.mxu1 %v4119_v32  ;;  %v4394_v27 = vld [vmem:[%s6396_s25 + $0x278] sm:$0xf]  ;;  %v5202_v0 = vld [vmem:[%s6925_s8 + $0x200] sm:$0xf] }
  0xd4   : > { %2193 = vmatpush.bf16.msra.mxu2 %v4123_v33  ;;  %v4387_v33 = vor.u32 %v6193_v21, %v4386_v20  ;;  %v5588_v20 = vld [vmem:[%s6925_s8 + $0x580] sm:$0xf0]  ;;  %v5594_v21 = vld [vmem:[%s6925_s8 + $0x508] sm:$0xf] }
  0xd5   : > { %2206 = vmatpush.bf16.msra.mxu3 %v4127_v36  ;;  %v4395_v36 = vor.u32 %v6194_v28, %v4394_v27  ;;  %v5595_v30 = vor.u32 %v6052_v22, %v5594_v21  ;;  %v5076_v22 = vld [vmem:[%s6925_s8 + $0x180] sm:$0xf0] }
  0xd6   : > { %4936 = vmatmul.msk.bf16.vlgmr.msra.gmra.mxu0 %vm1844_vm0, %v6806_v52  ;;  %4937 = vmatmul.msk.bf16.vlgmr.msra.gmra.mxu1 %vm1844_vm0, %v6806_v52 }
  0xd7   : > { %2213 = vmatpush.bf16.msrb.mxu0 %v4899_v37  ;;  %2226 = vmatpush.bf16.msrb.mxu1 %v4903_v39  ;;  %v1950_v34 = vpop.f32.mrf.mxu3  ;;  %v4258_v37 = vld [vmem:[%s6396_s25 + $0x170] sm:$0xf] }
  0xd8   : > { %2239 = vmatpush.bf16.msrb.mxu2 %v4907_v40  ;;  %4939 = vmatmul.msk.bf16.vlgmr.msra.gmra.mxu3 %vm1844_vm0, %v6806_v52  ;;  %v1937_v32 = vpop.f32.mrf.mxu2  ;;  %v6161_v39 = vld [vmem:[%s6396_s25 + $0x1ec] sm:$0xf0]  ;;  %v6145_v40 = vld [vmem:[%s6396_s25 + $0x174] sm:$0xf] }
  0xd9   : > { %2252 = vmatpush.bf16.msrb.mxu3 %v4911_v44  ;;  %4938 = vmatmul.msk.bf16.vlgmr.msra.gmra.mxu2 %vm1844_vm0, %v6806_v52  ;;  %v6162_v44 = vld [vmem:[%s6396_s25 + $0x1f4] sm:$0xf0]  ;;  %v4259_v48 = vor.u32 %v6161_v39, %v4258_v37  ;;  %v6019_v32 = vld [vmem:[%s6925_s8 + $0x47c] sm:$0xf0]  ;;  %v5466_v37 = vld [vmem:[%s6925_s8 + $0x408] sm:$0xf] }
  0xda   : > { %v6020_v39 = vld [vmem:[%s6925_s8 + $0x484] sm:$0xf0] }
  0xdb   : > { %2214 = vmatpush.bf16.msrb.mxu0 %v4771_v53  ;;  %2227 = vmatpush.bf16.msrb.mxu1 %v4775_v54  ;;  %v4263_v53 = vor.u32 %v6145_v40, %v4260_v42  ;;  %v4267_v54 = vor.u32 %v6162_v44, %v4266_v43  ;;  %v6004_v40 = vld [vmem:[%s6925_s8 + $0x40c] sm:$0xf]  ;;  %v5459_v43 = vor.u32 %v6019_v32, %v5458_v31  ;;  %v4946_v31 = vld [vmem:[%s6925_s8] sm:$0xf] }
  0xdc   : > { %2240 = vmatpush.bf16.msrb.mxu2 %v4779_v55  ;;  %v6113_v55 = vld [vmem:[%s6396_s25 + $0x74] sm:$0xf]  ;;  %v5467_v47 = vor.u32 %v6020_v39, %v5466_v37  ;;  %v5891_v32 = vld [vmem:[%s6925_s8 + $0x7c] sm:$0xf0]  ;;  %v4948_v37 = vld [vmem:[%s6925_s8 + $0x80] sm:$0xf0] }
  0xdd   : > { %2253 = vmatpush.bf16.msrb.mxu3 %v4783_v60  ;;  %v6130_v60 = vld [vmem:[%s6396_s25 + $0xf4] sm:$0xf0]  ;;  %v4135_v8 = vor.u32 %v6113_v55, %v4132_v56  ;;  %v5338_v55 = vld [vmem:[%s6925_s8 + $0x308] sm:$0xf] }
  0xde   : > { %v4139_v9 = vor.u32 %v6130_v60, %v4138_v57  ;;  %v5988_v56 = vld [vmem:[%s6925_s8 + $0x384] sm:$0xf0] }
  0xdf   : > { %2215 = vmatpush.bf16.msrb.mxu0 %v4643_v3  ;;  %2228 = vmatpush.bf16.msrb.mxu1 %v4647_v5  ;;  %v4131_v3 = vor.u32 %v6129_v51, %v4130_v50  ;;  %v5716_v5 = vld [vmem:[%s6925_s8 + $0x680] sm:$0xf0]  ;;  %v5987_v50 = vld [vmem:[%s6925_s8 + $0x37c] sm:$0xf0]  ;;  %v5339_v63 = vor.u32 %v5988_v56, %v5338_v55  ;;  %v4954_v39 = vld [vmem:[%s6925_s8 + $0x8] sm:$0xf] }
  0xe0   : > { %2241 = vmatpush.bf16.msrb.mxu2 %v4651_v6  ;;  %v5722_v6 = vld [vmem:[%s6925_s8 + $0x608] sm:$0xf]  ;;  %v5719_v14 = vor.u32 %v6067_v1, %v5716_v5  ;;  %v5971_v51 = vld [vmem:[%s6925_s8 + $0x304] sm:$0xf]  ;;  %v5955_v1 = vld [vmem:[%s6925_s8 + $0x27c] sm:$0xf0] }
  0xe1   : > { %2254 = vmatpush.bf16.msrb.mxu3 %v4655_v10  ;;  %v6068_v10 = vld [vmem:[%s6925_s8 + $0x60c] sm:$0xf]  ;;  %v5723_v15 = vor.u32 %v6084_v7, %v5722_v6  ;;  %v5204_v7 = vld [vmem:[%s6925_s8 + $0x280] sm:$0xf0]  ;;  %v6086_v55 = vld [vmem:[%s6925_s8 + $0x694] sm:$0xf0] }
  0xe3   : > { %2216 = vmatpush.bf16.msrb.mxu0 %v4515_v17  ;;  %2229 = vmatpush.bf16.msrb.mxu1 %v4519_v18  ;;  %v6051_v17 = vld [vmem:[%s6925_s8 + $0x57c] sm:$0xf0]  ;;  %v6035_v18 = vld [vmem:[%s6925_s8 + $0x504] sm:$0xf]  ;;  %v6949_v23 = vpop.f32.mrf.mxu1  ;;  %v6956_v34 = vpop.f32.mrf.mxu0 }
  0xe4   : > { %2242 = vmatpush.bf16.msrb.mxu2 %v4523_v19  ;;  %v5727_v19 = vor.u32 %v6068_v10, %v5724_v11  ;;  %v5587_v27 = vor.u32 %v6051_v17, %v5586_v16  ;;  %v5591_v28 = vor.u32 %v6035_v18, %v5588_v20  ;;  %v6344_v10 = vmov 0   ;;  %v5940_v11 = vld [vmem:[%s6925_s8 + $0x20c] sm:$0xf]  ;;  %v5074_v18 = vld [vmem:[%s6925_s8 + $0x100] sm:$0xf] }
  0xe5   : > { %2255 = vmatpush.bf16.msrb.mxu3 %v4527_v25  ;;  %v6036_v25 = vld [vmem:[%s6925_s8 + $0x50c] sm:$0xf]  ;;  %6333 = vset.pattern.permute.xlu0 %v6344_v10  ;;  %v5907_v20 = vld [vmem:[%s6925_s8 + $0x104] sm:$0xf]  ;;  %v7029_v10 = vld [vmem:[%s7625_s2] sm:$0x1] }
  0xe6   : > { %3806 = vperm.xlu0 %6333, %v3803_v61  }
  0xe7   : > { %2217 = vmatpush.bf16.msrb.mxu0 %v4387_v33  ;;  %2230 = vmatpush.bf16.msrb.mxu1 %v4391_v35  ;;  %v6003_v33 = vld [vmem:[%s6925_s8 + $0x404] sm:$0xf]  ;;  %v5599_v35 = vor.u32 %v6036_v25, %v5596_v26  ;;  %v5082_v25 = vld [vmem:[%s6925_s8 + $0x108] sm:$0xf] }
  0xe8   : > { %2243 = vmatpush.bf16.msrb.mxu2 %v4395_v36  ;;  %v5460_v36 = vld [vmem:[%s6925_s8 + $0x480] sm:$0xf0]  ;;  %v5924_v26 = vld [vmem:[%s6925_s8 + $0x184] sm:$0xf0] }
  0xe9   : > { %2256 = vmatpush.bf16.msrb.mxu3 %v4399_v41  ;;  %v5468_v41 = vld [vmem:[%s6925_s8 + $0x488] sm:$0xf0]  ;;  %v5463_v45 = vor.u32 %v6003_v33, %v5460_v36  ;;  %v5079_v33 = vor.u32 %v5907_v20, %v5076_v22  ;;  %v5875_v36 = vld [vmem:[%s6925_s8 + $0x4] sm:$0xf]  ;;  %v5482_v22 = vld [vmem:[%s6925_s8 + $0x418] sm:$0xf] }
  0xea   : > { %v4951_v56 = vor.u32 %v5875_v36, %v4948_v37  ;;  %v5989_v36 = vld [vmem:[%s6925_s8 + $0x38c] sm:$0xf0]  ;;  %v5973_v37 = vld [vmem:[%s6925_s8 + $0x314] sm:$0xf] }
  0xeb   : > { %2218 = vmatpush.bf16.msrb.mxu0 %v4259_v48  ;;  %2231 = vmatpush.bf16.msrb.mxu1 %v4263_v53  ;;  %v6973_v44 = vpop.f32.mrf.mxu3  ;;  %v5330_v48 = vld [vmem:[%s6925_s8 + $0x300] sm:$0xf]  ;;  %v5471_v53 = vor.u32 %v6004_v40, %v5468_v41  ;;  %v1976_v57 = vpop.f32.mrf.mxu1  ;;  %v5892_v41 = vld [vmem:[%s6925_s8 + $0x84] sm:$0xf0] }
  0xec   : > { %2244 = vmatpush.bf16.msrb.mxu2 %v4267_v54  ;;  %v6969_v42 = vpop.f32.mrf.mxu2  ;;  %v5332_v54 = vld [vmem:[%s6925_s8 + $0x380] sm:$0xf0]  ;;  %v5331_v60 = vor.u32 %v5987_v50, %v5330_v48  ;;  %v1963_v5 = vpop.f32.mrf.mxu0  ;;  %v6085_v48 = vld [vmem:[%s6925_s8 + $0x68c] sm:$0xf0]  ;;  %v6069_v50 = vld [vmem:[%s6925_s8 + $0x614] sm:$0xf]  ;;  %v4955_v57 = vor.u32 %v5892_v41, %v4954_v39 }
  0xed   : > { %2257 = vmatpush.bf16.msrb.mxu3 %v4271_v58  ;;  %v5340_v58 = vld [vmem:[%s6925_s8 + $0x388] sm:$0xf0]  ;;  %v5335_v62 = vor.u32 %v5971_v51, %v5332_v54  ;;  %v4947_v51 = vor.u32 %v5891_v32, %v4946_v31  ;;  %v5738_v54 = vld [vmem:[%s6925_s8 + $0x618] sm:$0xf] }
  0xee   : > { %v5354_v41 = vld [vmem:[%s6925_s8 + $0x318] sm:$0xf] }
  0xef   : > { %2219 = vmatpush.bf16.msrb.mxu0 %v4131_v3  ;;  %2232 = vmatpush.bf16.msrb.mxu1 %v4135_v8  ;;  %v5939_v3 = vld [vmem:[%s6925_s8 + $0x204] sm:$0xf]  ;;  %v5210_v8 = vld [vmem:[%s6925_s8 + $0x208] sm:$0xf] }
  0xf0   : > { %2245 = vmatpush.bf16.msrb.mxu2 %v4139_v9  ;;  %v5956_v9 = vld [vmem:[%s6925_s8 + $0x284] sm:$0xf0]  ;;  %v5207_v16 = vor.u32 %v5939_v3, %v5204_v7  ;;  %v6037_v3 = vld [vmem:[%s6925_s8 + $0x514] sm:$0xf]  ;;  %v5610_v7 = vld [vmem:[%s6925_s8 + $0x518] sm:$0xf] }
  0xf1   : > { %2258 = vmatpush.bf16.msrb.mxu3 %v4143_v12  ;;  %v5212_v12 = vld [vmem:[%s6925_s8 + $0x288] sm:$0xf0]  ;;  %v5211_v17 = vor.u32 %v5956_v9, %v5210_v8  ;;  %v6054_v8 = vld [vmem:[%s6925_s8 + $0x594] sm:$0xf0] }
  0xf2   : > { %4940 = vmatmul.msk.bf16.vlgmr.msrb.gmra.mxu0 %vm1844_vm0, %v6806_v52  ;;  %4941 = vmatmul.msk.bf16.vlgmr.msrb.gmra.mxu1 %vm1844_vm0, %v6806_v52  ;;  %v5215_v21 = vor.u32 %v5940_v11, %v5212_v12  ;;  %v6038_v11 = vld [vmem:[%s6925_s8 + $0x51c] sm:$0xf] }
  0xf3   : > { %3388 = vmatpush.bf16.msra.mxu0 %v5715_v13  ;;  %3401 = vmatpush.bf16.msra.mxu1 %v5719_v14  ;;  %v5203_v14 = vor.u32 %v5955_v1, %v5202_v0  ;;  %v5602_v0 = vld [vmem:[%s6925_s8 + $0x510] sm:$0xf]  ;;  %v5612_v12 = vld [vmem:[%s6925_s8 + $0x598] sm:$0xf0] }
  0xf4   : > { %3414 = vmatpush.bf16.msra.mxu2 %v5723_v15  ;;  %4943 = vmatmul.msk.bf16.vlgmr.msrb.gmra.mxu3 %vm1844_vm0, %v6806_v52  ;;  %v1989_v13 = vpop.f32.mrf.mxu2  ;;  %v2002_v15 = vpop.f32.mrf.mxu3  ;;  %v6053_v1 = vld [vmem:[%s6925_s8 + $0x58c] sm:$0xf0]  ;;  %v5615_v20 = vor.u32 %v6038_v11, %v5612_v12  ;;  %v5909_v11 = vld [vmem:[%s6925_s8 + $0x114] sm:$0xf] }
  0xf5   : > { %3427 = vmatpush.bf16.msra.mxu3 %v5727_v19  ;;  %4942 = vmatmul.msk.bf16.vlgmr.msrb.gmra.mxu2 %vm1844_vm0, %v6806_v52  ;;  %v5972_v52 = vld [vmem:[%s6925_s8 + $0x30c] sm:$0xf]  ;;  %v5923_v19 = vld [vmem:[%s6925_s8 + $0x17c] sm:$0xf0]  ;;  %v5603_v13 = vor.u32 %v6053_v1, %v5602_v0  ;;  %v5611_v15 = vor.u32 %v6054_v8, %v5610_v7  ;;  %v5090_v7 = vld [vmem:[%s6925_s8 + $0x110] sm:$0xf] }
  0xf6   : > { %v5343_v6 = vor.u32 %v5972_v52, %v5340_v58  ;;  %v6070_v52 = vld [vmem:[%s6925_s8 + $0x61c] sm:$0xf]  ;;  %v5925_v8 = vld [vmem:[%s6925_s8 + $0x18c] sm:$0xf0] }
  0xf7   : > { %3389 = vmatpush.bf16.msra.mxu0 %v5587_v27  ;;  %3402 = vmatpush.bf16.msra.mxu1 %v5591_v28  ;;  %v5908_v27 = vld [vmem:[%s6925_s8 + $0x10c] sm:$0xf]  ;;  %v5740_v58 = vld [vmem:[%s6925_s8 + $0x698] sm:$0xf0] }
  0xf8   : > { %3415 = vmatpush.bf16.msra.mxu2 %v5595_v30  ;;  %v5084_v28 = vld [vmem:[%s6925_s8 + $0x188] sm:$0xf0]  ;;  %v5075_v30 = vor.u32 %v5923_v19, %v5074_v18  ;;  %v5743_v5 = vor.u32 %v6070_v52, %v5740_v58  ;;  %v6005_v18 = vld [vmem:[%s6925_s8 + $0x414] sm:$0xf] }
  0xf9   : > { %3428 = vmatpush.bf16.msra.mxu3 %v5599_v35  ;;  %v5083_v35 = vor.u32 %v5924_v26, %v5082_v25  ;;  %v5087_v40 = vor.u32 %v5908_v27, %v5084_v28  ;;  %v6022_v25 = vld [vmem:[%s6925_s8 + $0x494] sm:$0xf0]  ;;  %v6006_v26 = vld [vmem:[%s6925_s8 + $0x41c] sm:$0xf]  ;;  %v5220_v58 = vld [vmem:[%s6925_s8 + $0x290] sm:$0xf0] }
  0xfa   : > { %v5484_v27 = vld [vmem:[%s6925_s8 + $0x498] sm:$0xf0] }
  0xfb   : > { %3390 = vmatpush.bf16.msra.mxu0 %v5459_v43  ;;  %3403 = vmatpush.bf16.msra.mxu1 %v5463_v45  ;;  %v5876_v43 = vld [vmem:[%s6925_s8 + $0xc] sm:$0xf]  ;;  %v5487_v39 = vor.u32 %v6006_v26, %v5484_v27  ;;  %v5877_v26 = vld [vmem:[%s6925_s8 + $0x14] sm:$0xf] }
  0xfc   : > { %3416 = vmatpush.bf16.msra.mxu2 %v5467_v47  ;;  %v4956_v45 = vld [vmem:[%s6925_s8 + $0x88] sm:$0xf0]  ;;  %v5730_v47 = vld [vmem:[%s6925_s8 + $0x610] sm:$0xf]  ;;  %v4964_v27 = vld [vmem:[%s6925_s8 + $0x90] sm:$0xf0] }
  0xfd   : > { %3429 = vmatpush.bf16.msra.mxu3 %v5471_v53  ;;  %v5732_v53 = vld [vmem:[%s6925_s8 + $0x690] sm:$0xf0]  ;;  %v5731_v61 = vor.u32 %v6085_v48, %v5730_v47  ;;  %v5974_v47 = vld [vmem:[%s6925_s8 + $0x31c] sm:$0xf] }
  0xfe   : > { %v5356_v48 = vld [vmem:[%s6925_s8 + $0x398] sm:$0xf0] }
  0xff   : > { %3391 = vmatpush.bf16.msra.mxu0 %v5331_v60  ;;  %3404 = vmatpush.bf16.msra.mxu1 %v5335_v62  ;;  %v4959_v60 = vor.u32 %v5876_v43, %v4956_v45  ;;  %v5735_v62 = vor.u32 %v6069_v50, %v5732_v53  ;;  %v7024_v9 = vpop.f32.mrf.mxu1  ;;  %v7036_v19 = vpop.f32.mrf.mxu0  ;;  %v5990_v43 = vld [vmem:[%s6925_s8 + $0x394] sm:$0xf0]  ;;  %v5359_v52 = vor.u32 %v5974_v47, %v5356_v48  ;;  %v6088_v47 = vld [vmem:[%s6925_s8 + $0x6a4] sm:$0xf0] }
 0x100   : > { %3417 = vmatpush.bf16.msra.mxu2 %v5339_v63  ;;  %v5739_v63 = vor.u32 %v6086_v55, %v5738_v54  ;;  %v5355_v53 = vor.u32 %v5990_v43, %v5354_v41  ;;  %v5218_v54 = vld [vmem:[%s6925_s8 + $0x210] sm:$0xf]  ;;  %v5748_v43 = vld [vmem:[%s6925_s8 + $0x6a0] sm:$0xf0]  ;;  %v4967_v48 = vor.u32 %v5877_v26, %v4964_v27 }
 0x101   : > { %3430 = vmatpush.bf16.msra.mxu3 %v5343_v6  ;;  %v5604_v6 = vld [vmem:[%s6925_s8 + $0x590] sm:$0xf0]  ;;  %v5957_v55 = vld [vmem:[%s6925_s8 + $0x28c] sm:$0xf0] }
 0x102   : > { %v5219_v1 = vor.u32 %v5957_v55, %v5218_v54 }
 0x103   : > { %3392 = vmatpush.bf16.msra.mxu0 %v5203_v14  ;;  %3405 = vmatpush.bf16.msra.mxu1 %v5207_v16  ;;  %v5607_v14 = vor.u32 %v6037_v3, %v5604_v6  ;;  %v5474_v16 = vld [vmem:[%s6925_s8 + $0x410] sm:$0xf] }
 0x104   : > { %3418 = vmatpush.bf16.msra.mxu2 %v5211_v17  ;;  %v6021_v17 = vld [vmem:[%s6925_s8 + $0x48c] sm:$0xf0] }
 0x105   : > { %3431 = vmatpush.bf16.msra.mxu3 %v5215_v21  ;;  %v5476_v21 = vld [vmem:[%s6925_s8 + $0x490] sm:$0xf0] }
 0x106   : > { %v5479_v32 = vor.u32 %v6005_v18, %v5476_v21  ;;  %v5091_v18 = vor.u32 %v5925_v8, %v5090_v7  ;;  %v5893_v21 = vld [vmem:[%s6925_s8 + $0x8c] sm:$0xf0] }
 0x107   : > { %3393 = vmatpush.bf16.msra.mxu0 %v5075_v30  ;;  %3406 = vmatpush.bf16.msra.mxu1 %v5079_v33  ;;  %v5475_v30 = vor.u32 %v6021_v17, %v5474_v16  ;;  %v7053_v31 = vpop.f32.mrf.mxu3  ;;  %v5483_v33 = vor.u32 %v6022_v25, %v5482_v22  ;;  %v2028_v45 = vpop.f32.mrf.mxu1  ;;  %v5910_v16 = vld [vmem:[%s6925_s8 + $0x11c] sm:$0xf] }
 0x108   : > { %3419 = vmatpush.bf16.msra.mxu2 %v5083_v35  ;;  %v7049_v28 = vpop.f32.mrf.mxu2  ;;  %v5346_v35 = vld [vmem:[%s6925_s8 + $0x310] sm:$0xf]  ;;  %v5100_v17 = vld [vmem:[%s6925_s8 + $0x198] sm:$0xf0]  ;;  %v5754_v45 = vld [vmem:[%s6925_s8 + $0x628] sm:$0xf] }
 0x109   : > { %3432 = vmatpush.bf16.msra.mxu3 %v5087_v40  ;;  %v5348_v40 = vld [vmem:[%s6925_s8 + $0x390] sm:$0xf0]  ;;  %v5347_v50 = vor.u32 %v5989_v36, %v5346_v35  ;;  %v5878_v35 = vld [vmem:[%s6925_s8 + $0x1c] sm:$0xf] }
 0x10a   : > { %v4972_v36 = vld [vmem:[%s6925_s8 + $0x98] sm:$0xf0] }
 0x10b   : > { %3394 = vmatpush.bf16.msra.mxu0 %v4947_v51  ;;  %3407 = vmatpush.bf16.msra.mxu1 %v4951_v56  ;;  %v5351_v51 = vor.u32 %v5973_v37, %v5348_v40  ;;  %v5941_v56 = vld [vmem:[%s6925_s8 + $0x214] sm:$0xf]  ;;  %v5746_v37 = vld [vmem:[%s6925_s8 + $0x620] sm:$0xf]  ;;  %v6071_v40 = vld [vmem:[%s6925_s8 + $0x624] sm:$0xf]  ;;  %v4975_v54 = vor.u32 %v5878_v35, %v4972_v36 }
 0x10c   : > { %3420 = vmatpush.bf16.msra.mxu2 %v4955_v57  ;;  %v2015_v57 = vpop.f32.mrf.mxu0  ;;  %v5975_v35 = vld [vmem:[%s6925_s8 + $0x324] sm:$0xf] }
 0x10d   : > { %3433 = vmatpush.bf16.msra.mxu3 %v4959_v60  ;;  %v5226_v60 = vld [vmem:[%s6925_s8 + $0x218] sm:$0xf]  ;;  %v5755_v57 = vor.u32 %v6088_v47, %v5754_v45  ;;  %v5372_v45 = vld [vmem:[%s6925_s8 + $0x3a8] sm:$0xf0] }
 0x10e   : > { %5840 = vmatmul.msk.bf16.vlgmr.msra.gmra.mxu0 %vm1844_vm0, %v7029_v10  ;;  %5841 = vmatmul.msk.bf16.vlgmr.msra.gmra.mxu1 %vm1844_vm0, %v7029_v10 }
 0x10f   : > { %3440 = vmatpush.bf16.msrb.mxu0 %v5731_v61  ;;  %3453 = vmatpush.bf16.msrb.mxu1 %v5735_v62  ;;  %v5958_v61 = vld [vmem:[%s6925_s8 + $0x294] sm:$0xf0]  ;;  %v5942_v62 = vld [vmem:[%s6925_s8 + $0x21c] sm:$0xf]  ;;  %v2054_v3 = vpop.f32.mrf.mxu3 }
 0x110   : > { %3466 = vmatpush.bf16.msrb.mxu2 %v5739_v63  ;;  %5843 = vmatmul.msk.bf16.vlgmr.msra.gmra.mxu3 %vm1844_vm0, %v7029_v10  ;;  %v5228_v63 = vld [vmem:[%s6925_s8 + $0x298] sm:$0xf0]  ;;  %v2041_v0 = vpop.f32.mrf.mxu2  ;;  %v5227_v6 = vor.u32 %v5958_v61, %v5226_v60  ;;  %v6039_v60 = vld [vmem:[%s6925_s8 + $0x524] sm:$0xf]  ;;  %v6040_v3 = vld [vmem:[%s6925_s8 + $0x52c] sm:$0xf] }
 0x111   : > { %3479 = vmatpush.bf16.msrb.mxu3 %v5743_v5  ;;  %5842 = vmatmul.msk.bf16.vlgmr.msra.gmra.mxu2 %vm1844_vm0, %v7029_v10  ;;  %v5223_v5 = vor.u32 %v5941_v56, %v5220_v58  ;;  %v5231_v12 = vor.u32 %v5942_v62, %v5228_v63  ;;  %v5751_v56 = vor.u32 %v6071_v40, %v5748_v43  ;;  %v6055_v58 = vld [vmem:[%s6925_s8 + $0x59c] sm:$0xf0]  ;;  %v5620_v62 = vld [vmem:[%s6925_s8 + $0x5a0] sm:$0xf0]  ;;  %v5626_v63 = vld [vmem:[%s6925_s8 + $0x528] sm:$0xf] }
 0x112   : > { %v6056_v0 = vld [vmem:[%s6925_s8 + $0x5a4] sm:$0xf0]  ;;  %v5623_v7 = vor.u32 %v6039_v60, %v5620_v62  ;;  %v5976_v43 = vld [vmem:[%s6925_s8 + $0x32c] sm:$0xf] }
 0x113   : > { %3441 = vmatpush.bf16.msrb.mxu0 %v5603_v13  ;;  %3454 = vmatpush.bf16.msrb.mxu1 %v5607_v14  ;;  %v5092_v13 = vld [vmem:[%s6925_s8 + $0x190] sm:$0xf0]  ;;  %v5098_v14 = vld [vmem:[%s6925_s8 + $0x118] sm:$0xf]  ;;  %v5627_v8 = vor.u32 %v6056_v0, %v5626_v63  ;;  %v5992_v40 = vld [vmem:[%s6925_s8 + $0x3a4] sm:$0xf0] }
 0x114   : > { %3467 = vmatpush.bf16.msrb.mxu2 %v5611_v15  ;;  %v5926_v15 = vld [vmem:[%s6925_s8 + $0x194] sm:$0xf0]  ;;  %v5095_v22 = vor.u32 %v5909_v11, %v5092_v13  ;;  %v5490_v11 = vld [vmem:[%s6925_s8 + $0x420] sm:$0xf]  ;;  %v6007_v13 = vld [vmem:[%s6925_s8 + $0x424] sm:$0xf] }
 0x115   : > { %3480 = vmatpush.bf16.msrb.mxu3 %v5615_v20  ;;  %v4962_v20 = vld [vmem:[%s6925_s8 + $0x10] sm:$0xf]  ;;  %v5099_v25 = vor.u32 %v5926_v15, %v5098_v14  ;;  %v5944_v60 = vld [vmem:[%s6925_s8 + $0x22c] sm:$0xf] }
 0x116   : > { %v4963_v41 = vor.u32 %v5893_v21, %v4962_v20  ;;  %v6008_v20 = vld [vmem:[%s6925_s8 + $0x42c] sm:$0xf] }
 0x117   : > { %3442 = vmatpush.bf16.msrb.mxu0 %v5475_v30  ;;  %3455 = vmatpush.bf16.msrb.mxu1 %v5479_v32  ;;  %v4970_v30 = vld [vmem:[%s6925_s8 + $0x18] sm:$0xf]  ;;  %v5103_v32 = vor.u32 %v5910_v16, %v5100_v17  ;;  %v5492_v16 = vld [vmem:[%s6925_s8 + $0x4a0] sm:$0xf0]  ;;  %v5498_v17 = vld [vmem:[%s6925_s8 + $0x428] sm:$0xf] }
 0x118   : > { %3468 = vmatpush.bf16.msrb.mxu2 %v5483_v33  ;;  %v5894_v33 = vld [vmem:[%s6925_s8 + $0x94] sm:$0xf0]  ;;  %v5500_v21 = vld [vmem:[%s6925_s8 + $0x4a8] sm:$0xf0]  ;;  %v5495_v27 = vor.u32 %v6007_v13, %v5492_v16  ;;  %v5114_v13 = vld [vmem:[%s6925_s8 + $0x128] sm:$0xf] }
 0x119   : > { %3481 = vmatpush.bf16.msrb.mxu3 %v5487_v39  ;;  %v6087_v39 = vld [vmem:[%s6925_s8 + $0x69c] sm:$0xf0]  ;;  %v5503_v36 = vor.u32 %v6008_v20, %v5500_v21  ;;  %v5912_v16 = vld [vmem:[%s6925_s8 + $0x12c] sm:$0xf] }
 0x11a   : > { %v5747_v55 = vor.u32 %v6087_v39, %v5746_v37  ;;  %v5364_v37 = vld [vmem:[%s6925_s8 + $0x3a0] sm:$0xf0]  ;;  %v5370_v39 = vld [vmem:[%s6925_s8 + $0x328] sm:$0xf]  ;;  %v4978_v20 = vld [vmem:[%s6925_s8 + $0x20] sm:$0xf] }
 0x11b   : > { %3443 = vmatpush.bf16.msrb.mxu0 %v5347_v50  ;;  %3456 = vmatpush.bf16.msrb.mxu1 %v5351_v51  ;;  %v4971_v50 = vor.u32 %v5894_v33, %v4970_v30  ;;  %v6072_v51 = vld [vmem:[%s6925_s8 + $0x62c] sm:$0xf]  ;;  %v7108_v14 = vpop.f32.mrf.mxu0  ;;  %v5991_v33 = vld [vmem:[%s6925_s8 + $0x39c] sm:$0xf0] }
 0x11c   : > { %3469 = vmatpush.bf16.msrb.mxu2 %v5355_v53  ;;  %v5756_v53 = vld [vmem:[%s6925_s8 + $0x6a8] sm:$0xf0]  ;;  %v5895_v21 = vld [vmem:[%s6925_s8 + $0x9c] sm:$0xf0] }
 0x11d   : > { %3482 = vmatpush.bf16.msrb.mxu3 %v5359_v52  ;;  %v5618_v52 = vld [vmem:[%s6925_s8 + $0x520] sm:$0xf]  ;;  %v5759_v61 = vor.u32 %v6072_v51, %v5756_v53 }
 0x11e   : > { %v5234_v51 = vld [vmem:[%s6925_s8 + $0x220] sm:$0xf] }
 0x11f   : > { %3444 = vmatpush.bf16.msrb.mxu0 %v5219_v1  ;;  %3457 = vmatpush.bf16.msrb.mxu1 %v5223_v5  ;;  %v7101_v1 = vpop.f32.mrf.mxu1  ;;  %v5628_v5 = vld [vmem:[%s6925_s8 + $0x5a8] sm:$0xf0]  ;;  %v5959_v53 = vld [vmem:[%s6925_s8 + $0x29c] sm:$0xf0] }
 0x120   : > { %3470 = vmatpush.bf16.msrb.mxu2 %v5227_v6  ;;  %v5619_v6 = vor.u32 %v6055_v58, %v5618_v52  ;;  %v5631_v15 = vor.u32 %v6040_v3, %v5628_v5  ;;  %v5242_v52 = vld [vmem:[%s6925_s8 + $0x228] sm:$0xf]  ;;  %v5235_v63 = vor.u32 %v5959_v53, %v5234_v51 }
 0x121   : > { %3483 = vmatpush.bf16.msrb.mxu3 %v5231_v12  ;;  %v6023_v12 = vld [vmem:[%s6925_s8 + $0x49c] sm:$0xf0]  ;;  %v5960_v58 = vld [vmem:[%s6925_s8 + $0x2a4] sm:$0xf0] }
 0x122   : > { %v5243_v5 = vor.u32 %v5960_v58, %v5242_v52 }
 0x123   : > { %3445 = vmatpush.bf16.msrb.mxu0 %v5091_v18  ;;  %3458 = vmatpush.bf16.msrb.mxu1 %v5095_v22  ;;  %v6024_v18 = vld [vmem:[%s6925_s8 + $0x4a4] sm:$0xf0]  ;;  %v7125_v26 = vpop.f32.mrf.mxu3 }
 0x124   : > { %3471 = vmatpush.bf16.msrb.mxu2 %v5099_v25  ;;  %v7121_v22 = vpop.f32.mrf.mxu2  ;;  %v5491_v25 = vor.u32 %v6023_v12, %v5490_v11  ;;  %v5499_v30 = vor.u32 %v6024_v18, %v5498_v17  ;;  %v5108_v12 = vld [vmem:[%s6925_s8 + $0x1a0] sm:$0xf0]  ;;  %v5116_v17 = vld [vmem:[%s6925_s8 + $0x1a8] sm:$0xf0] }
 0x125   : > { %3484 = vmatpush.bf16.msrb.mxu3 %v5103_v32  ;;  %v5362_v32 = vld [vmem:[%s6925_s8 + $0x320] sm:$0xf] }
 0x126   : > { %v5363_v47 = vor.u32 %v5991_v33, %v5362_v32  ;;  %v4980_v32 = vld [vmem:[%s6925_s8 + $0xa0] sm:$0xf0]  ;;  %v4986_v33 = vld [vmem:[%s6925_s8 + $0x28] sm:$0xf] }
 0x127   : > { %3446 = vmatpush.bf16.msrb.mxu0 %v4963_v41  ;;  %3459 = vmatpush.bf16.msrb.mxu1 %v4967_v48  ;;  %v2080_v41 = vpop.f32.mrf.mxu1  ;;  %v5367_v48 = vor.u32 %v5975_v35, %v5364_v37  ;;  %v5119_v35 = vor.u32 %v5912_v16, %v5116_v17  ;;  %v5880_v37 = vld [vmem:[%s6925_s8 + $0x2c] sm:$0xf]  ;;  %v6025_v16 = vld [vmem:[%s6925_s8 + $0x4ac] sm:$0xf0]  ;;  %v6009_v17 = vld [vmem:[%s6925_s8 + $0x434] sm:$0xf] }
 0x128   : > { %3472 = vmatpush.bf16.msrb.mxu2 %v4971_v50  ;;  %v5371_v50 = vor.u32 %v5992_v40, %v5370_v39  ;;  %v4988_v39 = vld [vmem:[%s6925_s8 + $0xa8] sm:$0xf0]  ;;  %v5762_v40 = vld [vmem:[%s6925_s8 + $0x630] sm:$0xf] }
 0x129   : > { %3485 = vmatpush.bf16.msrb.mxu3 %v4975_v54  ;;  %v5943_v54 = vld [vmem:[%s6925_s8 + $0x224] sm:$0xf]  ;;  %v6089_v41 = vld [vmem:[%s6925_s8 + $0x6ac] sm:$0xf0] }
 0x12a   : > { %5844 = vmatmul.msk.bf16.vlgmr.msrb.gmra.mxu0 %vm1844_vm0, %v7029_v10  ;;  %5845 = vmatmul.msk.bf16.vlgmr.msrb.gmra.mxu1 %vm1844_vm0, %v7029_v10 }
 0x12b   : > { %3492 = vmatpush.bf16.msra.mxu0 %v5747_v55  ;;  %3505 = vmatpush.bf16.msra.mxu1 %v5751_v56  ;;  %v2067_v55 = vpop.f32.mrf.mxu0  ;;  %v5375_v56 = vor.u32 %v5976_v43, %v5372_v45  ;;  %v2106_v0 = vpop.f32.mrf.mxu3  ;;  %v6073_v43 = vld [vmem:[%s6925_s8 + $0x634] sm:$0xf]  ;;  %v4979_v45 = vor.u32 %v5895_v21, %v4978_v20 }
 0x12c   : > { %3518 = vmatpush.bf16.msra.mxu2 %v5755_v57  ;;  %5847 = vmatmul.msk.bf16.vlgmr.msrb.gmra.mxu3 %vm1844_vm0, %v7029_v10  ;;  %v5236_v57 = vld [vmem:[%s6925_s8 + $0x2a0] sm:$0xf0]  ;;  %v2093_v62 = vpop.f32.mrf.mxu2  ;;  %v5772_v55 = vld [vmem:[%s6925_s8 + $0x6b8] sm:$0xf0]  ;;  %v5636_v0 = vld [vmem:[%s6925_s8 + $0x5b0] sm:$0xf0] }
 0x12d   : > { %3531 = vmatpush.bf16.msra.mxu3 %v5759_v61  ;;  %5846 = vmatmul.msk.bf16.vlgmr.msrb.gmra.mxu2 %vm1844_vm0, %v7029_v10  ;;  %v5244_v61 = vld [vmem:[%s6925_s8 + $0x2a8] sm:$0xf0]  ;;  %v5239_v3 = vor.u32 %v5943_v54, %v5236_v57  ;;  %v6074_v54 = vld [vmem:[%s6925_s8 + $0x63c] sm:$0xf]  ;;  %v5763_v57 = vor.u32 %v6089_v41, %v5762_v40  ;;  %v6041_v62 = vld [vmem:[%s6925_s8 + $0x534] sm:$0xf] }
 0x12e   : > { %v5247_v11 = vor.u32 %v5944_v60, %v5244_v61  ;;  %v5634_v60 = vld [vmem:[%s6925_s8 + $0x530] sm:$0xf]  ;;  %v5508_v21 = vld [vmem:[%s6925_s8 + $0x4b0] sm:$0xf0] }
 0x12f   : > { %3493 = vmatpush.bf16.msra.mxu0 %v5619_v6  ;;  %3506 = vmatpush.bf16.msra.mxu1 %v5623_v7  ;;  %v5106_v6 = vld [vmem:[%s6925_s8 + $0x120] sm:$0xf]  ;;  %v6057_v61 = vld [vmem:[%s6925_s8 + $0x5ac] sm:$0xf0] }
 0x130   : > { %3519 = vmatpush.bf16.msra.mxu2 %v5627_v8  ;;  %v5927_v7 = vld [vmem:[%s6925_s8 + $0x19c] sm:$0xf0]  ;;  %v5911_v8 = vld [vmem:[%s6925_s8 + $0x124] sm:$0xf]  ;;  %v5378_v40 = vld [vmem:[%s6925_s8 + $0x330] sm:$0xf] }
 0x131   : > { %3532 = vmatpush.bf16.msra.mxu3 %v5631_v15  ;;  %v5928_v15 = vld [vmem:[%s6925_s8 + $0x1a4] sm:$0xf0]  ;;  %v5107_v18 = vor.u32 %v5927_v7, %v5106_v6  ;;  %v6042_v7 = vld [vmem:[%s6925_s8 + $0x53c] sm:$0xf]  ;;  %v5993_v41 = vld [vmem:[%s6925_s8 + $0x3ac] sm:$0xf0] }
 0x133   : > { %3494 = vmatpush.bf16.msra.mxu0 %v5491_v25  ;;  %3507 = vmatpush.bf16.msra.mxu1 %v5495_v27  ;;  %v5111_v25 = vor.u32 %v5911_v8, %v5108_v12  ;;  %v5115_v27 = vor.u32 %v5928_v15, %v5114_v13  ;;  %v5644_v8 = vld [vmem:[%s6925_s8 + $0x5b8] sm:$0xf0]  ;;  %v5639_v12 = vor.u32 %v6041_v62, %v5636_v0  ;;  %v5506_v15 = vld [vmem:[%s6925_s8 + $0x430] sm:$0xf]  ;;  %v5258_v0 = vld [vmem:[%s6925_s8 + $0x238] sm:$0xf] }
 0x134   : > { %3520 = vmatpush.bf16.msra.mxu2 %v5499_v30  ;;  %v5879_v30 = vld [vmem:[%s6925_s8 + $0x24] sm:$0xf]  ;;  %v5647_v20 = vor.u32 %v6042_v7, %v5644_v8  ;;  %v5260_v7 = vld [vmem:[%s6925_s8 + $0x2b8] sm:$0xf0] }
 0x135   : > { %3533 = vmatpush.bf16.msra.mxu3 %v5503_v36  ;;  %v5896_v36 = vld [vmem:[%s6925_s8 + $0xa4] sm:$0xf0]  ;;  %v4983_v51 = vor.u32 %v5879_v30, %v4980_v32  ;;  %v6010_v30 = vld [vmem:[%s6925_s8 + $0x43c] sm:$0xf] }
 0x136   : > { %v4987_v53 = vor.u32 %v5896_v36, %v4986_v33  ;;  %v5516_v32 = vld [vmem:[%s6925_s8 + $0x4b8] sm:$0xf0] }
 0x137   : > { %3495 = vmatpush.bf16.msra.mxu0 %v5363_v47  ;;  %3508 = vmatpush.bf16.msra.mxu1 %v5367_v48  ;;  %v5764_v47 = vld [vmem:[%s6925_s8 + $0x6b0] sm:$0xf0]  ;;  %v5770_v48 = vld [vmem:[%s6925_s8 + $0x638] sm:$0xf]  ;;  %v7173_v6 = vpop.f32.mrf.mxu1 }
 0x138   : > { %3521 = vmatpush.bf16.msra.mxu2 %v5371_v50  ;;  %v6090_v50 = vld [vmem:[%s6925_s8 + $0x6b4] sm:$0xf0]  ;;  %v5767_v52 = vor.u32 %v6073_v43, %v5764_v47  ;;  %v5977_v43 = vld [vmem:[%s6925_s8 + $0x334] sm:$0xf] }
 0x139   : > { %3534 = vmatpush.bf16.msra.mxu3 %v5375_v56  ;;  %v4991_v56 = vor.u32 %v5880_v37, %v4988_v39  ;;  %v5771_v58 = vor.u32 %v6090_v50, %v5770_v48  ;;  %v5511_v37 = vor.u32 %v6009_v17, %v5508_v21  ;;  %v5380_v47 = vld [vmem:[%s6925_s8 + $0x3b0] sm:$0xf0]  ;;  %v5386_v48 = vld [vmem:[%s6925_s8 + $0x338] sm:$0xf]  ;;  %v5929_v17 = vld [vmem:[%s6925_s8 + $0x1ac] sm:$0xf0] }
 0x13a   : > { %v5994_v50 = vld [vmem:[%s6925_s8 + $0x3b4] sm:$0xf0] }
 0x13b   : > { %3496 = vmatpush.bf16.msra.mxu0 %v5235_v63  ;;  %3509 = vmatpush.bf16.msra.mxu1 %v5239_v3  ;;  %v5775_v63 = vor.u32 %v6074_v54, %v5772_v55  ;;  %v5642_v3 = vld [vmem:[%s6925_s8 + $0x538] sm:$0xf]  ;;  %v5388_v54 = vld [vmem:[%s6925_s8 + $0x3b8] sm:$0xf0]  ;;  %v5379_v55 = vor.u32 %v5993_v41, %v5378_v40  ;;  %v5897_v40 = vld [vmem:[%s6925_s8 + $0xac] sm:$0xf0] }
 0x13c   : > { %3522 = vmatpush.bf16.msra.mxu2 %v5243_v5  ;;  %v6058_v5 = vld [vmem:[%s6925_s8 + $0x5b4] sm:$0xf0] }
 0x13d   : > { %3535 = vmatpush.bf16.msra.mxu3 %v5247_v11  ;;  %v5635_v11 = vor.u32 %v6057_v61, %v5634_v60  ;;  %v5643_v13 = vor.u32 %v6058_v5, %v5642_v3  ;;  %v5945_v60 = vld [vmem:[%s6925_s8 + $0x234] sm:$0xf]  ;;  %v5962_v3 = vld [vmem:[%s6925_s8 + $0x2b4] sm:$0xf0]  ;;  %v5946_v5 = vld [vmem:[%s6925_s8 + $0x23c] sm:$0xf] }
 0x13e   : > { %v5263_v21 = vor.u32 %v5946_v5, %v5260_v7 }
 0x13f   : > { %3497 = vmatpush.bf16.msra.mxu0 %v5107_v18  ;;  %3510 = vmatpush.bf16.msra.mxu1 %v5111_v25  ;;  %v7180_v18 = vpop.f32.mrf.mxu0  ;;  %v5514_v25 = vld [vmem:[%s6925_s8 + $0x438] sm:$0xf]  ;;  %v7197_v36 = vpop.f32.mrf.mxu3 }
 0x140   : > { %3523 = vmatpush.bf16.msra.mxu2 %v5115_v27  ;;  %v6026_v27 = vld [vmem:[%s6925_s8 + $0x4b4] sm:$0xf0]  ;;  %v7193_v33 = vpop.f32.mrf.mxu2 }
 0x141   : > { %3536 = vmatpush.bf16.msra.mxu3 %v5119_v35  ;;  %v5507_v35 = vor.u32 %v6025_v16, %v5506_v15  ;;  %v5515_v39 = vor.u32 %v6026_v27, %v5514_v25  ;;  %v5259_v15 = vor.u32 %v5962_v3, %v5258_v0  ;;  %v5122_v16 = vld [vmem:[%s6925_s8 + $0x130] sm:$0xf]  ;;  %v5124_v25 = vld [vmem:[%s6925_s8 + $0x1b0] sm:$0xf0]  ;;  %v5130_v27 = vld [vmem:[%s6925_s8 + $0x138] sm:$0xf] }
 0x142   : > { %v6076_v0 = vld [vmem:[%s6925_s8 + $0x64c] sm:$0xf] }
 0x143   : > { %3498 = vmatpush.bf16.msra.mxu0 %v4979_v45  ;;  %3511 = vmatpush.bf16.msra.mxu1 %v4983_v51  ;;  %v5519_v45 = vor.u32 %v6010_v30, %v5516_v32  ;;  %v2132_v51 = vpop.f32.mrf.mxu1  ;;  %v5930_v30 = vld [vmem:[%s6925_s8 + $0x1b4] sm:$0xf0]  ;;  %v5914_v32 = vld [vmem:[%s6925_s8 + $0x13c] sm:$0xf]  ;;  %v5788_v3 = vld [vmem:[%s6925_s8 + $0x6c8] sm:$0xf0] }
 0x144   : > { %3524 = vmatpush.bf16.msra.mxu2 %v4987_v53  ;;  %v5978_v53 = vld [vmem:[%s6925_s8 + $0x33c] sm:$0xf]  ;;  %v5898_v51 = vld [vmem:[%s6925_s8 + $0xb4] sm:$0xf0] }
 0x145   : > { %3537 = vmatpush.bf16.msra.mxu3 %v4991_v56  ;;  %v5383_v56 = vor.u32 %v5977_v43, %v5380_v47  ;;  %v5391_v62 = vor.u32 %v5978_v53, %v5388_v54  ;;  %v5131_v43 = vor.u32 %v5930_v30, %v5130_v27  ;;  %v4996_v47 = vld [vmem:[%s6925_s8 + $0xb0] sm:$0xf0]  ;;  %v5882_v53 = vld [vmem:[%s6925_s8 + $0x3c] sm:$0xf]  ;;  %v6044_v27 = vld [vmem:[%s6925_s8 + $0x54c] sm:$0xf] }
 0x146   : > { %5848 = vmatmul.msk.bf16.vlgmr.msra.gmra.mxu0 %vm1844_vm0, %v7029_v10  ;;  %5849 = vmatmul.msk.bf16.vlgmr.msra.gmra.mxu1 %vm1844_vm0, %v7029_v10  ;;  %v5004_v54 = vld [vmem:[%s6925_s8 + $0xb8] sm:$0xf0]  ;;  %v5660_v30 = vld [vmem:[%s6925_s8 + $0x5c8] sm:$0xf0] }
 0x147   : > { %3544 = vmatpush.bf16.msrb.mxu0 %v5763_v57  ;;  %3557 = vmatpush.bf16.msrb.mxu1 %v5767_v52  ;;  %v5387_v57 = vor.u32 %v5994_v50, %v5386_v48  ;;  %v5250_v52 = vld [vmem:[%s6925_s8 + $0x230] sm:$0xf]  ;;  %v2119_v61 = vpop.f32.mrf.mxu0  ;;  %v5002_v48 = vld [vmem:[%s6925_s8 + $0x38] sm:$0xf]  ;;  %v5007_v5 = vor.u32 %v5882_v53, %v5004_v54  ;;  %v5532_v53 = vld [vmem:[%s6925_s8 + $0x4c8] sm:$0xf0] }
 0x148   : > { %3570 = vmatpush.bf16.msrb.mxu2 %v5771_v58  ;;  %5851 = vmatmul.msk.bf16.vlgmr.msra.gmra.mxu3 %vm1844_vm0, %v7029_v10  ;;  %v5961_v58 = vld [vmem:[%s6925_s8 + $0x2ac] sm:$0xf0]  ;;  %v2145_v8 = vpop.f32.mrf.mxu2  ;;  %v6092_v61 = vld [vmem:[%s6925_s8 + $0x6c4] sm:$0xf0] }
 0x149   : > { %3583 = vmatpush.bf16.msrb.mxu3 %v5775_v63  ;;  %5850 = vmatmul.msk.bf16.vlgmr.msra.gmra.mxu2 %vm1844_vm0, %v7029_v10  ;;  %v5252_v63 = vld [vmem:[%s6925_s8 + $0x2b0] sm:$0xf0] }
 0x14b   : > { %3545 = vmatpush.bf16.msrb.mxu0 %v5635_v11  ;;  %3558 = vmatpush.bf16.msrb.mxu1 %v5639_v12  ;;  %v5251_v11 = vor.u32 %v5961_v58, %v5250_v52  ;;  %v2158_v12 = vpop.f32.mrf.mxu3  ;;  %v5780_v58 = vld [vmem:[%s6925_s8 + $0x6c0] sm:$0xf0] }
 0x14c   : > { %3571 = vmatpush.bf16.msrb.mxu2 %v5643_v13  ;;  %v5255_v13 = vor.u32 %v5945_v60, %v5252_v63  ;;  %v5786_v60 = vld [vmem:[%s6925_s8 + $0x648] sm:$0xf]  ;;  %v5003_v63 = vor.u32 %v5898_v51, %v5002_v48  ;;  %v5650_v12 = vld [vmem:[%s6925_s8 + $0x540] sm:$0xf]  ;;  %v6012_v51 = vld [vmem:[%s6925_s8 + $0x44c] sm:$0xf] }
 0x14d   : > { %3584 = vmatpush.bf16.msrb.mxu3 %v5647_v20  ;;  %v5913_v20 = vld [vmem:[%s6925_s8 + $0x134] sm:$0xf]  ;;  %v5530_v48 = vld [vmem:[%s6925_s8 + $0x448] sm:$0xf] }
 0x14e   : > { %v5127_v41 = vor.u32 %v5913_v20, %v5124_v25  ;;  %v5658_v20 = vld [vmem:[%s6925_s8 + $0x548] sm:$0xf] }
 0x14f   : > { %3546 = vmatpush.bf16.msrb.mxu0 %v5507_v35  ;;  %3559 = vmatpush.bf16.msrb.mxu1 %v5511_v37  ;;  %v5132_v35 = vld [vmem:[%s6925_s8 + $0x1b8] sm:$0xf0]  ;;  %v5123_v37 = vor.u32 %v5929_v17, %v5122_v16  ;;  %v5791_v16 = vor.u32 %v6076_v0, %v5788_v3  ;;  %v5652_v17 = vld [vmem:[%s6925_s8 + $0x5c0] sm:$0xf0]  ;;  %v5402_v0 = vld [vmem:[%s6925_s8 + $0x348] sm:$0xf] }
 0x150   : > { %3572 = vmatpush.bf16.msrb.mxu2 %v5515_v39  ;;  %v4994_v39 = vld [vmem:[%s6925_s8 + $0x30] sm:$0xf]  ;;  %v5135_v50 = vor.u32 %v5914_v32, %v5132_v35  ;;  %v5996_v3 = vld [vmem:[%s6925_s8 + $0x3c4] sm:$0xf0] }
 0x151   : > { %3585 = vmatpush.bf16.msrb.mxu3 %v5519_v45  ;;  %v5881_v45 = vld [vmem:[%s6925_s8 + $0x34] sm:$0xf]  ;;  %v4995_v52 = vor.u32 %v5897_v40, %v4994_v39  ;;  %v5522_v40 = vld [vmem:[%s6925_s8 + $0x440] sm:$0xf] }
 0x153   : > { %3547 = vmatpush.bf16.msrb.mxu0 %v5379_v55  ;;  %3560 = vmatpush.bf16.msrb.mxu1 %v5383_v56  ;;  %v5778_v55 = vld [vmem:[%s6925_s8 + $0x640] sm:$0xf]  ;;  %v7245_v25 = vpop.f32.mrf.mxu0  ;;  %v7249_v32 = vpop.f32.mrf.mxu1 }
 0x154   : > { %3573 = vmatpush.bf16.msrb.mxu2 %v5387_v57  ;;  %v6091_v56 = vld [vmem:[%s6925_s8 + $0x6bc] sm:$0xf0]  ;;  %v6075_v57 = vld [vmem:[%s6925_s8 + $0x644] sm:$0xf] }
 0x155   : > { %3586 = vmatpush.bf16.msrb.mxu3 %v5391_v62  ;;  %v4999_v62 = vor.u32 %v5881_v45, %v4996_v47  ;;  %v5779_v7 = vor.u32 %v6091_v56, %v5778_v55  ;;  %v5783_v8 = vor.u32 %v6075_v57, %v5780_v58  ;;  %v5663_v45 = vor.u32 %v6044_v27, %v5660_v30  ;;  %v5524_v47 = vld [vmem:[%s6925_s8 + $0x4c0] sm:$0xf0]  ;;  %v5394_v58 = vld [vmem:[%s6925_s8 + $0x340] sm:$0xf]  ;;  %v5274_v30 = vld [vmem:[%s6925_s8 + $0x248] sm:$0xf] }
 0x156   : > { %v5268_v27 = vld [vmem:[%s6925_s8 + $0x2c0] sm:$0xf0] }
 0x157   : > { %3548 = vmatpush.bf16.msrb.mxu0 %v5251_v11  ;;  %3561 = vmatpush.bf16.msrb.mxu1 %v5255_v13  ;;  %v5787_v11 = vor.u32 %v6092_v61, %v5786_v60  ;;  %v6059_v13 = vld [vmem:[%s6925_s8 + $0x5bc] sm:$0xf0]  ;;  %v5979_v61 = vld [vmem:[%s6925_s8 + $0x344] sm:$0xf] }
 0x158   : > { %3574 = vmatpush.bf16.msrb.mxu2 %v5259_v15  ;;  %v6043_v15 = vld [vmem:[%s6925_s8 + $0x544] sm:$0xf]  ;;  %v5651_v35 = vor.u32 %v6059_v13, %v5650_v12  ;;  %v5995_v60 = vld [vmem:[%s6925_s8 + $0x3bc] sm:$0xf0] }
 0x159   : > { %3587 = vmatpush.bf16.msrb.mxu3 %v5263_v21  ;;  %v6060_v21 = vld [vmem:[%s6925_s8 + $0x5c4] sm:$0xf0]  ;;  %v5395_v12 = vor.u32 %v5995_v60, %v5394_v58  ;;  %v5916_v58 = vld [vmem:[%s6925_s8 + $0x14c] sm:$0xf] }
 0x15a   : > { %v5659_v39 = vor.u32 %v6060_v21, %v5658_v20  ;;  %v5947_v20 = vld [vmem:[%s6925_s8 + $0x244] sm:$0xf]  ;;  %v5148_v60 = vld [vmem:[%s6925_s8 + $0x1c8] sm:$0xf0] }
 0x15b   : > { %3549 = vmatpush.bf16.msrb.mxu0 %v5123_v37  ;;  %3562 = vmatpush.bf16.msrb.mxu1 %v5127_v41  ;;  %v5655_v37 = vor.u32 %v6043_v15, %v5652_v17  ;;  %v6027_v41 = vld [vmem:[%s6925_s8 + $0x4bc] sm:$0xf0]  ;;  %v7269_v56 = vpop.f32.mrf.mxu3  ;;  %v5403_v15 = vor.u32 %v5996_v3, %v5402_v0 }
 0x15c   : > { %3575 = vmatpush.bf16.msrb.mxu2 %v5131_v43  ;;  %v6011_v43 = vld [vmem:[%s6925_s8 + $0x444] sm:$0xf]  ;;  %v7265_v54 = vpop.f32.mrf.mxu2  ;;  %v5523_v55 = vor.u32 %v6027_v41, %v5522_v40  ;;  %v5963_v17 = vld [vmem:[%s6925_s8 + $0x2bc] sm:$0xf0] }
 0x15d   : > { %3588 = vmatpush.bf16.msrb.mxu3 %v5135_v50  ;;  %v6028_v50 = vld [vmem:[%s6925_s8 + $0x4c4] sm:$0xf0]  ;;  %v5527_v57 = vor.u32 %v6011_v43, %v5524_v47 }
 0x15f   : > { %3550 = vmatpush.bf16.msrb.mxu0 %v4995_v52  ;;  %3563 = vmatpush.bf16.msrb.mxu1 %v4999_v62  ;;  %v5531_v52 = vor.u32 %v6028_v50, %v5530_v48  ;;  %v5535_v62 = vor.u32 %v6012_v51, %v5532_v53  ;;  %v5138_v48 = vld [vmem:[%s6925_s8 + $0x140] sm:$0xf]  ;;  %v5915_v51 = vld [vmem:[%s6925_s8 + $0x144] sm:$0xf] }
 0x160   : > { %3576 = vmatpush.bf16.msrb.mxu2 %v5003_v63  ;;  %v5396_v63 = vld [vmem:[%s6925_s8 + $0x3c0] sm:$0xf0]  ;;  %v5931_v50 = vld [vmem:[%s6925_s8 + $0x1bc] sm:$0xf0] }
 0x161   : > { %3589 = vmatpush.bf16.msrb.mxu3 %v5007_v5  ;;  %v2171_v5 = vpop.f32.mrf.mxu0  ;;  %v5399_v13 = vor.u32 %v5979_v61, %v5396_v63  ;;  %v5139_v61 = vor.u32 %v5931_v50, %v5138_v48  ;;  %v5899_v63 = vld [vmem:[%s6925_s8 + $0xbc] sm:$0xf0]  ;;  %v5666_v50 = vld [vmem:[%s6925_s8 + $0x550] sm:$0xf] }
 0x162   : > { %5852 = vmatmul.msk.bf16.vlgmr.msrb.gmra.mxu0 %vm1844_vm0, %v7029_v10  ;;  %5853 = vmatmul.msk.bf16.vlgmr.msrb.gmra.mxu1 %vm1844_vm0, %v7029_v10  ;;  %v5883_v5 = vld [vmem:[%s6925_s8 + $0x44] sm:$0xf] }
 0x163   : > { %3596 = vmatpush.bf16.msra.mxu0 %v5779_v7  ;;  %3609 = vmatpush.bf16.msra.mxu1 %v5783_v8  ;;  %v5980_v7 = vld [vmem:[%s6925_s8 + $0x34c] sm:$0xf]  ;;  %v2210_v43 = vpop.f32.mrf.mxu3 }
 0x164   : > { %3622 = vmatpush.bf16.msra.mxu2 %v5787_v11  ;;  %5855 = vmatmul.msk.bf16.vlgmr.msrb.gmra.mxu3 %vm1844_vm0, %v7029_v10  ;;  %v5404_v8 = vld [vmem:[%s6925_s8 + $0x3c8] sm:$0xf0]  ;;  %v2184_v11 = vpop.f32.mrf.mxu1  ;;  %v2197_v40 = vpop.f32.mrf.mxu2 }
 0x165   : > { %3635 = vmatpush.bf16.msra.mxu3 %v5791_v16  ;;  %5854 = vmatmul.msk.bf16.vlgmr.msrb.gmra.mxu2 %vm1844_vm0, %v7029_v10  ;;  %v5266_v16 = vld [vmem:[%s6925_s8 + $0x240] sm:$0xf]  ;;  %v5407_v21 = vor.u32 %v5980_v7, %v5404_v8  ;;  %v5012_v7 = vld [vmem:[%s6925_s8 + $0xc0] sm:$0xf0]  ;;  %v5018_v8 = vld [vmem:[%s6925_s8 + $0x48] sm:$0xf]  ;;  %v5151_v11 = vor.u32 %v5916_v58, %v5148_v60 }
 0x166   : > { %v5267_v41 = vor.u32 %v5963_v17, %v5266_v16  ;;  %v5794_v16 = vld [vmem:[%s6925_s8 + $0x650] sm:$0xf]  ;;  %v6078_v40 = vld [vmem:[%s6925_s8 + $0x65c] sm:$0xf]  ;;  %v5674_v58 = vld [vmem:[%s6925_s8 + $0x558] sm:$0xf] }
 0x167   : > { %3597 = vmatpush.bf16.msra.mxu0 %v5651_v35  ;;  %3610 = vmatpush.bf16.msra.mxu1 %v5655_v37  ;;  %v5964_v35 = vld [vmem:[%s6925_s8 + $0x2c4] sm:$0xf0]  ;;  %v5948_v37 = vld [vmem:[%s6925_s8 + $0x24c] sm:$0xf]  ;;  %v6093_v17 = vld [vmem:[%s6925_s8 + $0x6cc] sm:$0xf0] }
 0x168   : > { %3623 = vmatpush.bf16.msra.mxu2 %v5659_v39  ;;  %v5276_v39 = vld [vmem:[%s6925_s8 + $0x2c8] sm:$0xf0]  ;;  %v5275_v47 = vor.u32 %v5964_v35, %v5274_v30  ;;  %v5802_v30 = vld [vmem:[%s6925_s8 + $0x658] sm:$0xf] }
 0x169   : > { %3636 = vmatpush.bf16.msra.mxu3 %v5663_v45  ;;  %v5271_v45 = vor.u32 %v5947_v20, %v5268_v27  ;;  %v5279_v53 = vor.u32 %v5948_v37, %v5276_v39  ;;  %v6077_v20 = vld [vmem:[%s6925_s8 + $0x654] sm:$0xf]  ;;  %v6094_v35 = vld [vmem:[%s6925_s8 + $0x6d4] sm:$0xf0]  ;;  %v5015_v37 = vor.u32 %v5883_v5, %v5012_v7  ;;  %v5538_v7 = vld [vmem:[%s6925_s8 + $0x450] sm:$0xf] }
 0x16a   : > { %v5796_v27 = vld [vmem:[%s6925_s8 + $0x6d0] sm:$0xf0]  ;;  %v5803_v48 = vor.u32 %v6094_v35, %v5802_v30  ;;  %v6062_v60 = vld [vmem:[%s6925_s8 + $0x5d4] sm:$0xf0] }
 0x16b   : > { %3598 = vmatpush.bf16.msra.mxu0 %v5523_v55  ;;  %3611 = vmatpush.bf16.msra.mxu1 %v5527_v57  ;;  %v5140_v55 = vld [vmem:[%s6925_s8 + $0x1c0] sm:$0xf0]  ;;  %v5146_v57 = vld [vmem:[%s6925_s8 + $0x148] sm:$0xf]  ;;  %v5675_v5 = vor.u32 %v6062_v60, %v5674_v58 }
 0x16c   : > { %3624 = vmatpush.bf16.msra.mxu2 %v5531_v52  ;;  %v5932_v52 = vld [vmem:[%s6925_s8 + $0x1c4] sm:$0xf0]  ;;  %v5143_v0 = vor.u32 %v5915_v51, %v5140_v55  ;;  %v6061_v51 = vld [vmem:[%s6925_s8 + $0x5cc] sm:$0xf0] }
 0x16d   : > { %3637 = vmatpush.bf16.msra.mxu3 %v5535_v62  ;;  %v5010_v62 = vld [vmem:[%s6925_s8 + $0x40] sm:$0xf]  ;;  %v5147_v3 = vor.u32 %v5932_v52, %v5146_v57  ;;  %v5668_v52 = vld [vmem:[%s6925_s8 + $0x5d0] sm:$0xf0] }
 0x16f   : > { %3599 = vmatpush.bf16.msra.mxu0 %v5395_v12  ;;  %3612 = vmatpush.bf16.msra.mxu1 %v5399_v13  ;;  %v5900_v12 = vld [vmem:[%s6925_s8 + $0xc4] sm:$0xf0]  ;;  %v5884_v13 = vld [vmem:[%s6925_s8 + $0x4c] sm:$0xf]  ;;  %v7314_v55 = vpop.f32.mrf.mxu0 }
 0x170   : > { %3625 = vmatpush.bf16.msra.mxu2 %v5403_v15  ;;  %v5020_v15 = vld [vmem:[%s6925_s8 + $0xc8] sm:$0xf0]  ;;  %v5019_v39 = vor.u32 %v5900_v12, %v5018_v8  ;;  %v6029_v8 = vld [vmem:[%s6925_s8 + $0x4cc] sm:$0xf0] }
 0x171   : > { %3638 = vmatpush.bf16.msra.mxu3 %v5407_v21  ;;  %v5011_v21 = vor.u32 %v5899_v63, %v5010_v62  ;;  %v5023_v43 = vor.u32 %v5884_v13, %v5020_v15  ;;  %v6046_v62 = vld [vmem:[%s6925_s8 + $0x55c] sm:$0xf]  ;;  %v5540_v13 = vld [vmem:[%s6925_s8 + $0x4d0] sm:$0xf0]  ;;  %v5546_v15 = vld [vmem:[%s6925_s8 + $0x458] sm:$0xf] }
 0x172   : > { %v5676_v63 = vld [vmem:[%s6925_s8 + $0x5d8] sm:$0xf0] }
 0x173   : > { %3600 = vmatpush.bf16.msra.mxu0 %v5267_v41  ;;  %3613 = vmatpush.bf16.msra.mxu1 %v5271_v45  ;;  %v5804_v41 = vld [vmem:[%s6925_s8 + $0x6d8] sm:$0xf0]  ;;  %v5795_v45 = vor.u32 %v6093_v17, %v5794_v16  ;;  %v5679_v12 = vor.u32 %v6046_v62, %v5676_v63  ;;  %v6030_v16 = vld [vmem:[%s6925_s8 + $0x4d4] sm:$0xf0]  ;;  %v7334_v17 = vld [vmem:[%s7625_s2] sm:$0x1] }
 0x174   : > { %3626 = vmatpush.bf16.msra.mxu2 %v5275_v47  ;;  %v5799_v47 = vor.u32 %v6077_v20, %v5796_v27  ;;  %v5807_v57 = vor.u32 %v6078_v40, %v5804_v41  ;;  %v6014_v20 = vld [vmem:[%s6925_s8 + $0x45c] sm:$0xf]  ;;  %v5547_v35 = vor.u32 %v6030_v16, %v5546_v15  ;;  %v5981_v40 = vld [vmem:[%s6925_s8 + $0x354] sm:$0xf]  ;;  %v5282_v62 = vld [vmem:[%s6925_s8 + $0x250] sm:$0xf] }
 0x175   : > { %3639 = vmatpush.bf16.msra.mxu3 %v5279_v53  ;;  %v6045_v53 = vld [vmem:[%s6925_s8 + $0x554] sm:$0xf]  ;;  %v5965_v63 = vld [vmem:[%s6925_s8 + $0x2cc] sm:$0xf0] }
 0x177   : > { %3601 = vmatpush.bf16.msra.mxu0 %v5139_v61  ;;  %3614 = vmatpush.bf16.msra.mxu1 %v5143_v0  ;;  %v7319_v61 = vpop.f32.mrf.mxu1  ;;  %v5667_v0 = vor.u32 %v6061_v51, %v5666_v50  ;;  %v7349_v41 = vpop.f32.mrf.mxu3  ;;  %v5998_v50 = vld [vmem:[%s6925_s8 + $0x3d4] sm:$0xf0] }
 0x178   : > { %3627 = vmatpush.bf16.msra.mxu2 %v5147_v3  ;;  %v5671_v3 = vor.u32 %v6045_v53, %v5668_v52  ;;  %v7344_v27 = vpop.f32.mrf.mxu2  ;;  %v5982_v53 = vld [vmem:[%s6925_s8 + $0x35c] sm:$0xf] }
 0x179   : > { %3640 = vmatpush.bf16.msra.mxu3 %v5151_v11  ;;  %v6013_v11 = vld [vmem:[%s6925_s8 + $0x454] sm:$0xf] }
 0x17a   : > { %v5543_v30 = vor.u32 %v6013_v11, %v5540_v13  ;;  %v5950_v11 = vld [vmem:[%s6925_s8 + $0x25c] sm:$0xf]  ;;  %v5283_v13 = vor.u32 %v5965_v63, %v5282_v62  ;;  %v5902_v63 = vld [vmem:[%s6925_s8 + $0xd4] sm:$0xf0] }
 0x17b   : > { %3602 = vmatpush.bf16.msra.mxu0 %v5011_v21  ;;  %3615 = vmatpush.bf16.msra.mxu1 %v5015_v37  ;;  %v5539_v21 = vor.u32 %v6029_v8, %v5538_v7  ;;  %v5410_v37 = vld [vmem:[%s6925_s8 + $0x350] sm:$0xf]  ;;  %v5290_v7 = vld [vmem:[%s6925_s8 + $0x258] sm:$0xf] }
 0x17c   : > { %3628 = vmatpush.bf16.msra.mxu2 %v5019_v39  ;;  %v5997_v39 = vld [vmem:[%s6925_s8 + $0x3cc] sm:$0xf0]  ;;  %v5966_v8 = vld [vmem:[%s6925_s8 + $0x2d4] sm:$0xf0] }
 0x17d   : > { %3641 = vmatpush.bf16.msra.mxu3 %v5023_v43  ;;  %v2223_v43 = vpop.f32.mrf.mxu0  ;;  %v5411_v52 = vor.u32 %v5997_v39, %v5410_v37  ;;  %v5156_v39 = vld [vmem:[%s6925_s8 + $0x1d0] sm:$0xf0] }
 0x17e   : > { %5856 = vmatmul.msk.bf16.vlgmr.msra.gmra.mxu0 %vm1844_vm0, %v7029_v10  ;;  %5857 = vmatmul.msk.bf16.vlgmr.msra.gmra.mxu1 %vm1844_vm0, %v7334_v17  ;;  %v5548_v10 = vld [vmem:[%s6925_s8 + $0x4d8] sm:$0xf0]  ;;  %v5934_v43 = vld [vmem:[%s6925_s8 + $0x1d4] sm:$0xf0] }
 0x17f   : > { %3648 = vmatpush.bf16.msrb.mxu0 %v5795_v45  ;;  %3661 = vmatpush.bf16.msrb.mxu1 %v5799_v47  ;;  %v5551_v45 = vor.u32 %v6014_v20, %v5548_v10  ;;  %v5412_v47 = vld [vmem:[%s6925_s8 + $0x3d0] sm:$0xf0]  ;;  %v2236_v51 = vpop.f32.mrf.mxu1  ;;  %v5291_v20 = vor.u32 %v5966_v8, %v5290_v7  ;;  %v5154_v10 = vld [vmem:[%s6925_s8 + $0x150] sm:$0xf]  ;;  %v6095_v7 = vld [vmem:[%s6925_s8 + $0x6dc] sm:$0xf0] }
 0x180   : > { %3674 = vmatpush.bf16.msrb.mxu2 %v5803_v48  ;;  %5859 = vmatmul.msk.bf16.vlgmr.msra.gmra.mxu3 %vm1844_vm0, %v7334_v17  ;;  %v5418_v48 = vld [vmem:[%s6925_s8 + $0x358] sm:$0xf]  ;;  %v5415_v58 = vor.u32 %v5981_v40, %v5412_v47  ;;  %v2249_v15 = vpop.f32.mrf.mxu2  ;;  %v5164_v47 = vld [vmem:[%s6925_s8 + $0x1d8] sm:$0xf0]  ;;  %v5901_v51 = vld [vmem:[%s6925_s8 + $0xcc] sm:$0xf0] }
 0x181   : > { %3687 = vmatpush.bf16.msrb.mxu3 %v5807_v57  ;;  %5858 = vmatmul.msk.bf16.vlgmr.msra.gmra.mxu2 %vm1844_vm0, %v7334_v17  ;;  %v5420_v57 = vld [vmem:[%s6925_s8 + $0x3d8] sm:$0xf0]  ;;  %v5419_v60 = vor.u32 %v5998_v50, %v5418_v48  ;;  %v5162_v40 = vld [vmem:[%s6925_s8 + $0x158] sm:$0xf]  ;;  %v5026_v50 = vld [vmem:[%s6925_s8 + $0x50] sm:$0xf] }
 0x182   : > { %v6079_v8 = vld [vmem:[%s6925_s8 + $0x664] sm:$0xf]  ;;  %v6096_v15 = vld [vmem:[%s6925_s8 + $0x6e4] sm:$0xf0] }
 0x183   : > { %3649 = vmatpush.bf16.msrb.mxu0 %v5667_v0  ;;  %3662 = vmatpush.bf16.msrb.mxu1 %v5671_v3  ;;  %v5949_v0 = vld [vmem:[%s6925_s8 + $0x254] sm:$0xf]  ;;  %v5423_v3 = vor.u32 %v5982_v53, %v5420_v57  ;;  %v5163_v57 = vor.u32 %v5934_v43, %v5162_v40  ;;  %v5682_v43 = vld [vmem:[%s6925_s8 + $0x560] sm:$0xf] }
 0x184   : > { %3675 = vmatpush.bf16.msrb.mxu2 %v5675_v5  ;;  %v5284_v5 = vld [vmem:[%s6925_s8 + $0x2d0] sm:$0xf0] }
 0x185   : > { %3688 = vmatpush.bf16.msrb.mxu3 %v5679_v12  ;;  %v5292_v12 = vld [vmem:[%s6925_s8 + $0x2d8] sm:$0xf0]  ;;  %v5287_v16 = vor.u32 %v5949_v0, %v5284_v5  ;;  %v5810_v5 = vld [vmem:[%s6925_s8 + $0x660] sm:$0xf] }
 0x186   : > { %v5295_v37 = vor.u32 %v5950_v11, %v5292_v12  ;;  %v5886_v0 = vld [vmem:[%s6925_s8 + $0x5c] sm:$0xf]  ;;  %v5027_v11 = vor.u32 %v5901_v51, %v5026_v50  ;;  %v5812_v12 = vld [vmem:[%s6925_s8 + $0x6e0] sm:$0xf0] }
 0x187   : > { %3650 = vmatpush.bf16.msrb.mxu0 %v5539_v21  ;;  %3663 = vmatpush.bf16.msrb.mxu1 %v5543_v30  ;;  %v5933_v21 = vld [vmem:[%s6925_s8 + $0x1cc] sm:$0xf0]  ;;  %v5917_v30 = vld [vmem:[%s6925_s8 + $0x154] sm:$0xf]  ;;  %v5684_v51 = vld [vmem:[%s6925_s8 + $0x5e0] sm:$0xf0] }
 0x188   : > { %3676 = vmatpush.bf16.msrb.mxu2 %v5547_v35  ;;  %v2262_v35 = vpop.f32.mrf.mxu3  ;;  %v5155_v48 = vor.u32 %v5933_v21, %v5154_v10  ;;  %v5159_v53 = vor.u32 %v5917_v30, %v5156_v39  ;;  %v6080_v10 = vld [vmem:[%s6925_s8 + $0x66c] sm:$0xf] }
 0x189   : > { %3689 = vmatpush.bf16.msrb.mxu3 %v5551_v45  ;;  %v5918_v45 = vld [vmem:[%s6925_s8 + $0x15c] sm:$0xf]  ;;  %v5820_v21 = vld [vmem:[%s6925_s8 + $0x6e8] sm:$0xf0]  ;;  %v5811_v35 = vor.u32 %v6095_v7, %v5810_v5  ;;  %v5554_v5 = vld [vmem:[%s6925_s8 + $0x460] sm:$0xf] }
 0x18a   : > { %v5167_v62 = vor.u32 %v5918_v45, %v5164_v47  ;;  %v6063_v45 = vld [vmem:[%s6925_s8 + $0x5dc] sm:$0xf0]  ;;  %v6047_v47 = vld [vmem:[%s6925_s8 + $0x564] sm:$0xf] }
 0x18b   : > { %3651 = vmatpush.bf16.msrb.mxu0 %v5411_v52  ;;  %3664 = vmatpush.bf16.msrb.mxu1 %v5415_v58  ;;  %v5885_v52 = vld [vmem:[%s6925_s8 + $0x54] sm:$0xf]  ;;  %v3396_v40 = vpop.f32.mrf.mxu0  ;;  %v3409_v50 = vpop.f32.mrf.mxu1  ;;  %v6031_v7 = vld [vmem:[%s6925_s8 + $0x4dc] sm:$0xf0] }
 0x18c   : > { %3677 = vmatpush.bf16.msrb.mxu2 %v5419_v60  ;;  %v5028_v58 = vld [vmem:[%s6925_s8 + $0xd0] sm:$0xf0]  ;;  %v5034_v60 = vld [vmem:[%s6925_s8 + $0x58] sm:$0xf] }
 0x18d   : > { %3690 = vmatpush.bf16.msrb.mxu3 %v5423_v3  ;;  %v5036_v3 = vld [vmem:[%s6925_s8 + $0xd8] sm:$0xf0] }
 0x18e   : > { %v5039_v30 = vor.u32 %v5886_v0, %v5036_v3  ;;  %v5687_v0 = vor.u32 %v6047_v47, %v5684_v51  ;;  %v5983_v47 = vld [vmem:[%s6925_s8 + $0x364] sm:$0xf] }
 0x18f   : > { %3652 = vmatpush.bf16.msrb.mxu0 %v5283_v13  ;;  %3665 = vmatpush.bf16.msrb.mxu1 %v5287_v16  ;;  %v5818_v13 = vld [vmem:[%s6925_s8 + $0x668] sm:$0xf]  ;;  %v5031_v16 = vor.u32 %v5885_v52, %v5028_v58  ;;  %v6048_v52 = vld [vmem:[%s6925_s8 + $0x56c] sm:$0xf] }
 0x190   : > { %3678 = vmatpush.bf16.msrb.mxu2 %v5291_v20  ;;  %v5035_v20 = vor.u32 %v5902_v63, %v5034_v60  ;;  %v5819_v39 = vor.u32 %v6096_v15, %v5818_v13  ;;  %v5692_v58 = vld [vmem:[%s6925_s8 + $0x5e8] sm:$0xf0]  ;;  %v3410_v60 = vadd.f32 %v3409_v50, %v6798_v24  ;;  %v7397_v63 = vpop.permute.xlu0 %3806  ;;  %v5562_v13 = vld [vmem:[%s6925_s8 + $0x468] sm:$0xf]  ;;  %v3397_v50 = vadd.f32 %v3396_v40, %v6810_v29 }
 0x191   : > { %3691 = vmatpush.bf16.msrb.mxu3 %v5295_v37  ;;  %v5815_v37 = vor.u32 %v6079_v8, %v5812_v12  ;;  %v6015_v8 = vld [vmem:[%s6925_s8 + $0x464] sm:$0xf]  ;;  %v6032_v24 = vld [vmem:[%s6925_s8 + $0x4e4] sm:$0xf0]  ;;  %v6016_v15 = vld [vmem:[%s6925_s8 + $0x46c] sm:$0xf] }
 0x192   : > { %v5556_v12 = vld [vmem:[%s6925_s8 + $0x4e0] sm:$0xf0] }
 0x193   : > { %3653 = vmatpush.bf16.msrb.mxu0 %v5155_v48  ;;  %3666 = vmatpush.bf16.msrb.mxu1 %v5159_v53  ;;  %v5823_v48 = vor.u32 %v6080_v10, %v5820_v21  ;;  %v5690_v53 = vld [vmem:[%s6925_s8 + $0x568] sm:$0xf]  ;;  %v3810_v10 = vadd.f32 %v7397_v63, %v3410_v60  ;;  %v5555_v21 = vor.u32 %v6031_v7, %v5554_v5  ;;  %v5967_v5 = vld [vmem:[%s6925_s8 + $0x2dc] sm:$0xf0] }
 0x194   : > { %3679 = vmatpush.bf16.msrb.mxu2 %v5163_v57  ;;  %v6064_v57 = vld [vmem:[%s6925_s8 + $0x5e4] sm:$0xf0] }
 0x195   : > { %3692 = vmatpush.bf16.msrb.mxu3 %v5167_v62  ;;  %v5683_v62 = vor.u32 %v6063_v45, %v5682_v43  ;;  %v5691_v3 = vor.u32 %v6064_v57, %v5690_v53  ;;  %v5426_v43 = vld [vmem:[%s6925_s8 + $0x360] sm:$0xf]  ;;  %v5428_v57 = vld [vmem:[%s6925_s8 + $0x3e0] sm:$0xf0]  ;;  %v3873_v29 = vrot.slane %v3810_v10, 6 }
 0x196   : > { %v5999_v45 = vld [vmem:[%s6925_s8 + $0x3dc] sm:$0xf0]  ;;  %v5968_v10 = vld [vmem:[%s6925_s8 + $0x2e4] sm:$0xf0] }
 0x197   : > { %3654 = vmatpush.bf16.msrb.mxu0 %v5027_v11  ;;  %3667 = vmatpush.bf16.msrb.mxu1 %v5031_v16  ;;  %v5695_v11 = vor.u32 %v6048_v52, %v5692_v58  ;;  %v5564_v16 = vld [vmem:[%s6925_s8 + $0x4e8] sm:$0xf0]  ;;  %v6000_v52 = vld [vmem:[%s6925_s8 + $0x3e4] sm:$0xf0]  ;;  %v3411_v58 = vpop.f32.mrf.mxu1  ;;  %v5427_v40 = vor.u32 %v5999_v45, %v5426_v43 }
 0x198   : > { %3680 = vmatpush.bf16.msrb.mxu2 %v5035_v20  ;;  %v3422_v20 = vpop.f32.mrf.mxu2  ;;  %v5567_v53 = vor.u32 %v6016_v15, %v5564_v16  ;;  %v5178_v58 = vld [vmem:[%s6925_s8 + $0x168] sm:$0xf] }
 0x199   : > { %3693 = vmatpush.bf16.msrb.mxu3 %v5039_v30  ;;  %v3423_v30 = vadd.f32 %v3422_v20, %v6821_v38  ;;  %v5434_v38 = vld [vmem:[%s6925_s8 + $0x368] sm:$0xf] }
 0x19a   : > { %5860 = vmatmul.msk.bf16.vlgmr.msrb.gmra.mxu0 %vm1844_vm0, %v7334_v17  ;;  %5861 = vmatmul.msk.bf16.vlgmr.msrb.gmra.mxu1 %vm1844_vm0, %v7334_v17  ;;  %v5306_v20 = vld [vmem:[%s6925_s8 + $0x268] sm:$0xf] }
 0x19b   : > { %3700 = vmatpush.bf16.msra.mxu0 %v5811_v35  ;;  %3713 = vmatpush.bf16.msra.mxu1 %v5815_v37  ;;  %v3435_v35 = vpop.f32.mrf.mxu3  ;;  %v5559_v37 = vor.u32 %v6015_v8, %v5556_v12  ;;  %v3811_v60 = vadd.f32 %v7397_v63, %v3423_v30  ;;  %v5431_v8 = vor.u32 %v5983_v47, %v5428_v57  ;;  %v5951_v12 = vld [vmem:[%s6925_s8 + $0x264] sm:$0xf]  ;;  %v5308_v30 = vld [vmem:[%s6925_s8 + $0x2e8] sm:$0xf0] }
 0x19c   : > { %3726 = vmatpush.bf16.msra.mxu2 %v5819_v39  ;;  %5863 = vmatmul.msk.bf16.vlgmr.msrb.gmra.mxu3 %vm1844_vm0, %v7334_v17  ;;  %v5563_v39 = vor.u32 %v6032_v24, %v5562_v13  ;;  %v3436_v51 = vadd.f32 %v3435_v35, %v6830_v46  ;;  %v5298_v46 = vld [vmem:[%s6925_s8 + $0x260] sm:$0xf]  ;;  %v5300_v13 = vld [vmem:[%s6925_s8 + $0x2e0] sm:$0xf0]  ;;  %v3809_v24 = vadd.f32 %v7397_v63, %v3397_v50 }
 0x19d   : > { %3739 = vmatpush.bf16.msra.mxu3 %v5823_v48  ;;  %5862 = vmatmul.msk.bf16.vlgmr.msrb.gmra.mxu2 %vm1844_vm0, %v7334_v17  ;;  %v3398_v48 = vpop.f32.mrf.mxu0  ;;  %v3874_v7 = vrot.slane %v3811_v60, 4  ;;  %v5303_v47 = vor.u32 %v5951_v12, %v5300_v13  ;;  %v5170_v50 = vld [vmem:[%s6925_s8 + $0x160] sm:$0xf]  ;;  %v5936_v60 = vld [vmem:[%s6925_s8 + $0x1e4] sm:$0xf0] }
 0x19e   : > { %v3898_v35 = vsel %vm3897_vm1, %v3809_v24, %v3873_v29  ;;  %v5307_v48 = vor.u32 %v5968_v10, %v5306_v20  ;;  %v5042_v29 = vld [vmem:[%s6925_s8 + $0x60] sm:$0xf]  ;;  %v5904_v13 = vld [vmem:[%s6925_s8 + $0xe4] sm:$0xf0]  ;;  %v5888_v24 = vld [vmem:[%s6925_s8 + $0x6c] sm:$0xf] }
 0x19f   : > { %3701 = vmatpush.bf16.msra.mxu0 %v5683_v62  ;;  %3714 = vmatpush.bf16.msra.mxu1 %v5687_v0  ;;  %v5984_v62 = vld [vmem:[%s6925_s8 + $0x36c] sm:$0xf]  ;;  %v6097_v20 = vld [vmem:[%s6925_s8 + $0x6ec] sm:$0xf0]  ;;  %v6081_v10 = vld [vmem:[%s6925_s8 + $0x674] sm:$0xf] }
 0x1a0   : > { %3727 = vmatpush.bf16.msra.mxu2 %v5691_v3  ;;  %v5436_v0 = vld [vmem:[%s6925_s8 + $0x3e8] sm:$0xf0]  ;;  %v3812_v3 = vadd.f32 %v7397_v63, %v3436_v51  ;;  %v3424_v43 = vpop.f32.mrf.mxu2  ;;  %v5935_v51 = vld [vmem:[%s6925_s8 + $0x1dc] sm:$0xf0] }
 0x1a1   : > { %3740 = vmatpush.bf16.msra.mxu3 %v5695_v11  ;;  %v5435_v11 = vor.u32 %v6000_v52, %v5434_v38  ;;  %v5439_v16 = vor.u32 %v5984_v62, %v5436_v0  ;;  %v5172_v52 = vld [vmem:[%s6925_s8 + $0x1e0] sm:$0xf0]  ;;  %v5920_v62 = vld [vmem:[%s6925_s8 + $0x16c] sm:$0xf] }
 0x1a2   : > { %v3875_v15 = vrot.slane %v3812_v3, 2  ;;  %v5180_v0 = vld [vmem:[%s6925_s8 + $0x1e8] sm:$0xf0]  ;;  %v5171_v3 = vor.u32 %v5935_v51, %v5170_v50 }
 0x1a3   : > { %3702 = vmatpush.bf16.msra.mxu0 %v5555_v21  ;;  %3715 = vmatpush.bf16.msra.mxu1 %v5559_v37  ;;  %v5952_v21 = vld [vmem:[%s6925_s8 + $0x26c] sm:$0xf]  ;;  %v3437_v57 = vpop.f32.mrf.mxu3  ;;  %v5183_v12 = vor.u32 %v5920_v62, %v5180_v0  ;;  %v5700_v0 = vld [vmem:[%s6925_s8 + $0x5f0] sm:$0xf0] }
 0x1a4   : > { %3728 = vmatpush.bf16.msra.mxu2 %v5563_v39  ;;  %v3900_v37 = vsel %vm3899_vm2, %v3874_v7, %v3875_v15  ;;  %v5299_v39 = vor.u32 %v5967_v5, %v5298_v46  ;;  %v5311_v38 = vor.u32 %v5952_v21, %v5308_v30  ;;  %v5179_v5 = vor.u32 %v5936_v60, %v5178_v58  ;;  %v5887_v7 = vld [vmem:[%s6925_s8 + $0x64] sm:$0xf]  ;;  %v5052_v15 = vld [vmem:[%s6925_s8 + $0xe8] sm:$0xf0]  ;;  %v5828_v30 = vld [vmem:[%s6925_s8 + $0x6f0] sm:$0xf0] }
 0x1a5   : > { %3741 = vmatpush.bf16.msra.mxu3 %v5567_v53  ;;  %v3902_v45 = vsel %vm3901_vm3, %v3898_v35, %v3900_v37  ;;  %v5919_v53 = vld [vmem:[%s6925_s8 + $0x164] sm:$0xf]  ;;  %v5834_v35 = vld [vmem:[%s6925_s8 + $0x678] sm:$0xf]  ;;  %v5831_v51 = vor.u32 %v6081_v10, %v5828_v30  ;;  %v6049_v58 = vld [vmem:[%s6925_s8 + $0x574] sm:$0xf] }
 0x1a6   : > { %3932 = vst [vmem:[%s7440_s18] sm:$0xff] %v3902_v45  ;;  %v5175_v46 = vor.u32 %v5919_v53, %v5172_v52  ;;  %v6098_v37 = vld [vmem:[%s6925_s8 + $0x6f4] sm:$0xf0]  ;;  %v6082_v45 = vld [vmem:[%s6925_s8 + $0x67c] sm:$0xf]  ;;  %v6065_v52 = vld [vmem:[%s6925_s8 + $0x5ec] sm:$0xf0] }
 0x1a7   : > { %3703 = vmatpush.bf16.msra.mxu0 %v5427_v40  ;;  %3716 = vmatpush.bf16.msra.mxu1 %v5431_v8  ;;  %v5903_v40 = vld [vmem:[%s6925_s8 + $0xdc] sm:$0xf0]  ;;  %v5044_v8 = vld [vmem:[%s6925_s8 + $0xe0] sm:$0xf0]  ;;  %v5835_v53 = vor.u32 %v6098_v37, %v5834_v35  ;;  %v3448_v57 = vpop.f32.mrf.mxu0  ;;  %v3461_v62 = vpop.f32.mrf.mxu1  ;;  %v6034_v10 = vld [vmem:[%s6925_s8 + $0x4f4] sm:$0xf0] }
 0x1a8   : > { %3729 = vmatpush.bf16.msra.mxu2 %v5435_v11  ;;  %v5050_v11 = vld [vmem:[%s6925_s8 + $0x68] sm:$0xf]  ;;  %v5043_v21 = vor.u32 %v5903_v40, %v5042_v29  ;;  %v6066_v29 = vld [vmem:[%s6925_s8 + $0x5f4] sm:$0xf0]  ;;  %v6050_v40 = vld [vmem:[%s6925_s8 + $0x57c] sm:$0xf] }
 0x1a9   : > { %3742 = vmatpush.bf16.msra.mxu3 %v5439_v16  ;;  %v5826_v16 = vld [vmem:[%s6925_s8 + $0x670] sm:$0xf]  ;;  %v5051_v43 = vor.u32 %v5904_v13, %v5050_v11 }
 0x1aa   : > { %v5827_v50 = vor.u32 %v6097_v20, %v5826_v16  ;;  %v6033_v13 = vld [vmem:[%s6925_s8 + $0x4ec] sm:$0xf0]  ;;  %v5572_v16 = vld [vmem:[%s6925_s8 + $0x4f0] sm:$0xf0]  ;;  %v5578_v20 = vld [vmem:[%s6925_s8 + $0x478] sm:$0xf] }
 0x1ab   : > { %3704 = vmatpush.bf16.msra.mxu0 %v5299_v39  ;;  %3717 = vmatpush.bf16.msra.mxu1 %v5303_v47  ;;  %v5047_v39 = vor.u32 %v5887_v7, %v5044_v8  ;;  %v5836_v47 = vld [vmem:[%s6925_s8 + $0x6f8] sm:$0xf0]  ;;  %v5703_v8 = vor.u32 %v6049_v58, %v5700_v0 }
 0x1ac   : > { %3730 = vmatpush.bf16.msra.mxu2 %v5307_v48  ;;  %v5055_v48 = vor.u32 %v5888_v24, %v5052_v15  ;;  %v5839_v60 = vor.u32 %v6082_v45, %v5836_v47  ;;  %v6017_v24 = vld [vmem:[%s6925_s8 + $0x474] sm:$0xf]  ;;  %v5579_v47 = vor.u32 %v6034_v10, %v5578_v20  ;;  %v5322_v20 = vld [vmem:[%s6925_s8 + $0x278] sm:$0xf] }
 0x1ad   : > { %3743 = vmatpush.bf16.msra.mxu3 %v5311_v38  ;;  %v5698_v38 = vld [vmem:[%s6925_s8 + $0x570] sm:$0xf]  ;;  %v5575_v45 = vor.u32 %v6017_v24, %v5572_v16  ;;  %v5970_v10 = vld [vmem:[%s6925_s8 + $0x2f4] sm:$0xf0] }
 0x1ae   : > { %v5699_v7 = vor.u32 %v6065_v52, %v5698_v38  ;;  %v3449_v38 = vadd.f32 %v3448_v57, %v6877_v59  ;;  %v5969_v57 = vld [vmem:[%s6925_s8 + $0x2ec] sm:$0xf0] }
 0x1af   : > { %3705 = vmatpush.bf16.msra.mxu0 %v5171_v3  ;;  %3718 = vmatpush.bf16.msra.mxu1 %v5175_v46  ;;  %v5706_v3 = vld [vmem:[%s6925_s8 + $0x578] sm:$0xf]  ;;  %v5708_v46 = vld [vmem:[%s6925_s8 + $0x5f8] sm:$0xf0]  ;;  %v3463_v0 = vpop.f32.mrf.mxu1 }
 0x1b0   : > { %3731 = vmatpush.bf16.msra.mxu2 %v5179_v5  ;;  %v3462_v5 = vadd.f32 %v3461_v62, %v6870_v49  ;;  %v5707_v11 = vor.u32 %v6066_v29, %v5706_v3  ;;  %v5711_v15 = vor.u32 %v6050_v40, %v5708_v46  ;;  %v6018_v49 = vld [vmem:[%s6925_s8 + $0x47c] sm:$0xf]  ;;  %v3474_v35 = vpop.f32.mrf.mxu2  ;;  %v5450_v62 = vld [vmem:[%s6925_s8 + $0x378] sm:$0xf]  ;;  %v3813_v24 = vadd.f32 %v7397_v63, %v3449_v38 }
 0x1b1   : > { %3744 = vmatpush.bf16.msra.mxu3 %v5183_v12  ;;  %v5570_v12 = vld [vmem:[%s6925_s8 + $0x470] sm:$0xf]  ;;  %v5986_v29 = vld [vmem:[%s6925_s8 + $0x37c] sm:$0xf] }
 0x1b2   : > { %v3814_v30 = vadd.f32 %v7397_v63, %v3462_v5  ;;  %v5571_v37 = vor.u32 %v6033_v13, %v5570_v12  ;;  %v5452_v40 = vld [vmem:[%s6925_s8 + $0x3f8] sm:$0xf0]  ;;  %v5953_v12 = vld [vmem:[%s6925_s8 + $0x274] sm:$0xf] }
 0x1b3   : > { %3706 = vmatpush.bf16.msra.mxu0 %v5043_v21  ;;  %3719 = vmatpush.bf16.msra.mxu1 %v5047_v39  ;;  %v5580_v21 = vld [vmem:[%s6925_s8 + $0x4f8] sm:$0xf0]  ;;  %v3475_v39 = vadd.f32 %v3474_v35, %v6890_v2  ;;  %v6002_v2 = vld [vmem:[%s6925_s8 + $0x3f4] sm:$0xf0]  ;;  %v5316_v13 = vld [vmem:[%s6925_s8 + $0x2f0] sm:$0xf0]  ;;  %v5455_v16 = vor.u32 %v5986_v29, %v5452_v40 }
 0x1b4   : > { %3732 = vmatpush.bf16.msra.mxu2 %v5051_v43  ;;  %v3487_v43 = vpop.f32.mrf.mxu3  ;;  %v5583_v58 = vor.u32 %v6018_v49, %v5580_v21  ;;  %v3876_v46 = vrot.slane %v3814_v30, 6  ;;  %v5954_v49 = vld [vmem:[%s6925_s8 + $0x27c] sm:$0xf]  ;;  %v5058_v40 = vld [vmem:[%s6925_s8 + $0x70] sm:$0xf] }
 0x1b5   : > { %3745 = vmatpush.bf16.msra.mxu3 %v5055_v48  ;;  %v5442_v48 = vld [vmem:[%s6925_s8 + $0x370] sm:$0xf]  ;;  %v3488_v52 = vadd.f32 %v3487_v43, %v6894_v4  ;;  %v3815_v3 = vadd.f32 %v7397_v63, %v3475_v39  ;;  %v5324_v21 = vld [vmem:[%s6925_s8 + $0x2f8] sm:$0xf0] }
 0x1b6   : > { %5864 = vmatmul.msk.bf16.vlgmr.msra.gmra.mxu0 %vm1844_vm0, %v7334_v17  ;;  %5865 = vmatmul.msk.bf16.vlgmr.msra.gmra.mxu1 %vm1844_vm0, %v7334_v17  ;;  %v5314_v4 = vld [vmem:[%s6925_s8 + $0x270] sm:$0xf]  ;;  %v3903_v30 = vsel %vm3897_vm1, %v3813_v24, %v3876_v46 }
 0x1b7   : > { %3752 = vmatpush.bf16.msrb.mxu0 %v5827_v50  ;;  %3765 = vmatpush.bf16.msrb.mxu1 %v5831_v51  ;;  %v6001_v50 = vld [vmem:[%s6925_s8 + $0x3ec] sm:$0xf0]  ;;  %v5985_v51 = vld [vmem:[%s6925_s8 + $0x374] sm:$0xf]  ;;  %v3816_v5 = vadd.f32 %v7397_v63, %v3488_v52  ;;  %v5327_v52 = vor.u32 %v5954_v49, %v5324_v21 }
 0x1b8   : > { %3778 = vmatpush.bf16.msrb.mxu2 %v5835_v53  ;;  %5867 = vmatmul.msk.bf16.vlgmr.msra.gmra.mxu3 %vm1844_vm0, %v7334_v17  ;;  %v3450_v53 = vpop.f32.mrf.mxu0  ;;  %v5443_v59 = vor.u32 %v6001_v50, %v5442_v48  ;;  %v5186_v39 = vld [vmem:[%s6925_s8 + $0x170] sm:$0xf]  ;;  %v3476_v43 = vpop.f32.mrf.mxu2  ;;  %v5323_v48 = vor.u32 %v5970_v10, %v5322_v20 }
 0x1b9   : > { %3791 = vmatpush.bf16.msrb.mxu3 %v5839_v60  ;;  %5866 = vmatmul.msk.bf16.vlgmr.msra.gmra.mxu2 %vm1844_vm0, %v7334_v17  ;;  %v5444_v60 = vld [vmem:[%s6925_s8 + $0x3f0] sm:$0xf0]  ;;  %v5937_v50 = vld [vmem:[%s6925_s8 + $0x1ec] sm:$0xf0] }
 0x1ba   : > { %v5188_v53 = vld [vmem:[%s6925_s8 + $0x1f0] sm:$0xf0]  ;;  %v5187_v0 = vor.u32 %v5937_v50, %v5186_v39  ;;  %v5905_v46 = vld [vmem:[%s6925_s8 + $0xec] sm:$0xf0] }
 0x1bb   : > { %3753 = vmatpush.bf16.msrb.mxu0 %v5699_v7  ;;  %3766 = vmatpush.bf16.msrb.mxu1 %v5703_v8  ;;  %v3877_v7 = vrot.slane %v3815_v3, 4  ;;  %v5447_v8 = vor.u32 %v5985_v51, %v5444_v60  ;;  %v5921_v51 = vld [vmem:[%s6925_s8 + $0x174] sm:$0xf]  ;;  %v5938_v60 = vld [vmem:[%s6925_s8 + $0x1f4] sm:$0xf0] }
 0x1bc   : > { %3779 = vmatpush.bf16.msrb.mxu2 %v5707_v11  ;;  %v5451_v11 = vor.u32 %v6002_v2, %v5450_v62  ;;  %v3489_v38 = vpop.f32.mrf.mxu3  ;;  %v5922_v62 = vld [vmem:[%s6925_s8 + $0x17c] sm:$0xf]  ;;  %v5191_v3 = vor.u32 %v5921_v51, %v5188_v53 }
 0x1bd   : > { %3792 = vmatpush.bf16.msrb.mxu3 %v5711_v15  ;;  %v3878_v15 = vrot.slane %v3816_v5, 2  ;;  %v5196_v2 = vld [vmem:[%s6925_s8 + $0x1f8] sm:$0xf0]  ;;  %v5889_v5 = vld [vmem:[%s6925_s8 + $0x74] sm:$0xf] }
 0x1bf   : > { %3754 = vmatpush.bf16.msrb.mxu0 %v5571_v37  ;;  %3767 = vmatpush.bf16.msrb.mxu1 %v5575_v45  ;;  %v3904_v35 = vsel %vm3899_vm2, %v3877_v7, %v3878_v15  ;;  %v5315_v37 = vor.u32 %v5969_v57, %v5314_v4  ;;  %v5060_v4 = vld [vmem:[%s6925_s8 + $0xf0] sm:$0xf0]  ;;  %v5066_v57 = vld [vmem:[%s6925_s8 + $0x78] sm:$0xf] }
 0x1c0   : > { %3780 = vmatpush.bf16.msrb.mxu2 %v5579_v47  ;;  %v3905_v45 = vsel %vm3901_vm3, %v3903_v30, %v3904_v35  ;;  %v5319_v47 = vor.u32 %v5953_v12, %v5316_v13  ;;  %v5906_v7 = vld [vmem:[%s6925_s8 + $0xf4] sm:$0xf0]  ;;  %v5059_v12 = vor.u32 %v5905_v46, %v5058_v40  ;;  %v5063_v13 = vor.u32 %v5889_v5, %v5060_v4 }
 0x1c1   : > { %3793 = vmatpush.bf16.msrb.mxu3 %v5583_v58  ;;  %3933 = vst [vmem:[%s7440_s18 + $0x8] sm:$0xff] %v3905_v45  ;;  %v5194_v58 = vld [vmem:[%s6925_s8 + $0x178] sm:$0xf]  ;;  %v5067_v24 = vor.u32 %v5906_v7, %v5066_v57 }
 0x1c2   : > { %v5195_v29 = vor.u32 %v5938_v60, %v5194_v58 }
 0x1c3   : > { %3755 = vmatpush.bf16.msrb.mxu0 %v5443_v59  ;;  %3768 = vmatpush.bf16.msrb.mxu1 %v5447_v8  ;;  %v5199_v59 = vor.u32 %v5922_v62, %v5196_v2  ;;  %v5890_v8 = vld [vmem:[%s6925_s8 + $0x7c] sm:$0xf]  ;;  %v3513_v20 = vpop.f32.mrf.mxu1 }
 0x1c4   : > { %3781 = vmatpush.bf16.msrb.mxu2 %v5451_v11  ;;  %v5068_v11 = vld [vmem:[%s6925_s8 + $0xf8] sm:$0xf0]  ;;  %v3514_v10 = vadd.f32 %v3513_v20, %v6949_v23 }
 0x1c5   : > { %3794 = vmatpush.bf16.msrb.mxu3 %v5455_v16  ;;  %v5071_v15 = vor.u32 %v5890_v8, %v5068_v11  ;;  %v3500_v16 = vpop.f32.mrf.mxu0 }
 0x1c6   : > { %v3818_v49 = vadd.f32 %v7397_v63, %v3514_v10 }
 0x1c7   : > { %3756 = vmatpush.bf16.msrb.mxu0 %v5315_v37  ;;  %3769 = vmatpush.bf16.msrb.mxu1 %v5319_v47  ;;  %v3501_v37 = vadd.f32 %v3500_v16, %v6956_v34 }
 0x1c8   : > { %3782 = vmatpush.bf16.msrb.mxu2 %v5323_v48  ;;  %v3879_v47 = vrot.slane %v3818_v49, 6 }
 0x1c9   : > { %3795 = vmatpush.bf16.msrb.mxu3 %v5327_v52 }
 0x1cb   : > { %3757 = vmatpush.bf16.msrb.mxu0 %v5187_v0  ;;  %3770 = vmatpush.bf16.msrb.mxu1 %v5191_v3  ;;  %v3539_v35 = vpop.f32.mrf.mxu3  ;;  %v3515_v43 = vpop.f32.mrf.mxu1 }
 0x1cc   : > { %3783 = vmatpush.bf16.msrb.mxu2 %v5195_v29  ;;  %v3526_v21 = vpop.f32.mrf.mxu2  ;;  %v3540_v39 = vadd.f32 %v3539_v35, %v6973_v44 }
 0x1cd   : > { %3796 = vmatpush.bf16.msrb.mxu3 %v5199_v59  ;;  %v3527_v30 = vadd.f32 %v3526_v21, %v6969_v42  ;;  %v3502_v23 = vpop.f32.mrf.mxu0 }
 0x1ce   : > { %v3820_v48 = vadd.f32 %v7397_v63, %v3540_v39 }
 0x1cf   : > { %3758 = vmatpush.bf16.msrb.mxu0 %v5059_v12  ;;  %3771 = vmatpush.bf16.msrb.mxu1 %v5063_v13  ;;  %v3819_v45 = vadd.f32 %v7397_v63, %v3527_v30 }
 0x1d0   : > { %3784 = vmatpush.bf16.msrb.mxu2 %v5067_v24  ;;  %v3881_v51 = vrot.slane %v3820_v48, 2 }
 0x1d1   : > { %3797 = vmatpush.bf16.msrb.mxu3 %v5071_v15  ;;  %v3880_v50 = vrot.slane %v3819_v45, 4 }
 0x1d2   : > { %5868 = vmatmul.msk.bf16.vlgmr.msrb.gmra.mxu0 %vm1844_vm0, %v7334_v17  ;;  %5869 = vmatmul.msk.bf16.vlgmr.msrb.gmra.mxu1 %vm1844_vm0, %v7334_v17 }
 0x1d3   : > { %5870 = vmatmul.msk.bf16.vlgmr.msrb.gmra.mxu2 %vm1844_vm0, %v7334_v17  ;;  %v3907_v42 = vsel %vm3899_vm2, %v3880_v50, %v3881_v51  ;;  %v3541_v34 = vpop.f32.mrf.mxu3 }
 0x1d4   : > { %5871 = vmatmul.msk.bf16.vlgmr.msrb.gmra.mxu3 %vm1844_vm0, %v7334_v17  ;;  %v3817_v17 = vadd.f32 %v7397_v63, %v3501_v37  ;;  %v3528_v38 = vpop.f32.mrf.mxu2 }
 0x1d6   : > { %v3906_v53 = vsel %vm3897_vm1, %v3817_v17, %v3879_v47 }
 0x1d7   : > { %v3908_v52 = vsel %vm3901_vm3, %v3906_v53, %v3907_v42 }
 0x1d8   : > { %3934 = vst [vmem:[%s7440_s18 + $0x10] sm:$0xff] %v3908_v52 }
 0x1df   : > { %v3552_v44 = vpop.f32.mrf.mxu0  ;;  %v3565_v58 = vpop.f32.mrf.mxu1 }
 0x1e0   : > { %v3566_v60 = vadd.f32 %v3565_v58, %v7024_v9  ;;  %v3553_v40 = vadd.f32 %v3552_v44, %v7036_v19 }
 0x1e2   : > { %v3822_v62 = vadd.f32 %v7397_v63, %v3566_v60  ;;  %v3821_v9 = vadd.f32 %v7397_v63, %v3553_v40 }
 0x1e4   : > { %v3882_v4 = vrot.slane %v3822_v62, 6 }
 0x1e6   : > { %v3909_v11 = vsel %vm3897_vm1, %v3821_v9, %v3882_v4 }
 0x1e7   : > { %v3591_v3 = vpop.f32.mrf.mxu3  ;;  %v3554_v29 = vpop.f32.mrf.mxu0 }
 0x1e8   : > { %v3578_v2 = vpop.f32.mrf.mxu2  ;;  %v3592_v46 = vadd.f32 %v3591_v3, %v7053_v31  ;;  %v3567_v5 = vpop.f32.mrf.mxu1 }
 0x1e9   : > { %v3579_v0 = vadd.f32 %v3578_v2, %v7049_v28 }
 0x1ea   : > { %v3824_v57 = vadd.f32 %v7397_v63, %v3592_v46 }
 0x1eb   : > { %v3823_v59 = vadd.f32 %v7397_v63, %v3579_v0 }
 0x1ec   : > { %v3884_v8 = vrot.slane %v3824_v57, 2 }
 0x1ed   : > { %v3883_v7 = vrot.slane %v3823_v59, 4 }
 0x1ef   : > { %v3910_v28 = vsel %vm3899_vm2, %v3883_v7, %v3884_v8  ;;  %v3593_v19 = vpop.f32.mrf.mxu3 }
 0x1f0   : > { %v3580_v12 = vpop.f32.mrf.mxu2  ;;  %v3911_v13 = vsel %vm3901_vm3, %v3909_v11, %v3910_v28 }
 0x1f1   : > { %3935 = vst [vmem:[%s7440_s18 + $0x18] sm:$0xff] %v3911_v13 }
 0x1fb   : > { %v3604_v31 = vpop.f32.mrf.mxu0  ;;  %v3617_v24 = vpop.f32.mrf.mxu1 }
 0x1fc   : > { %v3618_v15 = vadd.f32 %v3617_v24, %v7101_v1  ;;  %v3605_v30 = vadd.f32 %v3604_v31, %v7108_v14 }
 0x1fe   : > { %v3826_v16 = vadd.f32 %v7397_v63, %v3618_v15  ;;  %v3825_v1 = vadd.f32 %v7397_v63, %v3605_v30 }
 0x200   : > { %v3885_v39 = vrot.slane %v3826_v16, 6 }
 0x202   : > { %v3912_v48 = vsel %vm3897_vm1, %v3825_v1, %v3885_v39 }
 0x203   : > { %v3643_v49 = vpop.f32.mrf.mxu3  ;;  %v3606_v21 = vpop.f32.mrf.mxu0 }
 0x204   : > { %v3630_v20 = vpop.f32.mrf.mxu2  ;;  %v3644_v35 = vadd.f32 %v3643_v49, %v7125_v26  ;;  %v3619_v23 = vpop.f32.mrf.mxu1 }
 0x205   : > { %v3631_v10 = vadd.f32 %v3630_v20, %v7121_v22 }
 0x206   : > { %v3828_v43 = vadd.f32 %v7397_v63, %v3644_v35 }
 0x207   : > { %v3827_v37 = vadd.f32 %v7397_v63, %v3631_v10 }
 0x208   : > { %v3887_v47 = vrot.slane %v3828_v43, 2 }
 0x209   : > { %v3886_v45 = vrot.slane %v3827_v37, 4 }
 0x20b   : > { %v3913_v22 = vsel %vm3899_vm2, %v3886_v45, %v3887_v47  ;;  %v3645_v14 = vpop.f32.mrf.mxu3 }
 0x20c   : > { %v3632_v50 = vpop.f32.mrf.mxu2  ;;  %v3914_v17 = vsel %vm3901_vm3, %v3912_v48, %v3913_v22 }
 0x20d   : > { %3936 = vst [vmem:[%s7440_s18 + $0x20] sm:$0xff] %v3914_v17 }
 0x217   : > { %v3656_v26 = vpop.f32.mrf.mxu0  ;;  %v3669_v51 = vpop.f32.mrf.mxu1 }
 0x218   : > { %v3670_v53 = vadd.f32 %v3669_v51, %v7173_v6  ;;  %v3657_v58 = vadd.f32 %v3656_v26, %v7180_v18 }
 0x21a   : > { %v3830_v42 = vadd.f32 %v7397_v63, %v3670_v53  ;;  %v3829_v6 = vadd.f32 %v7397_v63, %v3657_v58 }
 0x21c   : > { %v3888_v0 = vrot.slane %v3830_v42, 6 }
 0x21e   : > { %v3915_v46 = vsel %vm3897_vm1, %v3829_v6, %v3888_v0 }
 0x21f   : > { %v3695_v34 = vpop.f32.mrf.mxu3  ;;  %v3658_v44 = vpop.f32.mrf.mxu0 }
 0x220   : > { %v3682_v38 = vpop.f32.mrf.mxu2  ;;  %v3696_v60 = vadd.f32 %v3695_v34, %v7197_v36  ;;  %v3671_v62 = vpop.f32.mrf.mxu1 }
 0x221   : > { %v3683_v52 = vadd.f32 %v3682_v38, %v7193_v33 }
 0x222   : > { %v3832_v3 = vadd.f32 %v7397_v63, %v3696_v60 }
 0x223   : > { %v3831_v2 = vadd.f32 %v7397_v63, %v3683_v52 }
 0x224   : > { %v3890_v40 = vrot.slane %v3832_v3, 2 }
 0x225   : > { %v3889_v29 = vrot.slane %v3831_v2, 4 }
 0x227   : > { %v3916_v33 = vsel %vm3899_vm2, %v3889_v29, %v3890_v40  ;;  %v3697_v18 = vpop.f32.mrf.mxu3 }
 0x228   : > { %v3684_v5 = vpop.f32.mrf.mxu2  ;;  %v3917_v59 = vsel %vm3901_vm3, %v3915_v46, %v3916_v33 }
 0x229   : > { %3937 = vst [vmem:[%s7440_s18 + $0x28] sm:$0xff] %v3917_v59 }
 0x233   : > { %v3708_v36 = vpop.f32.mrf.mxu0  ;;  %v3721_v4 = vpop.f32.mrf.mxu1 }
 0x234   : > { %v3722_v57 = vadd.f32 %v3721_v4, %v7249_v32  ;;  %v3709_v12 = vadd.f32 %v3708_v36, %v7245_v25 }
 0x236   : > { %v3834_v7 = vadd.f32 %v7397_v63, %v3722_v57  ;;  %v3833_v32 = vadd.f32 %v7397_v63, %v3709_v12 }
 0x238   : > { %v3891_v24 = vrot.slane %v3834_v7, 6 }
 0x23a   : > { %v3918_v10 = vsel %vm3897_vm1, %v3833_v32, %v3891_v24 }
 0x23b   : > { %v3747_v11 = vpop.f32.mrf.mxu3  ;;  %v3710_v28 = vpop.f32.mrf.mxu0 }
 0x23c   : > { %v3734_v9 = vpop.f32.mrf.mxu2  ;;  %v3748_v13 = vadd.f32 %v3747_v11, %v7269_v56  ;;  %v3723_v19 = vpop.f32.mrf.mxu1 }
 0x23d   : > { %v3735_v8 = vadd.f32 %v3734_v9, %v7265_v54 }
 0x23e   : > { %v3836_v15 = vadd.f32 %v7397_v63, %v3748_v13 }
 0x23f   : > { %v3835_v31 = vadd.f32 %v7397_v63, %v3735_v8 }
 0x240   : > { %v3893_v20 = vrot.slane %v3836_v15, 2 }
 0x241   : > { %v3892_v16 = vrot.slane %v3835_v31, 4 }
 0x243   : > { %v3919_v54 = vsel %vm3899_vm2, %v3892_v16, %v3893_v20  ;;  %v3749_v25 = vpop.f32.mrf.mxu3 }
 0x244   : > { %v3736_v49 = vpop.f32.mrf.mxu2  ;;  %v3920_v21 = vsel %vm3901_vm3, %v3918_v10, %v3919_v54 }
 0x245   : > { %3938 = vst [vmem:[%s7440_s18 + $0x30] sm:$0xff] %v3920_v21 }
 0x24f   : > { %v3760_v56 = vpop.f32.mrf.mxu0  ;;  %v3773_v30 = vpop.f32.mrf.mxu1 }
 0x250   : > { %v3774_v35 = vadd.f32 %v3773_v30, %v7319_v61  ;;  %v3761_v1 = vadd.f32 %v3760_v56, %v7314_v55 }
 0x252   : > { %v3838_v23 = vadd.f32 %v7397_v63, %v3774_v35  ;;  %v3837_v61 = vadd.f32 %v7397_v63, %v3761_v1 }
 0x254   : > { %v3894_v50 = vrot.slane %v3838_v23, 6 }
 0x256   : > { %v3786_v37 = vpop.f32.mrf.mxu2  ;;  %v3921_v51 = vsel %vm3897_vm1, %v3837_v61, %v3894_v50 }
 0x257   : > { %v3787_v39 = vadd.f32 %v3786_v37, %v7344_v27  ;;  %v3799_v43 = vpop.f32.mrf.mxu3  ;;  %v3762_v45 = vpop.f32.mrf.mxu0 }
 0x258   : > { %v3800_v47 = vadd.f32 %v3799_v43, %v7349_v41  ;;  %v3775_v48 = vpop.f32.mrf.mxu1 }
 0x259   : > { %v3839_v22 = vadd.f32 %v7397_v63, %v3787_v39 }
 0x25a   : > { %v3840_v17 = vadd.f32 %v7397_v63, %v3800_v47 }
 0x25b   : > { %v3895_v14 = vrot.slane %v3839_v22, 4 }
 0x25c   : > { %v3896_v26 = vrot.slane %v3840_v17, 2 }
 0x25e   : > { %v3922_v27 = vsel %vm3899_vm2, %v3895_v14, %v3896_v26  ;;  %v3788_v53 = vpop.f32.mrf.mxu2 }
 0x25f   : > { %v3923_v42 = vsel %vm3901_vm3, %v3921_v51, %v3922_v27  ;;  %v3801_v55 = vpop.f32.mrf.mxu3 }
 0x260   : > { %3939 = vst [vmem:[%s7440_s18 + $0x38] sm:$0xff] %v3923_v42 }
 0x261 PF: > { %s17_s21 = sadd.s32 1, %s6342_s21  }
 0x262   : > { %p14_p4 = scmp.ge.s32.totalorder %s17_s21, 4  }
 0x264   :  { %16 = sbr.rel (!%p14_p4) target bundleno = 1 (0x1), region = 77 }

</bundles_post_ra>
